<compile_context>
chip_gen: v7x
topology: tpu7x:2x2x1
jax: 0.10.0
libtpu: 0.0.40
codegen_flags: <defaults>
</compile_context>

<pallas_src>
import numpy as np

import jax
import jax.numpy as jnp
from jax.experimental import pallas as pl
from jax.experimental.pallas import tpu as pltpu


# ----------------------------- configuration --------------------------------
B = 2                 # batch
H_RES, W_RES = 8, 8   # input_resolution
C = 32                # dim
NUM_HEADS = 4
WINDOW = 4            # window_size
SHIFT = 2             # shift_size (SW-MSA path, exercises the attn mask)
MLP_RATIO = 4.0
L = H_RES * W_RES                               # tokens per image
N_WIN = WINDOW * WINDOW                         # tokens per window
NW = (H_RES // WINDOW) * (W_RES // WINDOW)      # windows per image
HEAD_DIM = C // NUM_HEADS
SCALE = HEAD_DIM ** (-0.5)
MLP_HIDDEN = int(C * MLP_RATIO)
EPS = 1e-5
NEG_INF = -1e9
DTYPE = jnp.float32

assert L == NW * N_WIN


# ------------------------------- glue helpers -------------------------------
def window_partition(x, ws):
    b, h, w, c = x.shape
    x = x.reshape(b, h // ws, ws, w // ws, ws, c)
    x = jnp.transpose(x, (0, 1, 3, 2, 4, 5))
    return x.reshape(-1, ws, ws, c)


def window_reverse(windows, ws, h, w):
    b = windows.shape[0] // (h * w // ws // ws)
    x = windows.reshape(b, h // ws, w // ws, ws, ws, -1)
    x = jnp.transpose(x, (0, 1, 3, 2, 4, 5))
    return x.reshape(b, h, w, -1)


def _gelu_exact(x):
    # PyTorch nn.GELU default (erf based)
    return 0.5 * x * (1.0 + jax.lax.erf(x * (1.0 / np.sqrt(2.0))))


def _build_permutations():
    """Static token permutation: cyclic shift + window partition (and inverse)."""
    idx = np.arange(L).reshape(H_RES, W_RES)
    if SHIFT > 0:
        idx = np.roll(idx, (-SHIFT, -SHIFT), axis=(0, 1))
    idx = idx.reshape(H_RES // WINDOW, WINDOW, W_RES // WINDOW, WINDOW)
    idx = idx.transpose(0, 2, 1, 3).reshape(-1)        # window-order -> token id
    inv = np.argsort(idx)
    return idx.astype(np.int32), inv.astype(np.int32)


PERM, INV_PERM = _build_permutations()


# ------------------------------- Pallas kernel -------------------------------
def swin_block_kernel(x_ref, bias_ref,
                      g1_ref, b1_ref,
                      wq_ref, wk_ref, wv_ref, bq_ref, bk_ref, bv_ref,
                      wp_ref, bp_ref,
                      g2_ref, b2_ref,
                      w1_ref, bfc1_ref, w2_ref, bfc2_ref,
                      out_ref):
    """One grid step == one batch image, all windows, whole block fused."""
    x = x_ref[0]                                        # (L, C), window order

    # ---- LayerNorm1 (per token; commutes with the token permutation) ----
    mu = jnp.mean(x, axis=-1, keepdims=True)
    var = jnp.mean((x - mu) ** 2, axis=-1, keepdims=True)
    xn = (x - mu) * jax.lax.rsqrt(var + EPS)
    xn = xn * g1_ref[...] + b1_ref[...]

    # ---- window attention: all NW windows batched via block-diagonal mask ----
    acc = jnp.zeros((L, C), jnp.float32)
    for h in range(NUM_HEADS):                          # 4x unrolled, MXU matmuls
        q = (jnp.dot(xn, wq_ref[h], preferred_element_type=jnp.float32)
             + bq_ref[h]) * SCALE                       # (L, HEAD_DIM)
        k = jnp.dot(xn, wk_ref[h], preferred_element_type=jnp.float32) + bk_ref[h]
        v = jnp.dot(xn, wv_ref[h], preferred_element_type=jnp.float32) + bv_ref[h]

        # full (L, L) scores; cross-window entries carry -1e9 in bias_ref and
        # underflow to exactly 0 after softmax -> equivalent to per-window attn.
        s = jnp.dot(q, k.T, preferred_element_type=jnp.float32) + bias_ref[h]
        m = jnp.max(s, axis=-1, keepdims=True)
        e = jnp.exp(s - m)
        denom = jnp.sum(e, axis=-1, keepdims=True)
        p = e * pl.reciprocal(denom, approx=True)       # EUP slot

        o = jnp.dot(p, v, preferred_element_type=jnp.float32)       # (L, HEAD_DIM)
        acc = acc + jnp.dot(o, wp_ref[h], preferred_element_type=jnp.float32)

    h1 = x + acc + bp_ref[...]                          # residual 1

    # ---- LayerNorm2 -> MLP -> residual 2 ----
    mu2 = jnp.mean(h1, axis=-1, keepdims=True)
    var2 = jnp.mean((h1 - mu2) ** 2, axis=-1, keepdims=True)
    x2 = (h1 - mu2) * jax.lax.rsqrt(var2 + EPS)
    x2 = x2 * g2_ref[...] + b2_ref[...]

    hid = jnp.dot(x2, w1_ref[...], preferred_element_type=jnp.float32) + bfc1_ref[...]
    hid = _gelu_exact(hid)
    y = jnp.dot(hid, w2_ref[...], preferred_element_type=jnp.float32) + bfc2_ref[...]

    # TODO(synk): output last dim is C=32 (<128 lanes) -> masked stores; a
    # lane-dense (L/4, 4C) store would need an in-kernel reshape, skipped for
    # robustness since the whole output is only 8 KB per step.
    out_ref[0] = (h1 + y).astype(out_ref.dtype)


# ------------------------------- wrapper --------------------------------------
def _full_spec(arr):
    nd = arr.ndim
    return pl.BlockSpec(arr.shape, lambda b, _nd=nd: (0,) * _nd)


def swin_block_forward(x, kp):
    """x: (B, L, C) -> (B, L, C). kp: kernel-ready params (see prepare_kernel_params)."""
    xw = jnp.take(x, PERM, axis=1)          # shift + window-partition (row permutation)

    args = (xw, kp["bias"],
            kp["g1"], kp["b1"],
            kp["wq"], kp["wk"], kp["wv"], kp["bq"], kp["bk"], kp["bv"],
            kp["wp"], kp["bp"],
            kp["g2"], kp["b2"],
            kp["w1"], kp["bfc1"], kp["w2"], kp["bfc2"])

    in_specs = [pl.BlockSpec((1, L, C), lambda b: (b, 0, 0))]
    in_specs += [_full_spec(a) for a in args[1:]]

    out = pl.pallas_call(
        swin_block_kernel,
        out_shape=jax.ShapeDtypeStruct((B, L, C), DTYPE),
        grid=(B,),
        in_specs=in_specs,
        out_specs=pl.BlockSpec((1, L, C), lambda b: (b, 0, 0)),
        compiler_params=pltpu.CompilerParams(
            dimension_semantics=("parallel",)),
    )(*args)

    return jnp.take(out, INV_PERM, axis=1)  # window-reverse + un-shift


# --------------------------- parameter / buffer setup ------------------------
def build_relative_position_index(ws):
    coords = np.stack(np.meshgrid(np.arange(ws), np.arange(ws), indexing="ij"))
    coords_flatten = coords.reshape(2, -1)
    rel = coords_flatten[:, :, None] - coords_flatten[:, None, :]
    rel = rel.transpose(1, 2, 0).astype(np.int64)
    rel[:, :, 0] += ws - 1
    rel[:, :, 1] += ws - 1
    rel[:, :, 0] *= 2 * ws - 1
    return rel.sum(-1)                                   # (N_WIN, N_WIN)


def build_attn_mask(h, w, ws, shift):
    if shift == 0:
        return np.zeros((NW, N_WIN, N_WIN), np.float32)
    img_mask = np.zeros((1, h, w, 1), np.float32)
    slices = (slice(0, -ws), slice(-ws, -shift), slice(-shift, None))
    cnt = 0
    for hs in slices:
        for wsl in slices:
            img_mask[:, hs, wsl, :] = cnt
            cnt += 1
    mw = np.asarray(window_partition(jnp.asarray(img_mask), ws)).reshape(-1, ws * ws)
    attn_mask = mw[:, None, :] - mw[:, :, None]
    attn_mask = np.where(attn_mask != 0, -100.0, 0.0).astype(np.float32)
    return attn_mask                                     # (NW, N_WIN, N_WIN)


def init_params(key):
    ks = jax.random.split(key, 8)
    p = {}
    p["g1"] = jnp.ones((1, C), DTYPE)
    p["b1"] = jnp.zeros((1, C), DTYPE)
    p["g2"] = jnp.ones((1, C), DTYPE)
    p["b2"] = jnp.zeros((1, C), DTYPE)
    # nn.Linear weights are (out, in); we pre-transpose for x @ W^T.
    wqkv = jax.random.normal(ks[0], (3 * C, C), DTYPE) * 0.02
    wproj = jax.random.normal(ks[1], (C, C), DTYPE) * 0.02
    w1 = jax.random.normal(ks[2], (MLP_HIDDEN, C), DTYPE) * 0.02
    w2 = jax.random.normal(ks[3], (C, MLP_HIDDEN), DTYPE) * 0.02
    p["wqkv_t"] = wqkv.T
    p["bqkv"] = (jax.random.normal(ks[4], (3 * C,), DTYPE) * 0.02).reshape(1, -1)
    p["wproj_t"] = wproj.T
    p["bproj"] = jnp.zeros((1, C), DTYPE)
    p["w1_t"] = w1.T
    p["bfc1"] = jnp.zeros((1, MLP_HIDDEN), DTYPE)
    p["w2_t"] = w2.T
    p["bfc2"] = jnp.zeros((1, C), DTYPE)
    table = 0.02 * jax.random.truncated_normal(
        ks[5], -2.0, 2.0, ((2 * WINDOW - 1) ** 2, NUM_HEADS), DTYPE)
    p["rpb_table"] = table
    return p


def build_bias_mask(params):
    """Reference layout: (NW, NUM_HEADS, N_WIN, N_WIN)."""
    idx = build_relative_position_index(WINDOW)
    rpb = params["rpb_table"][jnp.asarray(idx.reshape(-1))]
    rpb = rpb.reshape(N_WIN, N_WIN, NUM_HEADS).transpose(2, 0, 1)
    mask = jnp.asarray(build_attn_mask(H_RES, W_RES, WINDOW, SHIFT))
    return (rpb[None, :, :, :] + mask[:, None, :, :]).astype(DTYPE)


def build_bias_big(params):
    """Kernel layout: (NUM_HEADS, L, L) block-diagonal (rel-pos bias + shift mask),
    with -1e9 on cross-window blocks so full-row softmax equals per-window softmax."""
    idx = build_relative_position_index(WINDOW)
    rpb = params["rpb_table"][jnp.asarray(idx.reshape(-1))]
    rpb = rpb.reshape(N_WIN, N_WIN, NUM_HEADS).transpose(2, 0, 1)      # (nh, N, N)
    msk = jnp.asarray(build_attn_mask(H_RES, W_RES, WINDOW, SHIFT))    # (NW, N, N)
    diag = rpb[:, None, :, :] + msk[None, :, :, :]                     # (nh, NW, N, N)
    eye = jnp.eye(NW, dtype=bool)[None, :, None, :, None]              # (1, NW, 1, NW, 1)
    big = jnp.where(eye, diag[:, :, :, None, :], jnp.float32(NEG_INF))
    return big.reshape(NUM_HEADS, L, L).astype(DTYPE)


def prepare_kernel_params(params):
    """Re-pack PyTorch-style params into head-major, kernel-friendly arrays."""
    kp = {}
    kp["g1"], kp["b1"] = params["g1"], params["b1"]
    kp["g2"], kp["b2"] = params["g2"], params["b2"]

    wqkv_t = params["wqkv_t"]                    # (C, 3C) == W_qkv^T
    bqkv = params["bqkv"][0]                     # (3C,)

    def split_heads(w2d):                        # (C, C) -> (heads, C, head_dim)
        return w2d.reshape(C, NUM_HEADS, HEAD_DIM).transpose(1, 0, 2)

    kp["wq"] = split_heads(wqkv_t[:, 0 * C:1 * C])
    kp["wk"] = split_heads(wqkv_t[:, 1 * C:2 * C])
    kp["wv"] = split_heads(wqkv_t[:, 2 * C:3 * C])
    kp["bq"] = bqkv[0 * C:1 * C].reshape(NUM_HEADS, 1, HEAD_DIM)
    kp["bk"] = bqkv[1 * C:2 * C].reshape(NUM_HEADS, 1, HEAD_DIM)
    kp["bv"] = bqkv[2 * C:3 * C].reshape(NUM_HEADS, 1, HEAD_DIM)

    kp["wp"] = params["wproj_t"].reshape(NUM_HEADS, HEAD_DIM, C)   # (heads, hd, C)
    kp["bp"] = params["bproj"]

    kp["w1"], kp["bfc1"] = params["w1_t"], params["bfc1"]
    kp["w2"], kp["bfc2"] = params["w2_t"], params["bfc2"]

    kp["bias"] = build_bias_big(params)
    return kp


# ------------------------------ pure-JAX reference ---------------------------
def reference_forward(x, params, bias_mask):
    def ln(v, g, b):
        m = v.mean(-1, keepdims=True)
        var = ((v - m) ** 2).mean(-1, keepdims=True)
        return (v - m) / jnp.sqrt(var + EPS) * g + b

    b = x.shape[0]
    shortcut = x
    xn = ln(x, params["g1"], params["b1"]).reshape(b, H_RES, W_RES, C)
    if SHIFT > 0:
        xn = jnp.roll(xn, shift=(-SHIFT, -SHIFT), axis=(1, 2))
    xw = window_partition(xn, WINDOW).reshape(-1, N_WIN, C)
    qkv = xw @ params["wqkv_t"] + params["bqkv"]
    qkv = qkv.reshape(-1, N_WIN, 3, NUM_HEADS, HEAD_DIM).transpose(2, 0, 3, 1, 4)
    q, k, v = qkv[0] * SCALE, qkv[1], qkv[2]
    attn = q @ jnp.swapaxes(k, -2, -1)                       # (B*NW, nh, N, N)
    attn = attn.reshape(b, NW, NUM_HEADS, N_WIN, N_WIN) + bias_mask[None]
    attn = jax.nn.softmax(attn.reshape(-1, NUM_HEADS, N_WIN, N_WIN), axis=-1)
    out = (attn @ v).transpose(0, 2, 1, 3).reshape(-1, N_WIN, C)
    out = out @ params["wproj_t"] + params["bproj"]
    out = window_reverse(out.reshape(-1, WINDOW, WINDOW, C), WINDOW, H_RES, W_RES)
    if SHIFT > 0:
        out = jnp.roll(out, shift=(SHIFT, SHIFT), axis=(1, 2))
    h1 = shortcut + out.reshape(b, L, C)
    xn2 = ln(h1, params["g2"], params["b2"])
    hid = _gelu_exact(xn2 @ params["w1_t"] + params["bfc1"])
    return h1 + (hid @ params["w2_t"] + params["bfc2"])


# ----------------------------------- main ------------------------------------
if __name__ == "__main__":
    key = jax.random.PRNGKey(0)
    kx, kparam = jax.random.split(key)
    x = jax.random.normal(kx, (B, L, C), DTYPE)
    params = init_params(kparam)
    kernel_params = prepare_kernel_params(params)

    fwd = jax.jit(swin_block_forward)
    out = jax.block_until_ready(fwd(x, kernel_params))

    ref = reference_forward(x, params, build_bias_mask(params))
    err = float(jnp.max(jnp.abs(out - ref)))
    assert out.shape == (B, L, C)
    assert err < 1e-3, f"mismatch vs reference: {err}"
    print("KERNEL_OK")
</pallas_src>

<mosaic_0001>
module attributes {stable_mosaic.version = 11 : i64} {
  func.func @swin_block_kernel(%arg0: i32, %arg1: memref<1x64x32xf32, #tpu.memory_space<vmem>>, %arg2: memref<4x64x64xf32, #tpu.memory_space<vmem>>, %arg3: memref<1x32xf32, #tpu.memory_space<vmem>>, %arg4: memref<1x32xf32, #tpu.memory_space<vmem>>, %arg5: memref<4x32x8xf32, #tpu.memory_space<vmem>>, %arg6: memref<4x32x8xf32, #tpu.memory_space<vmem>>, %arg7: memref<4x32x8xf32, #tpu.memory_space<vmem>>, %arg8: memref<4x1x8xf32, #tpu.memory_space<vmem>>, %arg9: memref<4x1x8xf32, #tpu.memory_space<vmem>>, %arg10: memref<4x1x8xf32, #tpu.memory_space<vmem>>, %arg11: memref<4x8x32xf32, #tpu.memory_space<vmem>>, %arg12: memref<1x32xf32, #tpu.memory_space<vmem>>, %arg13: memref<1x32xf32, #tpu.memory_space<vmem>>, %arg14: memref<1x32xf32, #tpu.memory_space<vmem>>, %arg15: memref<32x128xf32, #tpu.memory_space<vmem>>, %arg16: memref<1x128xf32, #tpu.memory_space<vmem>>, %arg17: memref<128x32xf32, #tpu.memory_space<vmem>>, %arg18: memref<1x32xf32, #tpu.memory_space<vmem>>, %arg19: memref<1x64x32xf32, #tpu.memory_space<vmem>>) attributes {dimension_semantics = [#tpu.dimension_semantics<parallel>], iteration_bounds = array<i64: 2>, scalar_prefetch = 0 : i64, scratch_operands = 0 : i64, tpu.core_type = #tpu.core_type<tc>, window_params = [{transform_indices = @transform_0, window_bounds = array<i64: 1, 64, 32>}, {pipeline_mode = #tpu.pipeline_mode<synchronous>, transform_indices = @transform_1, window_bounds = array<i64: 4, 64, 64>}, {pipeline_mode = #tpu.pipeline_mode<synchronous>, transform_indices = @transform_2, window_bounds = array<i64: 1, 32>}, {pipeline_mode = #tpu.pipeline_mode<synchronous>, transform_indices = @transform_3, window_bounds = array<i64: 1, 32>}, {pipeline_mode = #tpu.pipeline_mode<synchronous>, transform_indices = @transform_4, window_bounds = array<i64: 4, 32, 8>}, {pipeline_mode = #tpu.pipeline_mode<synchronous>, transform_indices = @transform_5, window_bounds = array<i64: 4, 32, 8>}, {pipeline_mode = #tpu.pipeline_mode<synchronous>, transform_indices = @transform_6, window_bounds = array<i64: 4, 32, 8>}, {pipeline_mode = #tpu.pipeline_mode<synchronous>, transform_indices = @transform_7, window_bounds = array<i64: 4, 1, 8>}, {pipeline_mode = #tpu.pipeline_mode<synchronous>, transform_indices = @transform_8, window_bounds = array<i64: 4, 1, 8>}, {pipeline_mode = #tpu.pipeline_mode<synchronous>, transform_indices = @transform_9, window_bounds = array<i64: 4, 1, 8>}, {pipeline_mode = #tpu.pipeline_mode<synchronous>, transform_indices = @transform_10, window_bounds = array<i64: 4, 8, 32>}, {pipeline_mode = #tpu.pipeline_mode<synchronous>, transform_indices = @transform_11, window_bounds = array<i64: 1, 32>}, {pipeline_mode = #tpu.pipeline_mode<synchronous>, transform_indices = @transform_12, window_bounds = array<i64: 1, 32>}, {pipeline_mode = #tpu.pipeline_mode<synchronous>, transform_indices = @transform_13, window_bounds = array<i64: 1, 32>}, {pipeline_mode = #tpu.pipeline_mode<synchronous>, transform_indices = @transform_14, window_bounds = array<i64: 32, 128>}, {pipeline_mode = #tpu.pipeline_mode<synchronous>, transform_indices = @transform_15, window_bounds = array<i64: 1, 128>}, {pipeline_mode = #tpu.pipeline_mode<synchronous>, transform_indices = @transform_16, window_bounds = array<i64: 128, 32>}, {pipeline_mode = #tpu.pipeline_mode<synchronous>, transform_indices = @transform_17, window_bounds = array<i64: 1, 32>}, {transform_indices = @transform_18, window_bounds = array<i64: 1, 64, 32>}]} {
    %c0 = arith.constant 0 : index
    %c0_0 = arith.constant 0 : index
    %c0_1 = arith.constant 0 : index
    %0 = vector.load %arg1[%c0, %c0_0, %c0_1] : memref<1x64x32xf32, #tpu.memory_space<vmem>>, vector<1x64x32xf32>
    %1 = vector.shape_cast %0 : vector<1x64x32xf32> to vector<64x32xf32>
    %cst = arith.constant dense<0.000000e+00> : vector<64xf32>
    %2 = vector.multi_reduction <add>, %1, %cst [1] : vector<64x32xf32> to vector<64xf32>
    %3 = vector.shape_cast %2 : vector<64xf32> to vector<64x1xf32>
    %cst_2 = arith.constant 3.200000e+01 : f32
    %4 = vector.broadcast %cst_2 : f32 to vector<64x1xf32>
    %5 = arith.divf %3, %4 : vector<64x1xf32>
    %6 = vector.broadcast %5 : vector<64x1xf32> to vector<64x32xf32>
    %7 = arith.subf %1, %6 : vector<64x32xf32>
    %8 = arith.mulf %7, %7 : vector<64x32xf32>
    %cst_3 = arith.constant dense<0.000000e+00> : vector<64xf32>
    %9 = vector.multi_reduction <add>, %8, %cst_3 [1] : vector<64x32xf32> to vector<64xf32>
    %10 = vector.shape_cast %9 : vector<64xf32> to vector<64x1xf32>
    %cst_4 = arith.constant 3.200000e+01 : f32
    %11 = vector.broadcast %cst_4 : f32 to vector<64x1xf32>
    %12 = arith.divf %10, %11 : vector<64x1xf32>
    %13 = vector.broadcast %5 : vector<64x1xf32> to vector<64x32xf32>
    %14 = arith.subf %1, %13 : vector<64x32xf32>
    %cst_5 = arith.constant 9.99999974E-6 : f32
    %15 = vector.broadcast %cst_5 : f32 to vector<64x1xf32>
    %16 = arith.addf %12, %15 : vector<64x1xf32>
    %17 = math.rsqrt %16 : vector<64x1xf32>
    %18 = vector.broadcast %17 : vector<64x1xf32> to vector<64x32xf32>
    %19 = arith.mulf %14, %18 : vector<64x32xf32>
    %c0_6 = arith.constant 0 : index
    %c0_7 = arith.constant 0 : index
    %20 = vector.load %arg3[%c0_6, %c0_7] : memref<1x32xf32, #tpu.memory_space<vmem>>, vector<1x32xf32>
    %21 = vector.broadcast %20 : vector<1x32xf32> to vector<64x32xf32>
    %22 = arith.mulf %19, %21 : vector<64x32xf32>
    %c0_8 = arith.constant 0 : index
    %c0_9 = arith.constant 0 : index
    %23 = vector.load %arg4[%c0_8, %c0_9] : memref<1x32xf32, #tpu.memory_space<vmem>>, vector<1x32xf32>
    %24 = vector.broadcast %23 : vector<1x32xf32> to vector<64x32xf32>
    %25 = arith.addf %22, %24 : vector<64x32xf32>
    %cst_10 = arith.constant 0.000000e+00 : f32
    %26 = vector.broadcast %cst_10 : f32 to vector<64x32xf32>
    %c0_11 = arith.constant 0 : index
    %c0_12 = arith.constant 0 : index
    %c0_13 = arith.constant 0 : index
    %27 = vector.load %arg5[%c0_11, %c0_12, %c0_13] : memref<4x32x8xf32, #tpu.memory_space<vmem>>, vector<1x32x8xf32>
    %28 = vector.shape_cast %27 : vector<1x32x8xf32> to vector<32x8xf32>
    %cst_14 = arith.constant dense<0.000000e+00> : vector<64x8xf32>
    %29 = tpu.matmul %25, %28, %cst_14 {dimension_numbers = #tpu.dot_dimension_numbers<[1], [0], [0], [1], [0, 0, 1, 1], [], []>} : vector<64x32xf32>, vector<32x8xf32>, vector<64x8xf32> -> vector<64x8xf32>
    %c0_15 = arith.constant 0 : index
    %c0_16 = arith.constant 0 : index
    %c0_17 = arith.constant 0 : index
    %30 = vector.load %arg8[%c0_15, %c0_16, %c0_17] : memref<4x1x8xf32, #tpu.memory_space<vmem>>, vector<1x1x8xf32>
    %31 = vector.shape_cast %30 : vector<1x1x8xf32> to vector<1x8xf32>
    %32 = vector.broadcast %31 : vector<1x8xf32> to vector<64x8xf32>
    %33 = arith.addf %29, %32 : vector<64x8xf32>
    %cst_18 = arith.constant 0.353553385 : f32
    %34 = vector.broadcast %cst_18 : f32 to vector<64x8xf32>
    %35 = arith.mulf %33, %34 : vector<64x8xf32>
    %c0_19 = arith.constant 0 : index
    %c0_20 = arith.constant 0 : index
    %c0_21 = arith.constant 0 : index
    %36 = vector.load %arg6[%c0_19, %c0_20, %c0_21] : memref<4x32x8xf32, #tpu.memory_space<vmem>>, vector<1x32x8xf32>
    %37 = vector.shape_cast %36 : vector<1x32x8xf32> to vector<32x8xf32>
    %cst_22 = arith.constant dense<0.000000e+00> : vector<64x8xf32>
    %38 = tpu.matmul %25, %37, %cst_22 {dimension_numbers = #tpu.dot_dimension_numbers<[1], [0], [0], [1], [0, 0, 1, 1], [], []>} : vector<64x32xf32>, vector<32x8xf32>, vector<64x8xf32> -> vector<64x8xf32>
    %c0_23 = arith.constant 0 : index
    %c0_24 = arith.constant 0 : index
    %c0_25 = arith.constant 0 : index
    %39 = vector.load %arg9[%c0_23, %c0_24, %c0_25] : memref<4x1x8xf32, #tpu.memory_space<vmem>>, vector<1x1x8xf32>
    %40 = vector.shape_cast %39 : vector<1x1x8xf32> to vector<1x8xf32>
    %41 = vector.broadcast %40 : vector<1x8xf32> to vector<64x8xf32>
    %42 = arith.addf %38, %41 : vector<64x8xf32>
    %c0_26 = arith.constant 0 : index
    %c0_27 = arith.constant 0 : index
    %c0_28 = arith.constant 0 : index
    %43 = vector.load %arg7[%c0_26, %c0_27, %c0_28] : memref<4x32x8xf32, #tpu.memory_space<vmem>>, vector<1x32x8xf32>
    %44 = vector.shape_cast %43 : vector<1x32x8xf32> to vector<32x8xf32>
    %cst_29 = arith.constant dense<0.000000e+00> : vector<64x8xf32>
    %45 = tpu.matmul %25, %44, %cst_29 {dimension_numbers = #tpu.dot_dimension_numbers<[1], [0], [0], [1], [0, 0, 1, 1], [], []>} : vector<64x32xf32>, vector<32x8xf32>, vector<64x8xf32> -> vector<64x8xf32>
    %c0_30 = arith.constant 0 : index
    %c0_31 = arith.constant 0 : index
    %c0_32 = arith.constant 0 : index
    %46 = vector.load %arg10[%c0_30, %c0_31, %c0_32] : memref<4x1x8xf32, #tpu.memory_space<vmem>>, vector<1x1x8xf32>
    %47 = vector.shape_cast %46 : vector<1x1x8xf32> to vector<1x8xf32>
    %48 = vector.broadcast %47 : vector<1x8xf32> to vector<64x8xf32>
    %49 = arith.addf %45, %48 : vector<64x8xf32>
    %50 = tpu.transpose %42, [1, 0] : vector<64x8xf32> -> vector<8x64xf32>
    %cst_33 = arith.constant dense<0.000000e+00> : vector<64x64xf32>
    %51 = tpu.matmul %35, %50, %cst_33 {dimension_numbers = #tpu.dot_dimension_numbers<[1], [0], [0], [1], [0, 0, 1, 1], [], []>} : vector<64x8xf32>, vector<8x64xf32>, vector<64x64xf32> -> vector<64x64xf32>
    %c0_34 = arith.constant 0 : index
    %c0_35 = arith.constant 0 : index
    %c0_36 = arith.constant 0 : index
    %52 = vector.load %arg2[%c0_34, %c0_35, %c0_36] : memref<4x64x64xf32, #tpu.memory_space<vmem>>, vector<1x64x64xf32>
    %53 = vector.shape_cast %52 : vector<1x64x64xf32> to vector<64x64xf32>
    %54 = arith.addf %51, %53 : vector<64x64xf32>
    %cst_37 = arith.constant dense<0xFF800000> : vector<64xf32>
    %55 = vector.multi_reduction <maximumf>, %54, %cst_37 [1] : vector<64x64xf32> to vector<64xf32>
    %56 = vector.shape_cast %55 : vector<64xf32> to vector<64x1xf32>
    %57 = vector.broadcast %56 : vector<64x1xf32> to vector<64x64xf32>
    %58 = arith.subf %54, %57 : vector<64x64xf32>
    %59 = math.exp %58 : vector<64x64xf32>
    %cst_38 = arith.constant dense<0.000000e+00> : vector<64xf32>
    %60 = vector.multi_reduction <add>, %59, %cst_38 [1] : vector<64x64xf32> to vector<64xf32>
    %61 = vector.shape_cast %60 : vector<64xf32> to vector<64x1xf32>
    %62 = tpu.reciprocal %61 {approx = true} : vector<64x1xf32> -> vector<64x1xf32>
    %63 = vector.broadcast %62 : vector<64x1xf32> to vector<64x64xf32>
    %64 = arith.mulf %59, %63 : vector<64x64xf32>
    %cst_39 = arith.constant dense<0.000000e+00> : vector<64x8xf32>
    %65 = tpu.matmul %64, %49, %cst_39 {dimension_numbers = #tpu.dot_dimension_numbers<[1], [0], [0], [1], [0, 0, 1, 1], [], []>} : vector<64x64xf32>, vector<64x8xf32>, vector<64x8xf32> -> vector<64x8xf32>
    %c0_40 = arith.constant 0 : index
    %c0_41 = arith.constant 0 : index
    %c0_42 = arith.constant 0 : index
    %66 = vector.load %arg11[%c0_40, %c0_41, %c0_42] : memref<4x8x32xf32, #tpu.memory_space<vmem>>, vector<1x8x32xf32>
    %67 = vector.shape_cast %66 : vector<1x8x32xf32> to vector<8x32xf32>
    %cst_43 = arith.constant dense<0.000000e+00> : vector<64x32xf32>
    %68 = tpu.matmul %65, %67, %cst_43 {dimension_numbers = #tpu.dot_dimension_numbers<[1], [0], [0], [1], [0, 0, 1, 1], [], []>} : vector<64x8xf32>, vector<8x32xf32>, vector<64x32xf32> -> vector<64x32xf32>
    %69 = arith.addf %26, %68 : vector<64x32xf32>
    %c1 = arith.constant 1 : index
    %c0_44 = arith.constant 0 : index
    %c0_45 = arith.constant 0 : index
    %70 = vector.load %arg5[%c1, %c0_44, %c0_45] : memref<4x32x8xf32, #tpu.memory_space<vmem>>, vector<1x32x8xf32>
    %71 = vector.shape_cast %70 : vector<1x32x8xf32> to vector<32x8xf32>
    %cst_46 = arith.constant dense<0.000000e+00> : vector<64x8xf32>
    %72 = tpu.matmul %25, %71, %cst_46 {dimension_numbers = #tpu.dot_dimension_numbers<[1], [0], [0], [1], [0, 0, 1, 1], [], []>} : vector<64x32xf32>, vector<32x8xf32>, vector<64x8xf32> -> vector<64x8xf32>
    %c1_47 = arith.constant 1 : index
    %c0_48 = arith.constant 0 : index
    %c0_49 = arith.constant 0 : index
    %73 = vector.load %arg8[%c1_47, %c0_48, %c0_49] : memref<4x1x8xf32, #tpu.memory_space<vmem>>, vector<1x1x8xf32>
    %74 = vector.shape_cast %73 : vector<1x1x8xf32> to vector<1x8xf32>
    %75 = vector.broadcast %74 : vector<1x8xf32> to vector<64x8xf32>
    %76 = arith.addf %72, %75 : vector<64x8xf32>
    %cst_50 = arith.constant 0.353553385 : f32
    %77 = vector.broadcast %cst_50 : f32 to vector<64x8xf32>
    %78 = arith.mulf %76, %77 : vector<64x8xf32>
    %c1_51 = arith.constant 1 : index
    %c0_52 = arith.constant 0 : index
    %c0_53 = arith.constant 0 : index
    %79 = vector.load %arg6[%c1_51, %c0_52, %c0_53] : memref<4x32x8xf32, #tpu.memory_space<vmem>>, vector<1x32x8xf32>
    %80 = vector.shape_cast %79 : vector<1x32x8xf32> to vector<32x8xf32>
    %cst_54 = arith.constant dense<0.000000e+00> : vector<64x8xf32>
    %81 = tpu.matmul %25, %80, %cst_54 {dimension_numbers = #tpu.dot_dimension_numbers<[1], [0], [0], [1], [0, 0, 1, 1], [], []>} : vector<64x32xf32>, vector<32x8xf32>, vector<64x8xf32> -> vector<64x8xf32>
    %c1_55 = arith.constant 1 : index
    %c0_56 = arith.constant 0 : index
    %c0_57 = arith.constant 0 : index
    %82 = vector.load %arg9[%c1_55, %c0_56, %c0_57] : memref<4x1x8xf32, #tpu.memory_space<vmem>>, vector<1x1x8xf32>
    %83 = vector.shape_cast %82 : vector<1x1x8xf32> to vector<1x8xf32>
    %84 = vector.broadcast %83 : vector<1x8xf32> to vector<64x8xf32>
    %85 = arith.addf %81, %84 : vector<64x8xf32>
    %c1_58 = arith.constant 1 : index
    %c0_59 = arith.constant 0 : index
    %c0_60 = arith.constant 0 : index
    %86 = vector.load %arg7[%c1_58, %c0_59, %c0_60] : memref<4x32x8xf32, #tpu.memory_space<vmem>>, vector<1x32x8xf32>
    %87 = vector.shape_cast %86 : vector<1x32x8xf32> to vector<32x8xf32>
    %cst_61 = arith.constant dense<0.000000e+00> : vector<64x8xf32>
    %88 = tpu.matmul %25, %87, %cst_61 {dimension_numbers = #tpu.dot_dimension_numbers<[1], [0], [0], [1], [0, 0, 1, 1], [], []>} : vector<64x32xf32>, vector<32x8xf32>, vector<64x8xf32> -> vector<64x8xf32>
    %c1_62 = arith.constant 1 : index
    %c0_63 = arith.constant 0 : index
    %c0_64 = arith.constant 0 : index
    %89 = vector.load %arg10[%c1_62, %c0_63, %c0_64] : memref<4x1x8xf32, #tpu.memory_space<vmem>>, vector<1x1x8xf32>
    %90 = vector.shape_cast %89 : vector<1x1x8xf32> to vector<1x8xf32>
    %91 = vector.broadcast %90 : vector<1x8xf32> to vector<64x8xf32>
    %92 = arith.addf %88, %91 : vector<64x8xf32>
    %93 = tpu.transpose %85, [1, 0] : vector<64x8xf32> -> vector<8x64xf32>
    %cst_65 = arith.constant dense<0.000000e+00> : vector<64x64xf32>
    %94 = tpu.matmul %78, %93, %cst_65 {dimension_numbers = #tpu.dot_dimension_numbers<[1], [0], [0], [1], [0, 0, 1, 1], [], []>} : vector<64x8xf32>, vector<8x64xf32>, vector<64x64xf32> -> vector<64x64xf32>
    %c1_66 = arith.constant 1 : index
    %c0_67 = arith.constant 0 : index
    %c0_68 = arith.constant 0 : index
    %95 = vector.load %arg2[%c1_66, %c0_67, %c0_68] : memref<4x64x64xf32, #tpu.memory_space<vmem>>, vector<1x64x64xf32>
    %96 = vector.shape_cast %95 : vector<1x64x64xf32> to vector<64x64xf32>
    %97 = arith.addf %94, %96 : vector<64x64xf32>
    %cst_69 = arith.constant dense<0xFF800000> : vector<64xf32>
    %98 = vector.multi_reduction <maximumf>, %97, %cst_69 [1] : vector<64x64xf32> to vector<64xf32>
    %99 = vector.shape_cast %98 : vector<64xf32> to vector<64x1xf32>
    %100 = vector.broadcast %99 : vector<64x1xf32> to vector<64x64xf32>
    %101 = arith.subf %97, %100 : vector<64x64xf32>
    %102 = math.exp %101 : vector<64x64xf32>
    %cst_70 = arith.constant dense<0.000000e+00> : vector<64xf32>
    %103 = vector.multi_reduction <add>, %102, %cst_70 [1] : vector<64x64xf32> to vector<64xf32>
    %104 = vector.shape_cast %103 : vector<64xf32> to vector<64x1xf32>
    %105 = tpu.reciprocal %104 {approx = true} : vector<64x1xf32> -> vector<64x1xf32>
    %106 = vector.broadcast %105 : vector<64x1xf32> to vector<64x64xf32>
    %107 = arith.mulf %102, %106 : vector<64x64xf32>
    %cst_71 = arith.constant dense<0.000000e+00> : vector<64x8xf32>
    %108 = tpu.matmul %107, %92, %cst_71 {dimension_numbers = #tpu.dot_dimension_numbers<[1], [0], [0], [1], [0, 0, 1, 1], [], []>} : vector<64x64xf32>, vector<64x8xf32>, vector<64x8xf32> -> vector<64x8xf32>
    %c1_72 = arith.constant 1 : index
    %c0_73 = arith.constant 0 : index
    %c0_74 = arith.constant 0 : index
    %109 = vector.load %arg11[%c1_72, %c0_73, %c0_74] : memref<4x8x32xf32, #tpu.memory_space<vmem>>, vector<1x8x32xf32>
    %110 = vector.shape_cast %109 : vector<1x8x32xf32> to vector<8x32xf32>
    %cst_75 = arith.constant dense<0.000000e+00> : vector<64x32xf32>
    %111 = tpu.matmul %108, %110, %cst_75 {dimension_numbers = #tpu.dot_dimension_numbers<[1], [0], [0], [1], [0, 0, 1, 1], [], []>} : vector<64x8xf32>, vector<8x32xf32>, vector<64x32xf32> -> vector<64x32xf32>
    %112 = arith.addf %69, %111 : vector<64x32xf32>
    %c2 = arith.constant 2 : index
    %c0_76 = arith.constant 0 : index
    %c0_77 = arith.constant 0 : index
    %113 = vector.load %arg5[%c2, %c0_76, %c0_77] : memref<4x32x8xf32, #tpu.memory_space<vmem>>, vector<1x32x8xf32>
    %114 = vector.shape_cast %113 : vector<1x32x8xf32> to vector<32x8xf32>
    %cst_78 = arith.constant dense<0.000000e+00> : vector<64x8xf32>
    %115 = tpu.matmul %25, %114, %cst_78 {dimension_numbers = #tpu.dot_dimension_numbers<[1], [0], [0], [1], [0, 0, 1, 1], [], []>} : vector<64x32xf32>, vector<32x8xf32>, vector<64x8xf32> -> vector<64x8xf32>
    %c2_79 = arith.constant 2 : index
    %c0_80 = arith.constant 0 : index
    %c0_81 = arith.constant 0 : index
    %116 = vector.load %arg8[%c2_79, %c0_80, %c0_81] : memref<4x1x8xf32, #tpu.memory_space<vmem>>, vector<1x1x8xf32>
    %117 = vector.shape_cast %116 : vector<1x1x8xf32> to vector<1x8xf32>
    %118 = vector.broadcast %117 : vector<1x8xf32> to vector<64x8xf32>
    %119 = arith.addf %115, %118 : vector<64x8xf32>
    %cst_82 = arith.constant 0.353553385 : f32
    %120 = vector.broadcast %cst_82 : f32 to vector<64x8xf32>
    %121 = arith.mulf %119, %120 : vector<64x8xf32>
    %c2_83 = arith.constant 2 : index
    %c0_84 = arith.constant 0 : index
    %c0_85 = arith.constant 0 : index
    %122 = vector.load %arg6[%c2_83, %c0_84, %c0_85] : memref<4x32x8xf32, #tpu.memory_space<vmem>>, vector<1x32x8xf32>
    %123 = vector.shape_cast %122 : vector<1x32x8xf32> to vector<32x8xf32>
    %cst_86 = arith.constant dense<0.000000e+00> : vector<64x8xf32>
    %124 = tpu.matmul %25, %123, %cst_86 {dimension_numbers = #tpu.dot_dimension_numbers<[1], [0], [0], [1], [0, 0, 1, 1], [], []>} : vector<64x32xf32>, vector<32x8xf32>, vector<64x8xf32> -> vector<64x8xf32>
    %c2_87 = arith.constant 2 : index
    %c0_88 = arith.constant 0 : index
    %c0_89 = arith.constant 0 : index
    %125 = vector.load %arg9[%c2_87, %c0_88, %c0_89] : memref<4x1x8xf32, #tpu.memory_space<vmem>>, vector<1x1x8xf32>
    %126 = vector.shape_cast %125 : vector<1x1x8xf32> to vector<1x8xf32>
    %127 = vector.broadcast %126 : vector<1x8xf32> to vector<64x8xf32>
    %128 = arith.addf %124, %127 : vector<64x8xf32>
    %c2_90 = arith.constant 2 : index
    %c0_91 = arith.constant 0 : index
    %c0_92 = arith.constant 0 : index
    %129 = vector.load %arg7[%c2_90, %c0_91, %c0_92] : memref<4x32x8xf32, #tpu.memory_space<vmem>>, vector<1x32x8xf32>
    %130 = vector.shape_cast %129 : vector<1x32x8xf32> to vector<32x8xf32>
    %cst_93 = arith.constant dense<0.000000e+00> : vector<64x8xf32>
    %131 = tpu.matmul %25, %130, %cst_93 {dimension_numbers = #tpu.dot_dimension_numbers<[1], [0], [0], [1], [0, 0, 1, 1], [], []>} : vector<64x32xf32>, vector<32x8xf32>, vector<64x8xf32> -> vector<64x8xf32>
    %c2_94 = arith.constant 2 : index
    %c0_95 = arith.constant 0 : index
    %c0_96 = arith.constant 0 : index
    %132 = vector.load %arg10[%c2_94, %c0_95, %c0_96] : memref<4x1x8xf32, #tpu.memory_space<vmem>>, vector<1x1x8xf32>
    %133 = vector.shape_cast %132 : vector<1x1x8xf32> to vector<1x8xf32>
    %134 = vector.broadcast %133 : vector<1x8xf32> to vector<64x8xf32>
    %135 = arith.addf %131, %134 : vector<64x8xf32>
    %136 = tpu.transpose %128, [1, 0] : vector<64x8xf32> -> vector<8x64xf32>
    %cst_97 = arith.constant dense<0.000000e+00> : vector<64x64xf32>
    %137 = tpu.matmul %121, %136, %cst_97 {dimension_numbers = #tpu.dot_dimension_numbers<[1], [0], [0], [1], [0, 0, 1, 1], [], []>} : vector<64x8xf32>, vector<8x64xf32>, vector<64x64xf32> -> vector<64x64xf32>
    %c2_98 = arith.constant 2 : index
    %c0_99 = arith.constant 0 : index
    %c0_100 = arith.constant 0 : index
    %138 = vector.load %arg2[%c2_98, %c0_99, %c0_100] : memref<4x64x64xf32, #tpu.memory_space<vmem>>, vector<1x64x64xf32>
    %139 = vector.shape_cast %138 : vector<1x64x64xf32> to vector<64x64xf32>
    %140 = arith.addf %137, %139 : vector<64x64xf32>
    %cst_101 = arith.constant dense<0xFF800000> : vector<64xf32>
    %141 = vector.multi_reduction <maximumf>, %140, %cst_101 [1] : vector<64x64xf32> to vector<64xf32>
    %142 = vector.shape_cast %141 : vector<64xf32> to vector<64x1xf32>
    %143 = vector.broadcast %142 : vector<64x1xf32> to vector<64x64xf32>
    %144 = arith.subf %140, %143 : vector<64x64xf32>
    %145 = math.exp %144 : vector<64x64xf32>
    %cst_102 = arith.constant dense<0.000000e+00> : vector<64xf32>
    %146 = vector.multi_reduction <add>, %145, %cst_102 [1] : vector<64x64xf32> to vector<64xf32>
    %147 = vector.shape_cast %146 : vector<64xf32> to vector<64x1xf32>
    %148 = tpu.reciprocal %147 {approx = true} : vector<64x1xf32> -> vector<64x1xf32>
    %149 = vector.broadcast %148 : vector<64x1xf32> to vector<64x64xf32>
    %150 = arith.mulf %145, %149 : vector<64x64xf32>
    %cst_103 = arith.constant dense<0.000000e+00> : vector<64x8xf32>
    %151 = tpu.matmul %150, %135, %cst_103 {dimension_numbers = #tpu.dot_dimension_numbers<[1], [0], [0], [1], [0, 0, 1, 1], [], []>} : vector<64x64xf32>, vector<64x8xf32>, vector<64x8xf32> -> vector<64x8xf32>
    %c2_104 = arith.constant 2 : index
    %c0_105 = arith.constant 0 : index
    %c0_106 = arith.constant 0 : index
    %152 = vector.load %arg11[%c2_104, %c0_105, %c0_106] : memref<4x8x32xf32, #tpu.memory_space<vmem>>, vector<1x8x32xf32>
    %153 = vector.shape_cast %152 : vector<1x8x32xf32> to vector<8x32xf32>
    %cst_107 = arith.constant dense<0.000000e+00> : vector<64x32xf32>
    %154 = tpu.matmul %151, %153, %cst_107 {dimension_numbers = #tpu.dot_dimension_numbers<[1], [0], [0], [1], [0, 0, 1, 1], [], []>} : vector<64x8xf32>, vector<8x32xf32>, vector<64x32xf32> -> vector<64x32xf32>
    %155 = arith.addf %112, %154 : vector<64x32xf32>
    %c3 = arith.constant 3 : index
    %c0_108 = arith.constant 0 : index
    %c0_109 = arith.constant 0 : index
    %156 = vector.load %arg5[%c3, %c0_108, %c0_109] : memref<4x32x8xf32, #tpu.memory_space<vmem>>, vector<1x32x8xf32>
    %157 = vector.shape_cast %156 : vector<1x32x8xf32> to vector<32x8xf32>
    %cst_110 = arith.constant dense<0.000000e+00> : vector<64x8xf32>
    %158 = tpu.matmul %25, %157, %cst_110 {dimension_numbers = #tpu.dot_dimension_numbers<[1], [0], [0], [1], [0, 0, 1, 1], [], []>} : vector<64x32xf32>, vector<32x8xf32>, vector<64x8xf32> -> vector<64x8xf32>
    %c3_111 = arith.constant 3 : index
    %c0_112 = arith.constant 0 : index
    %c0_113 = arith.constant 0 : index
    %159 = vector.load %arg8[%c3_111, %c0_112, %c0_113] : memref<4x1x8xf32, #tpu.memory_space<vmem>>, vector<1x1x8xf32>
    %160 = vector.shape_cast %159 : vector<1x1x8xf32> to vector<1x8xf32>
    %161 = vector.broadcast %160 : vector<1x8xf32> to vector<64x8xf32>
    %162 = arith.addf %158, %161 : vector<64x8xf32>
    %cst_114 = arith.constant 0.353553385 : f32
    %163 = vector.broadcast %cst_114 : f32 to vector<64x8xf32>
    %164 = arith.mulf %162, %163 : vector<64x8xf32>
    %c3_115 = arith.constant 3 : index
    %c0_116 = arith.constant 0 : index
    %c0_117 = arith.constant 0 : index
    %165 = vector.load %arg6[%c3_115, %c0_116, %c0_117] : memref<4x32x8xf32, #tpu.memory_space<vmem>>, vector<1x32x8xf32>
    %166 = vector.shape_cast %165 : vector<1x32x8xf32> to vector<32x8xf32>
    %cst_118 = arith.constant dense<0.000000e+00> : vector<64x8xf32>
    %167 = tpu.matmul %25, %166, %cst_118 {dimension_numbers = #tpu.dot_dimension_numbers<[1], [0], [0], [1], [0, 0, 1, 1], [], []>} : vector<64x32xf32>, vector<32x8xf32>, vector<64x8xf32> -> vector<64x8xf32>
    %c3_119 = arith.constant 3 : index
    %c0_120 = arith.constant 0 : index
    %c0_121 = arith.constant 0 : index
    %168 = vector.load %arg9[%c3_119, %c0_120, %c0_121] : memref<4x1x8xf32, #tpu.memory_space<vmem>>, vector<1x1x8xf32>
    %169 = vector.shape_cast %168 : vector<1x1x8xf32> to vector<1x8xf32>
    %170 = vector.broadcast %169 : vector<1x8xf32> to vector<64x8xf32>
    %171 = arith.addf %167, %170 : vector<64x8xf32>
    %c3_122 = arith.constant 3 : index
    %c0_123 = arith.constant 0 : index
    %c0_124 = arith.constant 0 : index
    %172 = vector.load %arg7[%c3_122, %c0_123, %c0_124] : memref<4x32x8xf32, #tpu.memory_space<vmem>>, vector<1x32x8xf32>
    %173 = vector.shape_cast %172 : vector<1x32x8xf32> to vector<32x8xf32>
    %cst_125 = arith.constant dense<0.000000e+00> : vector<64x8xf32>
    %174 = tpu.matmul %25, %173, %cst_125 {dimension_numbers = #tpu.dot_dimension_numbers<[1], [0], [0], [1], [0, 0, 1, 1], [], []>} : vector<64x32xf32>, vector<32x8xf32>, vector<64x8xf32> -> vector<64x8xf32>
    %c3_126 = arith.constant 3 : index
    %c0_127 = arith.constant 0 : index
    %c0_128 = arith.constant 0 : index
    %175 = vector.load %arg10[%c3_126, %c0_127, %c0_128] : memref<4x1x8xf32, #tpu.memory_space<vmem>>, vector<1x1x8xf32>
    %176 = vector.shape_cast %175 : vector<1x1x8xf32> to vector<1x8xf32>
    %177 = vector.broadcast %176 : vector<1x8xf32> to vector<64x8xf32>
    %178 = arith.addf %174, %177 : vector<64x8xf32>
    %179 = tpu.transpose %171, [1, 0] : vector<64x8xf32> -> vector<8x64xf32>
    %cst_129 = arith.constant dense<0.000000e+00> : vector<64x64xf32>
    %180 = tpu.matmul %164, %179, %cst_129 {dimension_numbers = #tpu.dot_dimension_numbers<[1], [0], [0], [1], [0, 0, 1, 1], [], []>} : vector<64x8xf32>, vector<8x64xf32>, vector<64x64xf32> -> vector<64x64xf32>
    %c3_130 = arith.constant 3 : index
    %c0_131 = arith.constant 0 : index
    %c0_132 = arith.constant 0 : index
    %181 = vector.load %arg2[%c3_130, %c0_131, %c0_132] : memref<4x64x64xf32, #tpu.memory_space<vmem>>, vector<1x64x64xf32>
    %182 = vector.shape_cast %181 : vector<1x64x64xf32> to vector<64x64xf32>
    %183 = arith.addf %180, %182 : vector<64x64xf32>
    %cst_133 = arith.constant dense<0xFF800000> : vector<64xf32>
    %184 = vector.multi_reduction <maximumf>, %183, %cst_133 [1] : vector<64x64xf32> to vector<64xf32>
    %185 = vector.shape_cast %184 : vector<64xf32> to vector<64x1xf32>
    %186 = vector.broadcast %185 : vector<64x1xf32> to vector<64x64xf32>
    %187 = arith.subf %183, %186 : vector<64x64xf32>
    %188 = math.exp %187 : vector<64x64xf32>
    %cst_134 = arith.constant dense<0.000000e+00> : vector<64xf32>
    %189 = vector.multi_reduction <add>, %188, %cst_134 [1] : vector<64x64xf32> to vector<64xf32>
    %190 = vector.shape_cast %189 : vector<64xf32> to vector<64x1xf32>
    %191 = tpu.reciprocal %190 {approx = true} : vector<64x1xf32> -> vector<64x1xf32>
    %192 = vector.broadcast %191 : vector<64x1xf32> to vector<64x64xf32>
    %193 = arith.mulf %188, %192 : vector<64x64xf32>
    %cst_135 = arith.constant dense<0.000000e+00> : vector<64x8xf32>
    %194 = tpu.matmul %193, %178, %cst_135 {dimension_numbers = #tpu.dot_dimension_numbers<[1], [0], [0], [1], [0, 0, 1, 1], [], []>} : vector<64x64xf32>, vector<64x8xf32>, vector<64x8xf32> -> vector<64x8xf32>
    %c3_136 = arith.constant 3 : index
    %c0_137 = arith.constant 0 : index
    %c0_138 = arith.constant 0 : index
    %195 = vector.load %arg11[%c3_136, %c0_137, %c0_138] : memref<4x8x32xf32, #tpu.memory_space<vmem>>, vector<1x8x32xf32>
    %196 = vector.shape_cast %195 : vector<1x8x32xf32> to vector<8x32xf32>
    %cst_139 = arith.constant dense<0.000000e+00> : vector<64x32xf32>
    %197 = tpu.matmul %194, %196, %cst_139 {dimension_numbers = #tpu.dot_dimension_numbers<[1], [0], [0], [1], [0, 0, 1, 1], [], []>} : vector<64x8xf32>, vector<8x32xf32>, vector<64x32xf32> -> vector<64x32xf32>
    %198 = arith.addf %155, %197 : vector<64x32xf32>
    %199 = arith.addf %1, %198 : vector<64x32xf32>
    %c0_140 = arith.constant 0 : index
    %c0_141 = arith.constant 0 : index
    %200 = vector.load %arg12[%c0_140, %c0_141] : memref<1x32xf32, #tpu.memory_space<vmem>>, vector<1x32xf32>
    %201 = vector.broadcast %200 : vector<1x32xf32> to vector<64x32xf32>
    %202 = arith.addf %199, %201 : vector<64x32xf32>
    %cst_142 = arith.constant dense<0.000000e+00> : vector<64xf32>
    %203 = vector.multi_reduction <add>, %202, %cst_142 [1] : vector<64x32xf32> to vector<64xf32>
    %204 = vector.shape_cast %203 : vector<64xf32> to vector<64x1xf32>
    %cst_143 = arith.constant 3.200000e+01 : f32
    %205 = vector.broadcast %cst_143 : f32 to vector<64x1xf32>
    %206 = arith.divf %204, %205 : vector<64x1xf32>
    %207 = vector.broadcast %206 : vector<64x1xf32> to vector<64x32xf32>
    %208 = arith.subf %202, %207 : vector<64x32xf32>
    %209 = arith.mulf %208, %208 : vector<64x32xf32>
    %cst_144 = arith.constant dense<0.000000e+00> : vector<64xf32>
    %210 = vector.multi_reduction <add>, %209, %cst_144 [1] : vector<64x32xf32> to vector<64xf32>
    %211 = vector.shape_cast %210 : vector<64xf32> to vector<64x1xf32>
    %cst_145 = arith.constant 3.200000e+01 : f32
    %212 = vector.broadcast %cst_145 : f32 to vector<64x1xf32>
    %213 = arith.divf %211, %212 : vector<64x1xf32>
    %214 = vector.broadcast %206 : vector<64x1xf32> to vector<64x32xf32>
    %215 = arith.subf %202, %214 : vector<64x32xf32>
    %cst_146 = arith.constant 9.99999974E-6 : f32
    %216 = vector.broadcast %cst_146 : f32 to vector<64x1xf32>
    %217 = arith.addf %213, %216 : vector<64x1xf32>
    %218 = math.rsqrt %217 : vector<64x1xf32>
    %219 = vector.broadcast %218 : vector<64x1xf32> to vector<64x32xf32>
    %220 = arith.mulf %215, %219 : vector<64x32xf32>
    %c0_147 = arith.constant 0 : index
    %c0_148 = arith.constant 0 : index
    %221 = vector.load %arg13[%c0_147, %c0_148] : memref<1x32xf32, #tpu.memory_space<vmem>>, vector<1x32xf32>
    %222 = vector.broadcast %221 : vector<1x32xf32> to vector<64x32xf32>
    %223 = arith.mulf %220, %222 : vector<64x32xf32>
    %c0_149 = arith.constant 0 : index
    %c0_150 = arith.constant 0 : index
    %224 = vector.load %arg14[%c0_149, %c0_150] : memref<1x32xf32, #tpu.memory_space<vmem>>, vector<1x32xf32>
    %225 = vector.broadcast %224 : vector<1x32xf32> to vector<64x32xf32>
    %226 = arith.addf %223, %225 : vector<64x32xf32>
    %c0_151 = arith.constant 0 : index
    %c0_152 = arith.constant 0 : index
    %227 = vector.load %arg15[%c0_151, %c0_152] : memref<32x128xf32, #tpu.memory_space<vmem>>, vector<32x128xf32>
    %cst_153 = arith.constant dense<0.000000e+00> : vector<64x128xf32>
    %228 = tpu.matmul %226, %227, %cst_153 {dimension_numbers = #tpu.dot_dimension_numbers<[1], [0], [0], [1], [0, 0, 1, 1], [], []>} : vector<64x32xf32>, vector<32x128xf32>, vector<64x128xf32> -> vector<64x128xf32>
    %c0_154 = arith.constant 0 : index
    %c0_155 = arith.constant 0 : index
    %229 = vector.load %arg16[%c0_154, %c0_155] : memref<1x128xf32, #tpu.memory_space<vmem>>, vector<1x128xf32>
    %230 = vector.broadcast %229 : vector<1x128xf32> to vector<64x128xf32>
    %231 = arith.addf %228, %230 : vector<64x128xf32>
    %cst_156 = arith.constant 5.000000e-01 : f32
    %232 = vector.broadcast %cst_156 : f32 to vector<64x128xf32>
    %233 = arith.mulf %232, %231 : vector<64x128xf32>
    %cst_157 = arith.constant 0.707106769 : f32
    %234 = vector.broadcast %cst_157 : f32 to vector<64x128xf32>
    %235 = arith.mulf %231, %234 : vector<64x128xf32>
    %236 = math.erf %235 : vector<64x128xf32>
    %cst_158 = arith.constant 1.000000e+00 : f32
    %237 = vector.broadcast %cst_158 : f32 to vector<64x128xf32>
    %238 = arith.addf %237, %236 : vector<64x128xf32>
    %239 = arith.mulf %233, %238 : vector<64x128xf32>
    %c0_159 = arith.constant 0 : index
    %c0_160 = arith.constant 0 : index
    %240 = vector.load %arg17[%c0_159, %c0_160] : memref<128x32xf32, #tpu.memory_space<vmem>>, vector<128x32xf32>
    %cst_161 = arith.constant dense<0.000000e+00> : vector<64x32xf32>
    %241 = tpu.matmul %239, %240, %cst_161 {dimension_numbers = #tpu.dot_dimension_numbers<[1], [0], [0], [1], [0, 0, 1, 1], [], []>} : vector<64x128xf32>, vector<128x32xf32>, vector<64x32xf32> -> vector<64x32xf32>
    %c0_162 = arith.constant 0 : index
    %c0_163 = arith.constant 0 : index
    %242 = vector.load %arg18[%c0_162, %c0_163] : memref<1x32xf32, #tpu.memory_space<vmem>>, vector<1x32xf32>
    %243 = vector.broadcast %242 : vector<1x32xf32> to vector<64x32xf32>
    %244 = arith.addf %241, %243 : vector<64x32xf32>
    %245 = arith.addf %202, %244 : vector<64x32xf32>
    %c0_164 = arith.constant 0 : index
    %c0_165 = arith.constant 0 : index
    %c0_166 = arith.constant 0 : index
    %246 = vector.load %arg19[%c0_164, %c0_165, %c0_166] : memref<1x64x32xf32, #tpu.memory_space<vmem>>, vector<1x64x32xf32>
    %247 = vector.shape_cast %246 : vector<1x64x32xf32> to vector<64x32xf32>
    %248 = vector.shape_cast %245 : vector<64x32xf32> to vector<1x64x32xf32>
    tpu.vector_store %arg19[%c0_164, %c0_165, %c0_166], %248 {strides = array<i32>} : memref<1x64x32xf32, #tpu.memory_space<vmem>>, vector<1x64x32xf32>,
    return
  }
  func.func @transform_0(%arg0: i32) -> (i32, i32, i32) {
    %c0_i32 = arith.constant 0 : i32
    %c0_i32_0 = arith.constant 0 : i32
    %c0_i32_1 = arith.constant 0 : i32
    return %arg0, %c0_i32, %c0_i32_0 : i32, i32, i32
  }
  func.func @transform_1(%arg0: i32) -> (i32, i32, i32) {
    %c0_i32 = arith.constant 0 : i32
    %c0_i32_0 = arith.constant 0 : i32
    %c0_i32_1 = arith.constant 0 : i32
    %c0_i32_2 = arith.constant 0 : i32
    return %c0_i32, %c0_i32_0, %c0_i32_1 : i32, i32, i32
  }
  func.func @transform_2(%arg0: i32) -> (i32, i32) {
    %c0_i32 = arith.constant 0 : i32
    %c0_i32_0 = arith.constant 0 : i32
    %c0_i32_1 = arith.constant 0 : i32
    return %c0_i32, %c0_i32_0 : i32, i32
  }
  func.func @transform_3(%arg0: i32) -> (i32, i32) {
    %c0_i32 = arith.constant 0 : i32
    %c0_i32_0 = arith.constant 0 : i32
    %c0_i32_1 = arith.constant 0 : i32
    return %c0_i32, %c0_i32_0 : i32, i32
  }
  func.func @transform_4(%arg0: i32) -> (i32, i32, i32) {
    %c0_i32 = arith.constant 0 : i32
    %c0_i32_0 = arith.constant 0 : i32
    %c0_i32_1 = arith.constant 0 : i32
    %c0_i32_2 = arith.constant 0 : i32
    return %c0_i32, %c0_i32_0, %c0_i32_1 : i32, i32, i32
  }
  func.func @transform_5(%arg0: i32) -> (i32, i32, i32) {
    %c0_i32 = arith.constant 0 : i32
    %c0_i32_0 = arith.constant 0 : i32
    %c0_i32_1 = arith.constant 0 : i32
    %c0_i32_2 = arith.constant 0 : i32
    return %c0_i32, %c0_i32_0, %c0_i32_1 : i32, i32, i32
  }
  func.func @transform_6(%arg0: i32) -> (i32, i32, i32) {
    %c0_i32 = arith.constant 0 : i32
    %c0_i32_0 = arith.constant 0 : i32
    %c0_i32_1 = arith.constant 0 : i32
    %c0_i32_2 = arith.constant 0 : i32
    return %c0_i32, %c0_i32_0, %c0_i32_1 : i32, i32, i32
  }
  func.func @transform_7(%arg0: i32) -> (i32, i32, i32) {
    %c0_i32 = arith.constant 0 : i32
    %c0_i32_0 = arith.constant 0 : i32
    %c0_i32_1 = arith.constant 0 : i32
    %c0_i32_2 = arith.constant 0 : i32
    return %c0_i32, %c0_i32_0, %c0_i32_1 : i32, i32, i32
  }
  func.func @transform_8(%arg0: i32) -> (i32, i32, i32) {
    %c0_i32 = arith.constant 0 : i32
    %c0_i32_0 = arith.constant 0 : i32
    %c0_i32_1 = arith.constant 0 : i32
    %c0_i32_2 = arith.constant 0 : i32
    return %c0_i32, %c0_i32_0, %c0_i32_1 : i32, i32, i32
  }
  func.func @transform_9(%arg0: i32) -> (i32, i32, i32) {
    %c0_i32 = arith.constant 0 : i32
    %c0_i32_0 = arith.constant 0 : i32
    %c0_i32_1 = arith.constant 0 : i32
    %c0_i32_2 = arith.constant 0 : i32
    return %c0_i32, %c0_i32_0, %c0_i32_1 : i32, i32, i32
  }
  func.func @transform_10(%arg0: i32) -> (i32, i32, i32) {
    %c0_i32 = arith.constant 0 : i32
    %c0_i32_0 = arith.constant 0 : i32
    %c0_i32_1 = arith.constant 0 : i32
    %c0_i32_2 = arith.constant 0 : i32
    return %c0_i32, %c0_i32_0, %c0_i32_1 : i32, i32, i32
  }
  func.func @transform_11(%arg0: i32) -> (i32, i32) {
    %c0_i32 = arith.constant 0 : i32
    %c0_i32_0 = arith.constant 0 : i32
    %c0_i32_1 = arith.constant 0 : i32
    return %c0_i32, %c0_i32_0 : i32, i32
  }
  func.func @transform_12(%arg0: i32) -> (i32, i32) {
    %c0_i32 = arith.constant 0 : i32
    %c0_i32_0 = arith.constant 0 : i32
    %c0_i32_1 = arith.constant 0 : i32
    return %c0_i32, %c0_i32_0 : i32, i32
  }
  func.func @transform_13(%arg0: i32) -> (i32, i32) {
    %c0_i32 = arith.constant 0 : i32
    %c0_i32_0 = arith.constant 0 : i32
    %c0_i32_1 = arith.constant 0 : i32
    return %c0_i32, %c0_i32_0 : i32, i32
  }
  func.func @transform_14(%arg0: i32) -> (i32, i32) {
    %c0_i32 = arith.constant 0 : i32
    %c0_i32_0 = arith.constant 0 : i32
    %c0_i32_1 = arith.constant 0 : i32
    return %c0_i32, %c0_i32_0 : i32, i32
  }
  func.func @transform_15(%arg0: i32) -> (i32, i32) {
    %c0_i32 = arith.constant 0 : i32
    %c0_i32_0 = arith.constant 0 : i32
    %c0_i32_1 = arith.constant 0 : i32
    return %c0_i32, %c0_i32_0 : i32, i32
  }
  func.func @transform_16(%arg0: i32) -> (i32, i32) {
    %c0_i32 = arith.constant 0 : i32
    %c0_i32_0 = arith.constant 0 : i32
    %c0_i32_1 = arith.constant 0 : i32
    return %c0_i32, %c0_i32_0 : i32, i32
  }
  func.func @transform_17(%arg0: i32) -> (i32, i32) {
    %c0_i32 = arith.constant 0 : i32
    %c0_i32_0 = arith.constant 0 : i32
    %c0_i32_1 = arith.constant 0 : i32
    return %c0_i32, %c0_i32_0 : i32, i32
  }
  func.func @transform_18(%arg0: i32) -> (i32, i32, i32) {
    %c0_i32 = arith.constant 0 : i32
    %c0_i32_0 = arith.constant 0 : i32
    %c0_i32_1 = arith.constant 0 : i32
    return %arg0, %c0_i32, %c0_i32_0 : i32, i32, i32
  }
}

</mosaic_0001>

<bundles_post_ra>
// kernel: swin_block_forward.1
= control target key start
LH: loop header
LB: loop body
LE: loop exit
PB: predicated region body
PF: predicated region fallthrough
CT: control target
= control target key end

     0   :  { %s6661_s27 = smov 0   ;;  %s7882_s0 = inlined_call_operand.vmem [shape: f32[2,64,32], index: 0, kind: input, shape index: {}]   ;;  %s7883_s1 = inlined_call_operand.vmem [shape: f32[4,64,64], index: 1, kind: input, shape index: {}]   ;;  %s7884_s2 = inlined_call_operand.vmem [shape: f32[1,32], index: 2, kind: input, shape index: {}]   ;;  %s7885_s3 = inlined_call_operand.vmem [shape: f32[1,32], index: 3, kind: input, shape index: {}]   ;;  %s7886_s4 = inlined_call_operand.vmem [shape: f32[4,32,8], index: 4, kind: input, shape index: {}]   ;;  %s7887_s5 = inlined_call_operand.vmem [shape: f32[4,32,8], index: 5, kind: input, shape index: {}]   ;;  %s7888_s6 = inlined_call_operand.vmem [shape: f32[4,32,8], index: 6, kind: input, shape index: {}]   ;;  %s7889_s7 = inlined_call_operand.vmem [shape: f32[4,1,8], index: 7, kind: input, shape index: {}]   ;;  %s7890_s8 = inlined_call_operand.vmem [shape: f32[4,1,8], index: 8, kind: input, shape index: {}]   ;;  %s7891_s9 = inlined_call_operand.vmem [shape: f32[4,1,8], index: 9, kind: input, shape index: {}]   ;;  %s7892_s10 = inlined_call_operand.vmem [shape: f32[4,8,32], index: 10, kind: input, shape index: {}]   ;;  %s7893_s11 = inlined_call_operand.vmem [shape: f32[1,32], index: 11, kind: input, shape index: {}]   ;;  %s7894_s12 = inlined_call_operand.vmem [shape: f32[1,32], index: 12, kind: input, shape index: {}]   ;;  %s7895_s13 = inlined_call_operand.vmem [shape: f32[1,32], index: 13, kind: input, shape index: {}]   ;;  %s7896_s14 = inlined_call_operand.vmem [shape: f32[32,128], index: 14, kind: input, shape index: {}]   ;;  %s7897_s15 = inlined_call_operand.vmem [shape: f32[1,128], index: 15, kind: input, shape index: {}]   ;;  %s7898_s16 = inlined_call_operand.vmem [shape: f32[128,32], index: 16, kind: input, shape index: {}]   ;;  %s7899_s17 = inlined_call_operand.vmem [shape: f32[1,32], index: 17, kind: input, shape index: {}]   ;;  %s7900_s18 = inlined_call_operand.vmem [shape: f32[2,64,32], index: 18, kind: output, shape index: {}]  }
   0x1   :  { %7902 = sst [smem:[#allocation2_spill]] %s7882_s0 }
   0x2   :  { %7903 = sst [smem:[#allocation3_spill]] %s7883_s1 }
   0x3   :  { %7904 = sst [smem:[#allocation4_spill]] %s7884_s2 }
   0x4 LB: > { %s4778_s28 = sadd.s32 4294967295, %s6564_s27   ;;  %p4782_p0 = scmp.ge.s32.totalorder %s6564_s27, 1  ;;  %s6564_s27 = sphi %s6661_s27, %s28_s27  }
   0x5   : > { %p512_p1 = scmp.lt.s32.totalorder %s6564_s27, 3 }
   0x7   : > { %p513_p2 = pnand %p4782_p0, %p512_p1 }
   0x8   : > { %p566_p3 = scmp.lt.s32.totalorder (!%p513_p2), %s4778_s28, 1  ;;  %vm584_vm0 = vcmask (!%p513_p2), 261120   ;;  %s7905_s19 = sld [smem:[#allocation2_spill]] (!%p513_p2)  ;;  %v720_v56 = vld [vmem:[%s7886_s4] sm:$0xff] (!%p513_p2)  ;;  %v721_v57 = vld [vmem:[%s7886_s4 + $0x8] sm:$0xff] (!%p513_p2)  ;;  %v722_v62 = vld [vmem:[%s7886_s4 + $0x10] sm:$0xff] (!%p513_p2) }
   0x9   : > { %516 = sbr.rel (%p513_p2) target bundleno = 5091 (0x13e3), region = 92  ;;  %v868_v58 = vld [vmem:[%s7887_s5] sm:$0xff] (!%p513_p2)  ;;  %v6042_v59 = vpack.c.bf16 (!%p513_p2), %v721_v57, %v720_v56  ;;  %v869_v60 = vld [vmem:[%s7887_s5 + $0x8] sm:$0xff] (!%p513_p2)  ;;  %v723_v63 = vld [vmem:[%s7886_s4 + $0x18] sm:$0xff] (!%p513_p2)  ;;  %s7906_s20 = sld [smem:[#allocation4_spill]] (!%p513_p2)  ;;  %vm1108_vm1 = vcmask (!%p513_p2), 64512  }
   0xa   : > { %v6050_v61 = vpack.c.bf16 (!%p513_p2), %v869_v60, %v868_v58  ;;  %vm6866_vm2 = vmpackc.low (!%p513_p2), %vm1108_vm1, %vm1108_vm1  ;;  %s7909_s21 = sld [smem:[#allocation3_spill]] (!%p513_p2)  ;;  %vm1262_vm3 = vcmask (!%p513_p2), 523264  }
   0xb   : > { %6043 = vmatprep.subr.bf16.mxu0 (!%p513_p2), %v6042_v59 }
   0xc   : > { %6051 = vmatprep.subr.bf16.mxu1 (!%p513_p2), %v6050_v61  ;;  %6045 = vmatpush3.bf16.msra.mxu0 (!%p513_p2), %v6042_v59 }
   0xd   : > { %6053 = vmatpush3.bf16.msra.mxu1 (!%p513_p2), %v6050_v61 }
  0x10   : > { %s7911_s28 = smov (!%p566_p3, %s4778_s28), 1 }
  0x11   : > { %s5112_s29 = sshll.u32 %s7911_s28, 6 }
  0x12   : > { %s6677_s1 = scalar_lea.vmem %s7905_s19, %s5112_s29 }
  0x13   : > { %v576_v0 = vld [vmem:[%s6677_s1] sm:$0xff]  ;;  %v578_v1 = vld [vmem:[%s6677_s1 + $0x10] sm:$0xff]  ;;  %v577_v2 = vld [vmem:[%s6677_s1 + $0x8] sm:$0xff] }
  0x14   : > { %v585_v3 = vsel %vm584_vm0, %v576_v0, 0.0  ;;  %v591_v4 = vsel %vm584_vm0, %v578_v1, 0.0  ;;  %v579_v5 = vld [vmem:[%s6677_s1 + $0x18] sm:$0xff]  ;;  %v588_v6 = vsel %vm584_vm0, %v577_v2, 0.0  ;;  %v580_v8 = vld [vmem:[%s6677_s1 + $0x20] sm:$0xff]  ;;  %v581_v9 = vld [vmem:[%s6677_s1 + $0x28] sm:$0xff] }
  0x15   : > { %586 = vadd.xlane.f32.xlu0 %v585_v3  ;;  %592 = vadd.xlane.f32.xlu1 %v591_v4  ;;  %v594_v7 = vsel %vm584_vm0, %v579_v5, 0.0  ;;  %v597_v10 = vsel %vm584_vm0, %v580_v8, 0.0  ;;  %v600_v11 = vsel %vm584_vm0, %v581_v9, 0.0  ;;  %v582_v12 = vld [vmem:[%s6677_s1 + $0x30] sm:$0xff]  ;;  %v583_v13 = vld [vmem:[%s6677_s1 + $0x38] sm:$0xff]  ;;  %v984_v4 = vld [vmem:[%s7888_s6] sm:$0xff] }
  0x16   : > { %v603_v14 = vsel %vm584_vm0, %v582_v12, 0.0  ;;  %v606_v15 = vsel %vm584_vm0, %v583_v13, 0.0 }
  0x19   : > { %589 = vadd.xlane.f32.xlu0 %v588_v6  ;;  %595 = vadd.xlane.f32.xlu1 %v594_v7 }
  0x1d   : > { %598 = vadd.xlane.f32.xlu0 %v597_v10  ;;  %601 = vadd.xlane.f32.xlu1 %v600_v11 }
  0x21   : > { %604 = vadd.xlane.f32.xlu0 %v603_v14  ;;  %607 = vadd.xlane.f32.xlu1 %v606_v15 }
  0xa2   : > { %v587_v16 = vpop.xlane.xlu0 %586  ;;  %v593_v17 = vpop.xlane.xlu1 %592 }
  0xa3   : > { %v610_v18 = vmul.f32 0.03125, %v587_v16  ;;  %v612_v19 = vmul.f32 0.03125, %v593_v17 }
  0xa5   : > { %v6695_v20 = vsub.f32 %v576_v0, %v610_v18  ;;  %v6697_v21 = vsub.f32 %v578_v1, %v612_v19  ;;  %v870_v0 = vld [vmem:[%s7887_s5 + $0x10] sm:$0xff]  ;;  %v6046_v1 = vpack.c.bf16 %v723_v63, %v722_v62 }
  0xa6   : > { %v590_v22 = vpop.xlane.xlu0 %589  ;;  %v596_v23 = vpop.xlane.xlu1 %595 }
  0xa7   : > { %v611_v24 = vmul.f32 0.03125, %v590_v22  ;;  %v613_v25 = vmul.f32 0.03125, %v596_v23  ;;  %v626_v26 = vmul.f32 %v6695_v20, %v6695_v20  ;;  %v628_v27 = vmul.f32 %v6697_v21, %v6697_v21  ;;  %6047 = vmatprep.subr.bf16.mxu0 %v6046_v1 }
  0xa8   : > { %6049 = vmatpush3.bf16.msra.mxu0 %v6046_v1 }
  0xa9   : > { %v6703_v28 = vsub.f32 %v577_v2, %v611_v24  ;;  %v6705_v29 = vsub.f32 %v579_v5, %v613_v25  ;;  %v634_v30 = vsel %vm584_vm0, %v626_v26, 0.0  ;;  %v640_v33 = vsel %vm584_vm0, %v628_v27, 0.0  ;;  %v871_v2 = vld [vmem:[%s7887_s5 + $0x18] sm:$0xff]  ;;  %v985_v5 = vld [vmem:[%s7888_s6 + $0x8] sm:$0xff] }
  0xaa   : > { %635 = vadd.xlane.f32.xlu0 %v634_v30  ;;  %v599_v31 = vpop.xlane.xlu0 %598  ;;  %v602_v32 = vpop.xlane.xlu1 %601  ;;  %v6054_v3 = vpack.c.bf16 %v871_v2, %v870_v0  ;;  %v6765_v6 = vpack.c.bf16 %v985_v5, %v984_v4  ;;  %v6859_v5 = vld [vmem:[%s7889_s7] ss:$0 sm:$0xff] }
  0xab   : > { %v614_v34 = vmul.f32 0.03125, %v599_v31  ;;  %v615_v35 = vmul.f32 0.03125, %v602_v32  ;;  %v627_v36 = vmul.f32 %v6703_v28, %v6703_v28  ;;  %v629_v37 = vmul.f32 %v6705_v29, %v6705_v29  ;;  %v4787_v31 = vld [vmem:[%s7906_s20] ss:$0 sm:$0xff]  ;;  %s575_s20 = scalar_lea.vmem %s7900_s18, %s5112_s29 }
  0xac   : > { %6055 = vmatprep.subr.bf16.mxu1 %v6054_v3  ;;  %6059 = vmatprep.subr.bf16.mxu0 %v6765_v6 }
  0xad   : > { %v6713_v38 = vsub.f32 %v580_v8, %v614_v34  ;;  %v6715_v39 = vsub.f32 %v581_v9, %v615_v35  ;;  %v637_v40 = vsel %vm584_vm0, %v627_v36, 0.0  ;;  %v643_v43 = vsel %vm584_vm0, %v629_v37, 0.0  ;;  %6057 = vmatpush3.bf16.msra.mxu1 %v6054_v3  ;;  %v4788_v36 = vld [vmem:[%s7885_s3] ss:$0 sm:$0xff] }
  0xae   : > { %641 = vadd.xlane.f32.xlu0 %v640_v33  ;;  %638 = vadd.xlane.f32.xlu1 %v637_v40  ;;  %v605_v41 = vpop.xlane.xlu0 %604  ;;  %v608_v42 = vpop.xlane.xlu1 %607 }
  0xaf   : > { %v616_v44 = vmul.f32 0.03125, %v605_v41  ;;  %v617_v45 = vmul.f32 0.03125, %v608_v42  ;;  %v630_v46 = vmul.f32 %v6713_v38, %v6713_v38  ;;  %v631_v47 = vmul.f32 %v6715_v39, %v6715_v39 }
  0xb1   : > { %v6723_v48 = vsub.f32 %v582_v12, %v616_v44  ;;  %v6725_v49 = vsub.f32 %v583_v13, %v617_v45  ;;  %v646_v50 = vsel %vm584_vm0, %v630_v46, 0.0  ;;  %v649_v51 = vsel %vm584_vm0, %v631_v47, 0.0  ;;  %v986_v47 = vld [vmem:[%s7888_s6 + $0x10] sm:$0xff] }
  0xb2   : > { %644 = vadd.xlane.f32.xlu1 %v643_v43  ;;  %647 = vadd.xlane.f32.xlu0 %v646_v50  ;;  %v987_v50 = vld [vmem:[%s7888_s6 + $0x18] sm:$0xff] }
  0xb3   : > { %v632_v52 = vmul.f32 %v6723_v48, %v6723_v48  ;;  %v633_v53 = vmul.f32 %v6725_v49, %v6725_v49  ;;  %v6062_v56 = vpack.c.bf16 %v987_v50, %v986_v47 }
  0xb5   : > { %v652_v54 = vsel %vm584_vm0, %v632_v52, 0.0  ;;  %v655_v55 = vsel %vm584_vm0, %v633_v53, 0.0 }
  0xb6   : > { %650 = vadd.xlane.f32.xlu1 %v649_v51  ;;  %653 = vadd.xlane.f32.xlu0 %v652_v54 }
  0xba   : > { %656 = vadd.xlane.f32.xlu1 %v655_v55 }
 0x137   : > { %v636_v7 = vpop.xlane.xlu0 %635 }
 0x138   : > { %v658_v8 = vmul.f32 0.03125, %v636_v7 }
 0x13a   : > { %v666_v9 = vadd.f32 1e-05, %v658_v8 }
 0x13b   : > { %v639_v10 = vpop.xlane.xlu1 %638  ;;  %v642_v11 = vpop.xlane.xlu0 %641 }
 0x13c   : > { %6374 = vrsqrt.f32 %v666_v9  ;;  %v659_v12 = vmul.f32 0.03125, %v639_v10  ;;  %v660_v13 = vmul.f32 0.03125, %v642_v11 }
 0x13e   : > { %v667_v14 = vadd.f32 1e-05, %v659_v12  ;;  %v668_v15 = vadd.f32 1e-05, %v660_v13 }
 0x13f   : > { %v645_v16 = vpop.xlane.xlu1 %644  ;;  %v648_v17 = vpop.xlane.xlu0 %647 }
 0x140   : > { %6376 = vrsqrt.f32 %v667_v14  ;;  %v661_v18 = vmul.f32 0.03125, %v645_v16  ;;  %v662_v19 = vmul.f32 0.03125, %v648_v17 }
 0x141   : > { %6378 = vrsqrt.f32 %v668_v15 }
 0x142   : > { %v669_v22 = vadd.f32 1e-05, %v661_v18  ;;  %v670_v23 = vadd.f32 1e-05, %v662_v19 }
 0x143   : > { %v651_v24 = vpop.xlane.xlu1 %650  ;;  %v654_v25 = vpop.xlane.xlu0 %653 }
 0x144   : > { %6380 = vrsqrt.f32 %v669_v22  ;;  %v663_v26 = vmul.f32 0.03125, %v651_v24  ;;  %v664_v27 = vmul.f32 0.03125, %v654_v25 }
 0x145   : > { %6382 = vrsqrt.f32 %v670_v23 }
 0x146   : > { %v6375_v30 = vpop.eup %6374  ;;  %v671_v32 = vadd.f32 1e-05, %v663_v26  ;;  %v672_v33 = vadd.f32 1e-05, %v664_v27 }
 0x147   : > { %v682_v34 = vmul.f32 %v6375_v30, %v6695_v20  ;;  %v657_v35 = vpop.xlane.xlu1 %656 }
 0x148   : > { %6384 = vrsqrt.f32 %v671_v32  ;;  %v665_v37 = vmul.f32 0.03125, %v657_v35 }
 0x149   : > { %v697_v40 = vmul.f32 %v4787_v31, %v682_v34  ;;  %6386 = vrsqrt.f32 %v672_v33 }
 0x14a   : > { %v6377_v41 = vpop.eup %6376  ;;  %v673_v42 = vadd.f32 1e-05, %v665_v37 }
 0x14b   : > { %v6379_v43 = vpop.eup %6378  ;;  %v6775_v44 = vadd.f32 %v4788_v36, %v697_v40  ;;  %v683_v45 = vmul.f32 %v6377_v41, %v6703_v28 }
 0x14c   : > { %v684_v46 = vmul.f32 %v6379_v43, %v6697_v21  ;;  %6388 = vrsqrt.f32 %v673_v42  ;;  %v4807_v42 = vld [vmem:[%s7891_s9] ss:$0 sm:$0xff] }
 0x14d   : > { %v698_v20 = vmul.f32 %v4787_v31, %v683_v45  ;;  %5466 = vmatprep.mubr.msk.f32.mxu0 %vm584_vm0, %v6775_v44  ;;  %5486 = vmatprep.mubr.msk.f32.mxu1 %vm584_vm0, %v6775_v44 }
 0x14e   : > { %v6381_v51 = vpop.eup %6380  ;;  %v699_v28 = vmul.f32 %v4787_v31, %v684_v46 }
 0x14f   : > { %v6383_v52 = vpop.eup %6382  ;;  %v6789_v21 = vadd.f32 %v4788_v36, %v698_v20  ;;  %v685_v53 = vmul.f32 %v6381_v51, %v6705_v29 }
 0x150   : > { %v6792_v54 = vadd.f32 %v4788_v36, %v699_v28  ;;  %v686_v55 = vmul.f32 %v6383_v52, %v6713_v38 }
 0x151   : > { %v700_v57 = vmul.f32 %v4787_v31, %v685_v53  ;;  %5467 = vmatmul.mubr.msk.f32.vlgmr.msra.gmra.mrb[0].mxu0 %vm584_vm0, %v6789_v21  ;;  %5487 = vmatmul.mubr.msk.f32.vlgmr.msra.gmra.mrb[0].mxu1 %vm584_vm0, %v6789_v21 }
 0x152   : > { %v6385_v58 = vpop.eup %6384  ;;  %v701_v59 = vmul.f32 %v4787_v31, %v686_v55  ;;  %5469 = vmatprep.mubr.msk.f32.mxu0 %vm584_vm0, %v6792_v54  ;;  %5489 = vmatprep.mubr.msk.f32.mxu1 %vm584_vm0, %v6792_v54 }
 0x153   : > { %v6387_v29 = vpop.eup %6386  ;;  %v6803_v60 = vadd.f32 %v4788_v36, %v700_v57  ;;  %v687_v38 = vmul.f32 %v6385_v58, %v6715_v39  ;;  %6061 = vmatpush3.bf16.msra.mxu0 %v6765_v6 }
 0x154   : > { %v6807_v61 = vadd.f32 %v4788_v36, %v701_v59  ;;  %v688_v62 = vmul.f32 %v6387_v29, %v6723_v48  ;;  %6063 = vmatprep.subr.bf16.mxu0 %v6062_v56  ;;  %v4854_v59 = vld [vmem:[%s7887_s5 + $0x20] sm:$0xff]  ;;  %v4855_v29 = vld [vmem:[%s7887_s5 + $0x28] sm:$0xff] }
 0x155   : > { %v702_v63 = vmul.f32 %v4787_v31, %v687_v38  ;;  %5470 = vmatmul.mubr.msk.f32.gmra.mrb[2].mxu0 %vm584_vm0, %v6803_v60  ;;  %5490 = vmatmul.mubr.msk.f32.gmra.mrb[2].mxu1 %vm584_vm0, %v6803_v60 }
 0x156   : > { %v6389_v0 = vpop.eup %6388  ;;  %v703_v1 = vmul.f32 %v4787_v31, %v688_v62  ;;  %5472 = vmatprep.mubr.msk.f32.mxu0 %vm584_vm0, %v6807_v61  ;;  %5492 = vmatprep.mubr.msk.f32.mxu1 %vm584_vm0, %v6807_v61 }
 0x157   : > { %v6818_v39 = vadd.f32 %v4788_v36, %v702_v63  ;;  %v689_v48 = vmul.f32 %v6389_v0, %v6725_v49  ;;  %6065 = vmatpush3.bf16.msra.mxu0 %v6062_v56  ;;  %v4798_v49 = vld [vmem:[%s7890_s8] ss:$0 sm:$0xff]  ;;  %v6114_v0 = vpack.c.bf16 %v4855_v29, %v4854_v59 }
 0x158   : > { %v6821_v2 = vadd.f32 %v4788_v36, %v703_v1 }
 0x159   : > { %v704_v3 = vmul.f32 %v4787_v31, %v689_v48  ;;  %5473 = vmatmul.mubr.msk.f32.gmra.mrb[4].mxu0 %vm584_vm0, %v6818_v39  ;;  %5493 = vmatmul.mubr.msk.f32.gmra.mrb[4].mxu1 %vm584_vm0, %v6818_v39 }
 0x15a   : > { %5475 = vmatprep.mubr.msk.f32.mxu0 %vm584_vm0, %v6821_v2  ;;  %5495 = vmatprep.mubr.msk.f32.mxu1 %vm584_vm0, %v6821_v2 }
 0x15b   : > { %v6831_v4 = vadd.f32 %v4788_v36, %v704_v3 }
 0x15d   : > { %5476 = vmatmul.mubr.msk.f32.gmra.mrb[6].mxu0 %vm584_vm0, %v6831_v4  ;;  %5496 = vmatmul.mubr.msk.f32.gmra.mrb[6].mxu1 %vm584_vm0, %v6831_v4 }
 0x15e   : > { %5506 = vmatprep.mubr.msk.f32.mxu0 %vm584_vm0, %v6775_v44 }
 0x161   : > { %5507 = vmatmul.mubr.msk.f32.vlgmr.msra.gmra.mrb[8].mxu0 %vm584_vm0, %v6789_v21 }
 0x162   : > { %5509 = vmatprep.mubr.msk.f32.mxu0 %vm584_vm0, %v6792_v54 }
 0x165   : > { %5510 = vmatmul.mubr.msk.f32.gmra.mrb[10].mxu0 %vm584_vm0, %v6803_v60 }
 0x166   : > { %5512 = vmatprep.mubr.msk.f32.mxu0 %vm584_vm0, %v6807_v61 }
 0x169   : > { %5513 = vmatmul.mubr.msk.f32.gmra.mrb[12].mxu0 %vm584_vm0, %v6818_v39 }
 0x16a   : > { %5515 = vmatprep.mubr.msk.f32.mxu0 %vm584_vm0, %v6821_v2 }
 0x16d   : > { %5516 = vmatmul.mubr.msk.f32.gmra.mrb[14].mxu0 %vm584_vm0, %v6831_v4 }
 0x224   : > { %v6861_v6 = vpop.f32.mrb[0].mxu0  ;;  %v5488_v7 = vpop.f32.mrb[0].mxu1 }
 0x225   : > { %v951_v8 = vadd.f32 %v5488_v7, %v4798_v49  ;;  %v821_v9 = vpop.f32.mrb[1].mxu0  ;;  %v945_v10 = vpop.f32.mrb[1].mxu1 }
 0x226   : > { %v822_v11 = vadd.f32 %v6859_v5, %v821_v9  ;;  %v946_v12 = vadd.f32 %v4798_v49, %v945_v10  ;;  %v4856_v9 = vld [vmem:[%s7887_s5 + $0x30] sm:$0xff]  ;;  %v4857_v10 = vld [vmem:[%s7887_s5 + $0x38] sm:$0xff] }
 0x228   : > { %v860_v14 = vmul.f32 0.35355338, %v822_v11  ;;  %v6066_v15 = vpack.c.bf16 %v951_v8, %v946_v12  ;;  %v6870_v16 = vpop.f32.mrb[2].mxu0  ;;  %v5491_v17 = vpop.f32.mrb[2].mxu1 }
 0x229   : > { %v961_v18 = vadd.f32 %v5491_v17, %v4798_v49  ;;  %v831_v19 = vpop.f32.mrb[3].mxu0  ;;  %v955_v22 = vpop.f32.mrb[3].mxu1  ;;  %v837_v12 = vadd.f32 %v6870_v16, %v6859_v5 }
 0x22a   : > { %v956_v23 = vadd.f32 %v4798_v49, %v955_v22  ;;  %6068 = vmatprep.subr.msk.bf16.mxu1 %vm6866_vm2, %v6066_v15  ;;  %5534 = vmatprep.mubr.msk.f32.mxu1 %vm1108_vm1, %v860_v14  ;;  %v832_v8 = vadd.f32 %v6859_v5, %v831_v19  ;;  %v6118_v14 = vpack.c.bf16 %v4857_v10, %v4856_v9 }
 0x22b   : > { %6071 = vmatpush3.bf16.xpose.msk.msra.mxu1 %vm6866_vm2, %v6066_v15  ;;  %v863_v17 = vmul.f32 0.35355338, %v837_v12 }
 0x22c   : > { %v6072_v24 = vpack.c.bf16 %v961_v18, %v956_v23  ;;  %v6877_v25 = vpop.f32.mrb[4].mxu0  ;;  %v5494_v26 = vpop.f32.mrb[4].mxu1 }
 0x22d   : > { %v971_v27 = vadd.f32 %v5494_v26, %v4798_v49  ;;  %v841_v30 = vpop.f32.mrb[5].mxu0  ;;  %v965_v31 = vpop.f32.mrb[5].mxu1  ;;  %v847_v18 = vadd.f32 %v6877_v25, %v6859_v5  ;;  %v1100_v25 = vld [vmem:[%s7909_s21] sm:$0xff] }
 0x22e   : > { %v966_v32 = vadd.f32 %v4798_v49, %v965_v31  ;;  %6074 = vmatprep.subr.msk.bf16.mxu1 %vm6866_vm2, %v6072_v24  ;;  %v842_v15 = vadd.f32 %v6859_v5, %v841_v30 }
 0x22f   : > { %v865_v16 = vmul.f32 0.35355338, %v847_v18 }
 0x230   : > { %v6078_v33 = vpack.c.bf16 %v971_v27, %v966_v32  ;;  %v6881_v34 = vpop.f32.mrb[6].mxu0  ;;  %v5497_v35 = vpop.f32.mrb[6].mxu1  ;;  %v864_v19 = vmul.f32 0.35355338, %v842_v15 }
 0x231   : > { %v981_v36 = vadd.f32 %v5497_v35, %v4798_v49  ;;  %v851_v37 = vpop.f32.mrb[7].mxu0  ;;  %v975_v40 = vpop.f32.mrb[7].mxu1  ;;  %v857_v23 = vadd.f32 %v6881_v34, %v6859_v5  ;;  %v1102_v35 = vld [vmem:[%s7909_s21 + $0x10] sm:$0xff] }
 0x232   : > { %v976_v41 = vadd.f32 %v4798_v49, %v975_v40  ;;  %v827_v49 = vadd.f32 %v6861_v6, %v6859_v5  ;;  %v862_v6 = vmul.f32 0.35355338, %v832_v8  ;;  %v852_v22 = vadd.f32 %v6859_v5, %v851_v37  ;;  %v1101_v5 = vld [vmem:[%s7909_s21 + $0x8] sm:$0xff] }
 0x233   : > { %6077 = vmatpush3.bf16.xpose.msk.msra.mxu1 %vm6866_vm2, %v6072_v24  ;;  %v867_v26 = vmul.f32 0.35355338, %v857_v23 }
 0x234   : > { %v6084_v43 = vpack.c.bf16 %v981_v36, %v976_v41  ;;  %v5508_v45 = vpop.f32.mrb[8].mxu0  ;;  %6080 = vmatprep.subr.msk.bf16.mxu1 %vm6866_vm2, %v6078_v33  ;;  %v861_v11 = vmul.f32 0.35355338, %v827_v49  ;;  %v866_v24 = vmul.f32 0.35355338, %v852_v22 }
 0x235   : > { %v1067_v46 = vadd.f32 %v5508_v45, %v4807_v42  ;;  %v1061_v20 = vpop.f32.mrb[9].mxu0 }
 0x236   : > { %v1062_v47 = vadd.f32 %v4807_v42, %v1061_v20 }
 0x238   : > { %v6090_v50 = vpack.c.bf16 %v1067_v46, %v1062_v47  ;;  %v5511_v51 = vpop.f32.mrb[10].mxu0  ;;  %v1104_v46 = vld [vmem:[%s7909_s21 + $0x20] sm:$0xff] }
 0x239   : > { %v1077_v28 = vadd.f32 %v5511_v51, %v4807_v42  ;;  %v1071_v52 = vpop.f32.mrb[11].mxu0 }
 0x23a   : > { %v1072_v53 = vadd.f32 %v4807_v42, %v1071_v52  ;;  %6091 = vmatprep.subr.bf16.mxu0 %v6090_v50  ;;  %v1107_v52 = vld [vmem:[%s7909_s21 + $0x38] sm:$0xff] }
 0x23b   : > { %6083 = vmatpush3.bf16.xpose.msk.msra.mxu1 %vm6866_vm2, %v6078_v33  ;;  %6093 = vmatpush3.bf16.msra.mxu0 %v6090_v50  ;;  %v1103_v33 = vld [vmem:[%s7909_s21 + $0x18] sm:$0xff] }
 0x23c   : > { %v6094_v55 = vpack.c.bf16 %v1077_v28, %v1072_v53  ;;  %v5514_v56 = vpop.f32.mrb[12].mxu0  ;;  %6086 = vmatprep.subr.msk.bf16.mxu1 %vm6866_vm2, %v6084_v43 }
 0x23d   : > { %v1087_v57 = vadd.f32 %v5514_v56, %v4807_v42  ;;  %v1081_v58 = vpop.f32.mrb[13].mxu0 }
 0x23e   : > { %v1082_v38 = vadd.f32 %v4807_v42, %v1081_v58  ;;  %6095 = vmatprep.subr.bf16.mxu0 %v6094_v55 }
 0x23f   : > { %6097 = vmatpush3.bf16.msra.mxu0 %v6094_v55  ;;  %v1106_v55 = vld [vmem:[%s7909_s21 + $0x30] sm:$0xff] }
 0x240   : > { %v6098_v62 = vpack.c.bf16 %v1087_v57, %v1082_v38  ;;  %v5517_v63 = vpop.f32.mrb[14].mxu0  ;;  %v4859_v38 = vld [vmem:[%s7890_s8 + $0x1] ss:$0 sm:$0xff] }
 0x241   : > { %v1097_v1 = vadd.f32 %v5517_v63, %v4807_v42  ;;  %v1091_v48 = vpop.f32.mrb[15].mxu0 }
 0x242   : > { %v1092_v3 = vadd.f32 %v4807_v42, %v1091_v48  ;;  %6099 = vmatprep.subr.bf16.mxu0 %v6098_v62 }
 0x243   : > { %6089 = vmatpush3.bf16.xpose.msk.msra.mxu1 %vm6866_vm2, %v6084_v43  ;;  %6101 = vmatpush3.bf16.msra.mxu0 %v6098_v62  ;;  %v1105_v43 = vld [vmem:[%s7909_s21 + $0x28] sm:$0xff] }
 0x244   : > { %v6102_v7 = vpack.c.bf16 %v1097_v1, %v1092_v3  ;;  %6115 = vmatprep.subr.bf16.mxu1 %v6114_v0 }
 0x246   : > { %6103 = vmatprep.subr.bf16.mxu0 %v6102_v7 }
 0x247   : > { %6105 = vmatpush3.bf16.msra.mxu0 %v6102_v7 }
 0x24a   : > { %5535 = vmatmul.mubr.msk.f32.vlgmr.msra.gmra.mrb[8].mxu1 %vm1108_vm1, %v861_v11 }
 0x24b   : > { %5537 = vmatprep.mubr.msk.f32.mxu1 %vm1108_vm1, %v862_v6  ;;  %6117 = vmatpush3.bf16.msra.mxu1 %v6114_v0 }
 0x24c   : > { %6119 = vmatprep.subr.bf16.mxu1 %v6118_v14 }
 0x24e   : > { %5538 = vmatmul.mubr.msk.f32.gmra.mrb[10].mxu1 %vm1108_vm1, %v863_v17 }
 0x24f   : > { %5540 = vmatprep.mubr.msk.f32.mxu1 %vm1108_vm1, %v864_v19  ;;  %6121 = vmatpush3.bf16.msra.mxu1 %v6118_v14 }
 0x252   : > { %5541 = vmatmul.mubr.msk.f32.gmra.mrb[12].mxu1 %vm1108_vm1, %v865_v16 }
 0x253   : > { %5543 = vmatprep.mubr.msk.f32.mxu1 %vm1108_vm1, %v866_v24 }
 0x256   : > { %5544 = vmatmul.mubr.msk.f32.gmra.mrb[14].mxu1 %vm1108_vm1, %v867_v26 }
 0x257   : > { %5602 = vmatprep.mubr.msk.f32.mxu1 %vm584_vm0, %v6775_v44 }
 0x25a   : > { %5603 = vmatmul.mubr.msk.f32.vlgmr.msra.gmra.mrb[16].mxu1 %vm584_vm0, %v6789_v21 }
 0x25b   : > { %5605 = vmatprep.mubr.msk.f32.mxu1 %vm584_vm0, %v6792_v54 }
 0x25e   : > { %5606 = vmatmul.mubr.msk.f32.gmra.mrb[18].mxu1 %vm584_vm0, %v6803_v60 }
 0x25f   : > { %5608 = vmatprep.mubr.msk.f32.mxu1 %vm584_vm0, %v6807_v61 }
 0x262   : > { %5609 = vmatmul.mubr.msk.f32.gmra.mrb[20].mxu1 %vm584_vm0, %v6818_v39 }
 0x263   : > { %5611 = vmatprep.mubr.msk.f32.mxu1 %vm584_vm0, %v6821_v2 }
 0x266   : > { %5612 = vmatmul.mubr.msk.f32.gmra.mrb[22].mxu1 %vm584_vm0, %v6831_v4 }
 0x31d   : > { %v5536_v27 = vpop.f32.mrb[8].mxu1 }
 0x31e   : > { %v6948_v30 = vadd.f32 %v5536_v27, %v1101_v5  ;;  %v1223_v31 = vpop.f32.mrb[9].mxu1 }
 0x31f   : > { %v6950_v32 = vadd.f32 %v1223_v31, %v1100_v25 }
 0x320   : > { %v1266_v34 = vsel %vm1262_vm3, %v6948_v30, -inf }
 0x321   : > { %1267 = vmax.xlane.f32.xlu1 %v1266_v34  ;;  %v5539_v36 = vpop.f32.mrb[10].mxu1  ;;  %v1263_v37 = vsel %vm1262_vm3, %v6950_v32, -inf }
 0x322   : > { %v6962_v40 = vadd.f32 %v5539_v36, %v1103_v33  ;;  %v1233_v41 = vpop.f32.mrb[11].mxu1  ;;  %1264 = vmax.xlane.f32.xlu0 %v1263_v37 }
 0x323   : > { %v6964_v42 = vadd.f32 %v1233_v41, %v1102_v35 }
 0x324   : > { %v1272_v45 = vsel %vm1262_vm3, %v6962_v40, -inf }
 0x325   : > { %1273 = vmax.xlane.f32.xlu1 %v1272_v45  ;;  %v5542_v20 = vpop.f32.mrb[12].mxu1  ;;  %v1269_v47 = vsel %vm1262_vm3, %v6964_v42, -inf }
 0x326   : > { %v6976_v50 = vadd.f32 %v5542_v20, %v1105_v43  ;;  %v1243_v51 = vpop.f32.mrb[13].mxu1  ;;  %1270 = vmax.xlane.f32.xlu0 %v1269_v47 }
 0x327   : > { %v6978_v28 = vadd.f32 %v1243_v51, %v1104_v46 }
 0x328   : > { %v1278_v53 = vsel %vm1262_vm3, %v6976_v50, -inf }
 0x329   : > { %1279 = vmax.xlane.f32.xlu1 %v1278_v53  ;;  %v5545_v56 = vpop.f32.mrb[14].mxu1  ;;  %v1275_v57 = vsel %vm1262_vm3, %v6978_v28, -inf }
 0x32a   : > { %v6990_v58 = vadd.f32 %v5545_v56, %v1107_v52  ;;  %1276 = vmax.xlane.f32.xlu0 %v1275_v57  ;;  %v1253_v59 = vpop.f32.mrb[15].mxu1 }
 0x32b   : > { %v6992_v29 = vadd.f32 %v1253_v59, %v1106_v55 }
 0x32c   : > { %v1284_v62 = vsel %vm1262_vm3, %v6990_v58, -inf }
 0x32d   : > { %1285 = vmax.xlane.f32.xlu1 %v1284_v62  ;;  %v5604_v63 = vpop.f32.mrb[16].mxu1  ;;  %v1281_v0 = vsel %vm1262_vm3, %v6992_v29, -inf }
 0x32e   : > { %v1692_v1 = vadd.f32 %v5604_v63, %v4859_v38  ;;  %v1686_v48 = vpop.f32.mrb[17].mxu1  ;;  %1282 = vmax.xlane.f32.xlu0 %v1281_v0 }
 0x32f   : > { %v1687_v3 = vadd.f32 %v4859_v38, %v1686_v48 }
 0x331   : > { %v6130_v49 = vpack.c.bf16 %v1692_v1, %v1687_v3  ;;  %v5607_v7 = vpop.f32.mrb[18].mxu1 }
 0x332   : > { %v1702_v8 = vadd.f32 %v5607_v7, %v4859_v38  ;;  %v1696_v9 = vpop.f32.mrb[19].mxu1  ;;  %v4840_v7 = vld [vmem:[%s7886_s4 + $0x20] sm:$0xff] }
 0x333   : > { %v1697_v10 = vadd.f32 %v4859_v38, %v1696_v9  ;;  %6132 = vmatprep.subr.msk.bf16.mxu1 %vm6866_vm2, %v6130_v49 }
 0x334   : > { %6135 = vmatpush3.bf16.xpose.msk.msra.mxu1 %vm6866_vm2, %v6130_v49 }
 0x335   : > { %v6136_v11 = vpack.c.bf16 %v1702_v8, %v1697_v10  ;;  %v5610_v12 = vpop.f32.mrb[20].mxu1  ;;  %v4841_v8 = vld [vmem:[%s7886_s4 + $0x28] sm:$0xff] }
 0x336   : > { %v1712_v14 = vadd.f32 %v5610_v12, %v4859_v38  ;;  %v1706_v6 = vpop.f32.mrb[21].mxu1  ;;  %v6106_v9 = vpack.c.bf16 %v4841_v8, %v4840_v7 }
 0x337   : > { %v1707_v15 = vadd.f32 %v4859_v38, %v1706_v6  ;;  %6138 = vmatprep.subr.msk.bf16.mxu1 %vm6866_vm2, %v6136_v11 }
 0x338   : > { %6107 = vmatprep.subr.bf16.mxu0 %v6106_v9 }
 0x339   : > { %v6142_v17 = vpack.c.bf16 %v1712_v14, %v1707_v15  ;;  %v5613_v18 = vpop.f32.mrb[22].mxu1 }
 0x33a   : > { %v1722_v19 = vadd.f32 %v5613_v18, %v4859_v38  ;;  %v1716_v22 = vpop.f32.mrb[23].mxu1  ;;  %v4842_v18 = vld [vmem:[%s7886_s4 + $0x30] sm:$0xff] }
 0x33b   : > { %v1717_v16 = vadd.f32 %v4859_v38, %v1716_v22 }
 0x33c   : > { %6141 = vmatpush3.bf16.xpose.msk.msra.mxu1 %vm6866_vm2, %v6136_v11 }
 0x33d   : > { %v6148_v23 = vpack.c.bf16 %v1722_v19, %v1717_v16  ;;  %6144 = vmatprep.subr.msk.bf16.mxu1 %vm6866_vm2, %v6142_v17  ;;  %v4843_v19 = vld [vmem:[%s7886_s4 + $0x38] sm:$0xff] }
 0x344   : > { %6147 = vmatpush3.bf16.xpose.msk.msra.mxu1 %vm6866_vm2, %v6142_v17 }
 0x345   : > { %6150 = vmatprep.subr.msk.bf16.mxu1 %vm6866_vm2, %v6148_v23 }
 0x34c   : > { %6153 = vmatpush3.bf16.xpose.msk.msra.mxu1 %vm6866_vm2, %v6148_v23 }
 0x3ae   : > { %v1268_v24 = vpop.xlane.xlu1 %1267 }
 0x3af   : > { %v1288_v26 = vsub.f32 %v6948_v30, %v1268_v24  ;;  %v1265_v5 = vpop.xlane.xlu0 %1264 }
 0x3b0   : > { %v1287_v25 = vsub.f32 %v6950_v32, %v1265_v5  ;;  %v6110_v5 = vpack.c.bf16 %v4843_v19, %v4842_v18 }
 0x3b1   : > { %v1297_v27 = vmul.f32 1.442695, %v1288_v26 }
 0x3b2   : > { %v1295_v31 = vmul.f32 1.442695, %v1287_v25  ;;  %v1274_v33 = vpop.xlane.xlu1 %1273 }
 0x3b3   : > { %6390 = vpow2.f32 %v1297_v27  ;;  %v1290_v34 = vsub.f32 %v6962_v40, %v1274_v33  ;;  %v1271_v35 = vpop.xlane.xlu0 %1270  ;;  %v4868_v27 = vld [vmem:[%s7888_s6 + $0x20] sm:$0xff] }
 0x3b4   : > { %6392 = vpow2.f32 %v1295_v31  ;;  %v1289_v36 = vsub.f32 %v6964_v42, %v1271_v35  ;;  %v4869_v31 = vld [vmem:[%s7888_s6 + $0x28] sm:$0xff] }
 0x3b5   : > { %v1301_v37 = vmul.f32 1.442695, %v1290_v34 }
 0x3b6   : > { %v1299_v41 = vmul.f32 1.442695, %v1289_v36  ;;  %v1280_v43 = vpop.xlane.xlu1 %1279  ;;  %v6122_v36 = vpack.c.bf16 %v4869_v31, %v4868_v27 }
 0x3b7   : > { %6394 = vpow2.f32 %v1301_v37  ;;  %v1292_v45 = vsub.f32 %v6976_v50, %v1280_v43  ;;  %v1277_v30 = vpop.xlane.xlu0 %1276 }
 0x3b8   : > { %6396 = vpow2.f32 %v1299_v41  ;;  %v1291_v32 = vsub.f32 %v6978_v28, %v1277_v30 }
 0x3b9   : > { %v1305_v46 = vmul.f32 1.442695, %v1292_v45 }
 0x3ba   : > { %v1303_v20 = vmul.f32 1.442695, %v1291_v32  ;;  %v1286_v47 = vpop.xlane.xlu1 %1285 }
 0x3bb   : > { %6398 = vpow2.f32 %v1305_v46  ;;  %v1294_v40 = vsub.f32 %v6990_v58, %v1286_v47  ;;  %v1283_v51 = vpop.xlane.xlu0 %1282  ;;  %v4870_v47 = vld [vmem:[%s7888_s6 + $0x30] sm:$0xff] }
 0x3bc   : > { %6400 = vpow2.f32 %v1303_v20  ;;  %v1293_v42 = vsub.f32 %v6992_v29, %v1283_v51 }
 0x3bd   : > { %v6391_v52 = vpop.eup %6390  ;;  %v1309_v53 = vmul.f32 1.442695, %v1294_v40  ;;  %v4871_v40 = vld [vmem:[%s7888_s6 + $0x38] sm:$0xff] }
 0x3be   : > { %v6393_v55 = vpop.eup %6392  ;;  %v1307_v56 = vmul.f32 1.442695, %v1293_v42  ;;  %v1314_v50 = vsel %vm1262_vm3, %v6391_v52, 0.0  ;;  %v6126_v51 = vpack.c.bf16 %v4871_v40, %v4870_v47  ;;  %v4931_v42 = vld [vmem:[%s7886_s4 + $0x40] sm:$0xff] }
 0x3bf   : > { %6402 = vpow2.f32 %v1309_v53  ;;  %1315 = vadd.xlane.f32.xlu1 %v1314_v50  ;;  %v1311_v28 = vsel %vm1262_vm3, %v6393_v55, 0.0 }
 0x3c0   : > { %6404 = vpow2.f32 %v1307_v56  ;;  %1312 = vadd.xlane.f32.xlu0 %v1311_v28 }
 0x3c1   : > { %v6395_v57 = vpop.eup %6394 }
 0x3c2   : > { %v6397_v59 = vpop.eup %6396  ;;  %v1320_v58 = vsel %vm1262_vm3, %v6395_v57, 0.0 }
 0x3c3   : > { %1321 = vadd.xlane.f32.xlu1 %v1320_v58  ;;  %v1317_v38 = vsel %vm1262_vm3, %v6397_v59, 0.0 }
 0x3c4   : > { %1318 = vadd.xlane.f32.xlu0 %v1317_v38 }
 0x3c5   : > { %v6399_v29 = vpop.eup %6398 }
 0x3c6   : > { %v6401_v62 = vpop.eup %6400  ;;  %v1326_v63 = vsel %vm1262_vm3, %v6399_v29, 0.0 }
 0x3c7   : > { %1327 = vadd.xlane.f32.xlu1 %v1326_v63  ;;  %v1323_v0 = vsel %vm1262_vm3, %v6401_v62, 0.0 }
 0x3c8   : > { %1324 = vadd.xlane.f32.xlu0 %v1323_v0 }
 0x3c9   : > { %v6403_v1 = vpop.eup %6402 }
 0x3ca   : > { %v6405_v48 = vpop.eup %6404  ;;  %v1332_v3 = vsel %vm1262_vm3, %v6403_v1, 0.0 }
 0x3cb   : > { %1333 = vadd.xlane.f32.xlu1 %v1332_v3  ;;  %v1329_v49 = vsel %vm1262_vm3, %v6405_v48, 0.0  ;;  %v4934_v3 = vld [vmem:[%s7886_s4 + $0x58] sm:$0xff] }
 0x3cc   : > { %1330 = vadd.xlane.f32.xlu0 %v1329_v49 }
 0x44c   : > { %v1316_v10 = vpop.xlane.xlu1 %1315 }
 0x44d   : > { %6406 = vrcp.f32 %v1316_v10  ;;  %v1313_v11 = vpop.xlane.xlu0 %1312 }
 0x44e   : > { %6408 = vrcp.f32 %v1313_v11 }
 0x450   : > { %v1322_v12 = vpop.xlane.xlu1 %1321 }
 0x451   : > { %6410 = vrcp.f32 %v1322_v12  ;;  %v1319_v14 = vpop.xlane.xlu0 %1318 }
 0x452   : > { %6412 = vrcp.f32 %v1319_v14  ;;  %v4945_v14 = vld [vmem:[%s7887_s5 + $0x40] sm:$0xff] }
 0x454   : > { %v1328_v6 = vpop.xlane.xlu1 %1327 }
 0x455   : > { %6414 = vrcp.f32 %v1328_v6  ;;  %v1325_v15 = vpop.xlane.xlu0 %1324  ;;  %v4946_v6 = vld [vmem:[%s7887_s5 + $0x48] sm:$0xff] }
 0x456   : > { %6416 = vrcp.f32 %v1325_v15 }
 0x457   : > { %v6407_v17 = vpop.eup %6406 }
 0x458   : > { %v6409_v22 = vpop.eup %6408  ;;  %v1334_v16 = vpop.xlane.xlu1 %1333  ;;  %v1344_v26 = vmul.f32 %v6407_v17, %v6391_v52  ;;  %v4932_v52 = vld [vmem:[%s7886_s4 + $0x48] sm:$0xff] }
 0x459   : > { %6418 = vrcp.f32 %v1334_v16  ;;  %v1331_v23 = vpop.xlane.xlu0 %1330  ;;  %v1343_v24 = vmul.f32 %v6409_v22, %v6393_v55  ;;  %v7103_v53 = vpack.c.bf16 %v4932_v52, %v4931_v42  ;;  %v6178_v16 = vpack.c.bf16 %v4946_v6, %v4945_v14 }
 0x45a   : > { %6420 = vrcp.f32 %v1331_v23 }
 0x45b   : > { %v6411_v25 = vpop.eup %6410  ;;  %5562 = vmatprep.mubr.msk.f32.mxu0 %vm1262_vm3, %v1343_v24  ;;  %6338 = vmatprep.subr.bf16.mxu1 %v7103_v53 }
 0x45c   : > { %v6413_v33 = vpop.eup %6412  ;;  %5563 = vmatmul.mubr.msk.f32.vlgmr.msra.gmra.mrb[16].mxu0 %vm1262_vm3, %v1344_v26  ;;  %v1346_v35 = vmul.f32 %v6411_v25, %v6395_v57 }
 0x45d   : > { %6109 = vmatpush3.bf16.msra.mxu0 %v6106_v9  ;;  %v1345_v34 = vmul.f32 %v6413_v33, %v6397_v59  ;;  %v4873_v33 = vld [vmem:[%s7891_s9 + $0x1] ss:$0 sm:$0xff] }
 0x45e   : > { %6111 = vmatprep.subr.bf16.mxu0 %v6110_v5 }
 0x45f   : > { %v6415_v37 = vpop.eup %6414  ;;  %5565 = vmatprep.mubr.msk.f32.mxu0 %vm1262_vm3, %v1345_v34 }
 0x460   : > { %v6417_v41 = vpop.eup %6416  ;;  %5566 = vmatmul.mubr.msk.f32.gmra.mrb[18].mxu0 %vm1262_vm3, %v1346_v35  ;;  %v1348_v45 = vmul.f32 %v6415_v37, %v6399_v29  ;;  %v4845_v29 = vld [vmem:[%s7889_s7 + $0x1] ss:$0 sm:$0xff] }
 0x461   : > { %v1347_v43 = vmul.f32 %v6417_v41, %v6401_v62  ;;  %6113 = vmatpush3.bf16.msra.mxu0 %v6110_v5 }
 0x462   : > { %6123 = vmatprep.subr.bf16.mxu0 %v6122_v36 }
 0x463   : > { %v6419_v30 = vpop.eup %6418  ;;  %5568 = vmatprep.mubr.msk.f32.mxu0 %vm1262_vm3, %v1347_v43 }
 0x464   : > { %v6421_v32 = vpop.eup %6420  ;;  %5569 = vmatmul.mubr.msk.f32.gmra.mrb[20].mxu0 %vm1262_vm3, %v1348_v45  ;;  %v1350_v20 = vmul.f32 %v6419_v30, %v6403_v1  ;;  %v4947_v45 = vld [vmem:[%s7887_s5 + $0x50] sm:$0xff]  ;;  %v4948_v30 = vld [vmem:[%s7887_s5 + $0x58] sm:$0xff] }
 0x465   : > { %v1349_v46 = vmul.f32 %v6421_v32, %v6405_v48  ;;  %v4933_v48 = vld [vmem:[%s7886_s4 + $0x50] sm:$0xff]  ;;  %v6182_v40 = vpack.c.bf16 %v4948_v30, %v4947_v45 }
 0x466   : > { %v7131_v11 = vpack.c.bf16 %v4934_v3, %v4933_v48 }
 0x467   : > { %5571 = vmatprep.mubr.msk.f32.mxu0 %vm1262_vm3, %v1349_v46 }
 0x468   : > { %5572 = vmatmul.mubr.msk.f32.gmra.mrb[22].mxu0 %vm1262_vm3, %v1350_v20 }
 0x469   : > { %5582 = vmatprep.mubr.msk.f32.mxu0 %vm584_vm0, %v6775_v44 }
 0x46c   : > { %5583 = vmatmul.mubr.msk.f32.vlgmr.msra.gmra.mrb[24].mxu0 %vm584_vm0, %v6789_v21 }
 0x46d   : > { %5585 = vmatprep.mubr.msk.f32.mxu0 %vm584_vm0, %v6792_v54  ;;  %6125 = vmatpush3.bf16.msra.mxu0 %v6122_v36 }
 0x46e   : > { %6127 = vmatprep.subr.bf16.mxu0 %v6126_v51 }
 0x470   : > { %5586 = vmatmul.mubr.msk.f32.gmra.mrb[26].mxu0 %vm584_vm0, %v6803_v60 }
 0x471   : > { %5588 = vmatprep.mubr.msk.f32.mxu0 %vm584_vm0, %v6807_v61  ;;  %6129 = vmatpush3.bf16.msra.mxu0 %v6126_v51 }
 0x474   : > { %5589 = vmatmul.mubr.msk.f32.gmra.mrb[28].mxu0 %vm584_vm0, %v6818_v39 }
 0x475   : > { %5591 = vmatprep.mubr.msk.f32.mxu0 %vm584_vm0, %v6821_v2 }
 0x478   : > { %5592 = vmatmul.mubr.msk.f32.gmra.mrb[30].mxu0 %vm584_vm0, %v6831_v4 }
 0x479   : > { %5622 = vmatprep.mubr.msk.f32.mxu0 %vm584_vm0, %v6775_v44 }
 0x47c   : > { %5623 = vmatmul.mubr.msk.f32.vlgmr.msra.gmra.mrb[32].mxu0 %vm584_vm0, %v6789_v21 }
 0x47d   : > { %5625 = vmatprep.mubr.msk.f32.mxu0 %vm584_vm0, %v6792_v54 }
 0x480   : > { %5626 = vmatmul.mubr.msk.f32.gmra.mrb[34].mxu0 %vm584_vm0, %v6803_v60 }
 0x481   : > { %5628 = vmatprep.mubr.msk.f32.mxu0 %vm584_vm0, %v6807_v61 }
 0x484   : > { %5629 = vmatmul.mubr.msk.f32.gmra.mrb[36].mxu0 %vm584_vm0, %v6818_v39 }
 0x485   : > { %5631 = vmatprep.mubr.msk.f32.mxu0 %vm584_vm0, %v6821_v2 }
 0x488   : > { %5632 = vmatmul.mubr.msk.f32.gmra.mrb[38].mxu0 %vm584_vm0, %v6831_v4 }
 0x52f   : > { %v7106_v55 = vpop.f32.mrb[16].mxu0 }
 0x530   : > { %v7108_v56 = vpop.f32.mrb[17].mxu0 }
 0x533   : > { %v7110_v50 = vpop.f32.mrb[18].mxu0 }
 0x534   : > { %v7112_v28 = vpop.f32.mrb[19].mxu0 }
 0x537   : > { %v7114_v57 = vpop.f32.mrb[20].mxu0 }
 0x538   : > { %v7116_v59 = vpop.f32.mrb[21].mxu0 }
 0x53b   : > { %v7118_v58 = vpop.f32.mrb[22].mxu0 }
 0x53c   : > { %v7120_v38 = vpop.f32.mrb[23].mxu0 }
 0x53f   : > { %v5584_v62 = vpop.f32.mrb[24].mxu0 }
 0x540   : > { %v1566_v63 = vadd.f32 %v5584_v62, %v4845_v29  ;;  %v1560_v0 = vpop.f32.mrb[25].mxu0 }
 0x541   : > { %v1561_v1 = vadd.f32 %v4845_v29, %v1560_v0 }
 0x542   : > { %v1600_v8 = vmul.f32 0.35355338, %v1566_v63 }
 0x543   : > { %v1599_v49 = vmul.f32 0.35355338, %v1561_v1  ;;  %v5587_v7 = vpop.f32.mrb[26].mxu0 }
 0x544   : > { %v1576_v9 = vadd.f32 %v5587_v7, %v4845_v29  ;;  %v1570_v10 = vpop.f32.mrb[27].mxu0 }
 0x545   : > { %v1571_v12 = vadd.f32 %v4845_v29, %v1570_v10  ;;  %5650 = vmatprep.mubr.msk.f32.mxu1 %vm1108_vm1, %v1599_v49 }
 0x546   : > { %5651 = vmatmul.mubr.msk.f32.vlgmr.msra.gmra.mrb[24].mxu1 %vm1108_vm1, %v1600_v8  ;;  %v1602_v18 = vmul.f32 0.35355338, %v1576_v9  ;;  %v4883_v8 = vld [vmem:[%s7909_s21 + $0x48] sm:$0xff]  ;;  %v4882_v9 = vld [vmem:[%s7909_s21 + $0x40] sm:$0xff] }
 0x547   : > { %v1601_v15 = vmul.f32 0.35355338, %v1571_v12  ;;  %v5590_v17 = vpop.f32.mrb[28].mxu0  ;;  %6340 = vmatpush3.bf16.msra.mxu1 %v7103_v53 }
 0x548   : > { %v1586_v19 = vadd.f32 %v5590_v17, %v4845_v29  ;;  %v1580_v22 = vpop.f32.mrb[29].mxu0  ;;  %6339 = vmatprep.subr.bf16.mxu1 %v7131_v11 }
 0x549   : > { %v1581_v23 = vadd.f32 %v4845_v29, %v1580_v22  ;;  %5653 = vmatprep.mubr.msk.f32.mxu1 %vm1108_vm1, %v1601_v15  ;;  %v4885_v15 = vld [vmem:[%s7909_s21 + $0x58] sm:$0xff] }
 0x54a   : > { %5654 = vmatmul.mubr.msk.f32.gmra.mrb[26].mxu1 %vm1108_vm1, %v1602_v18  ;;  %v1604_v5 = vmul.f32 0.35355338, %v1586_v19  ;;  %v4884_v18 = vld [vmem:[%s7909_s21 + $0x50] sm:$0xff] }
 0x54b   : > { %v1603_v24 = vmul.f32 0.35355338, %v1581_v23  ;;  %v5593_v26 = vpop.f32.mrb[30].mxu0  ;;  %6341 = vmatpush3.bf16.msra.mxu1 %v7131_v11 }
 0x54c   : > { %v1596_v25 = vadd.f32 %v5593_v26, %v4845_v29  ;;  %v1590_v27 = vpop.f32.mrb[31].mxu0  ;;  %6179 = vmatprep.subr.bf16.mxu1 %v6178_v16  ;;  %v4887_v26 = vld [vmem:[%s7909_s21 + $0x68] sm:$0xff] }
 0x54d   : > { %v1591_v31 = vadd.f32 %v4845_v29, %v1590_v27  ;;  %5656 = vmatprep.mubr.msk.f32.mxu1 %vm1108_vm1, %v1603_v24 }
 0x54e   : > { %5657 = vmatmul.mubr.msk.f32.gmra.mrb[28].mxu1 %vm1108_vm1, %v1604_v5  ;;  %v1606_v36 = vmul.f32 0.35355338, %v1596_v25  ;;  %v4886_v25 = vld [vmem:[%s7909_s21 + $0x60] sm:$0xff] }
 0x54f   : > { %v1605_v34 = vmul.f32 0.35355338, %v1591_v31  ;;  %v5624_v35 = vpop.f32.mrb[32].mxu0 }
 0x550   : > { %v1810_v37 = vadd.f32 %v5624_v35, %v4873_v33  ;;  %v1804_v41 = vpop.f32.mrb[33].mxu0 }
 0x551   : > { %v1805_v43 = vadd.f32 %v4873_v33, %v1804_v41  ;;  %5659 = vmatprep.mubr.msk.f32.mxu1 %vm1108_vm1, %v1605_v34  ;;  %v4888_v41 = vld [vmem:[%s7909_s21 + $0x70] sm:$0xff] }
 0x552   : > { %5660 = vmatmul.mubr.msk.f32.gmra.mrb[30].mxu1 %vm1108_vm1, %v1606_v36  ;;  %v4889_v36 = vld [vmem:[%s7909_s21 + $0x78] sm:$0xff] }
 0x553   : > { %v6154_v32 = vpack.c.bf16 %v1810_v37, %v1805_v43  ;;  %v5627_v46 = vpop.f32.mrb[34].mxu0  ;;  %5732 = vmatprep.mubr.msk.f32.mxu1 %vm584_vm0, %v6807_v61 }
 0x554   : > { %v1820_v20 = vadd.f32 %v5627_v46, %v4873_v33  ;;  %v1814_v47 = vpop.f32.mrb[35].mxu0 }
 0x555   : > { %v1815_v51 = vadd.f32 %v4873_v33, %v1814_v47  ;;  %6155 = vmatprep.subr.bf16.mxu0 %v6154_v32 }
 0x556   : > { %6157 = vmatpush3.bf16.msra.mxu0 %v6154_v32  ;;  %5733 = vmatmul.mubr.msk.f32.vlgmr.msra.gmra.mrb[32].mxu1 %vm584_vm0, %v6818_v39 }
 0x557   : > { %v6158_v42 = vpack.c.bf16 %v1820_v20, %v1815_v51  ;;  %v5630_v52 = vpop.f32.mrb[36].mxu0  ;;  %5735 = vmatprep.mubr.msk.f32.mxu1 %vm584_vm0, %v6821_v2  ;;  %6181 = vmatpush3.bf16.msra.mxu1 %v6178_v16 }
 0x558   : > { %v1830_v29 = vadd.f32 %v5630_v52, %v4873_v33  ;;  %v1824_v62 = vpop.f32.mrb[37].mxu0  ;;  %6183 = vmatprep.subr.bf16.mxu1 %v6182_v40 }
 0x559   : > { %v1825_v63 = vadd.f32 %v4873_v33, %v1824_v62  ;;  %6159 = vmatprep.subr.bf16.mxu0 %v6158_v42 }
 0x55a   : > { %6161 = vmatpush3.bf16.msra.mxu0 %v6158_v42  ;;  %5736 = vmatmul.mubr.msk.f32.gmra.mrb[34].mxu1 %vm584_vm0, %v6831_v4 }
 0x55b   : > { %v6162_v0 = vpack.c.bf16 %v1830_v29, %v1825_v63  ;;  %v5633_v1 = vpop.f32.mrb[38].mxu0  ;;  %6185 = vmatpush3.bf16.msra.mxu1 %v6182_v40  ;;  %5746 = vmatprep.mubr.msk.f32.mxu1 %vm584_vm0, %v6775_v44  ;;  %v4950_v29 = vld [vmem:[%s7890_s8 + $0x2] ss:$0 sm:$0xff] }
 0x55c   : > { %v1840_v48 = vadd.f32 %v5633_v1, %v4873_v33  ;;  %v1834_v3 = vpop.f32.mrb[39].mxu0 }
 0x55d   : > { %v1835_v49 = vadd.f32 %v4873_v33, %v1834_v3  ;;  %6163 = vmatprep.subr.bf16.mxu0 %v6162_v0 }
 0x55e   : > { %6165 = vmatpush3.bf16.msra.mxu0 %v6162_v0  ;;  %5747 = vmatmul.mubr.msk.f32.vlgmr.msra.gmra.mrb[36].mxu1 %vm584_vm0, %v6789_v21 }
 0x55f   : > { %v6166_v7 = vpack.c.bf16 %v1840_v48, %v1835_v49  ;;  %5749 = vmatprep.mubr.msk.f32.mxu1 %vm584_vm0, %v6792_v54 }
 0x561   : > { %6167 = vmatprep.subr.bf16.mxu0 %v6166_v7 }
 0x562   : > { %6169 = vmatpush3.bf16.msra.mxu0 %v6166_v7  ;;  %5750 = vmatmul.mubr.msk.f32.gmra.mrb[38].mxu1 %vm584_vm0, %v6803_v60 }
 0x563   : > { %5752 = vmatprep.mubr.msk.f32.mxu1 %vm584_vm0, %v6807_v61 }
 0x566   : > { %5753 = vmatmul.mubr.msk.f32.gmra.mrb[40].mxu1 %vm584_vm0, %v6818_v39 }
 0x567   : > { %5755 = vmatprep.mubr.msk.f32.mxu1 %vm584_vm0, %v6821_v2 }
 0x56a   : > { %5756 = vmatmul.mubr.msk.f32.gmra.mrb[42].mxu1 %vm584_vm0, %v6831_v4 }
 0x619   : > { %v5652_v10 = vpop.f32.mrb[24].mxu1 }
 0x61a   : > { %v7189_v12 = vadd.f32 %v5652_v10, %v4883_v8  ;;  %v1966_v14 = vpop.f32.mrb[25].mxu1 }
 0x61b   : > { %v7191_v6 = vadd.f32 %v4882_v9, %v1966_v14 }
 0x61c   : > { %v2008_v17 = vsel %vm1262_vm3, %v7189_v12, -inf }
 0x61d   : > { %2009 = vmax.xlane.f32.xlu1 %v2008_v17  ;;  %v5655_v19 = vpop.f32.mrb[26].mxu1  ;;  %v2005_v22 = vsel %vm1262_vm3, %v7191_v6, -inf }
 0x61e   : > { %v7203_v16 = vadd.f32 %v5655_v19, %v4885_v15  ;;  %v1976_v23 = vpop.f32.mrb[27].mxu1  ;;  %2006 = vmax.xlane.f32.xlu0 %v2005_v22 }
 0x61f   : > { %v7205_v24 = vadd.f32 %v4884_v18, %v1976_v23 }
 0x620   : > { %v2014_v5 = vsel %vm1262_vm3, %v7203_v16, -inf }
 0x621   : > { %2015 = vmax.xlane.f32.xlu1 %v2014_v5  ;;  %v5658_v27 = vpop.f32.mrb[28].mxu1  ;;  %v2011_v31 = vsel %vm1262_vm3, %v7205_v24, -inf }
 0x622   : > { %v7217_v33 = vadd.f32 %v5658_v27, %v4887_v26  ;;  %v1986_v34 = vpop.f32.mrb[29].mxu1  ;;  %2012 = vmax.xlane.f32.xlu0 %v2011_v31 }
 0x623   : > { %v7219_v35 = vadd.f32 %v4886_v25, %v1986_v34 }
 0x624   : > { %v2020_v37 = vsel %vm1262_vm3, %v7217_v33, -inf }
 0x625   : > { %2021 = vmax.xlane.f32.xlu1 %v2020_v37  ;;  %v5661_v43 = vpop.f32.mrb[30].mxu1  ;;  %v2017_v45 = vsel %vm1262_vm3, %v7219_v35, -inf }
 0x626   : > { %v7231_v30 = vadd.f32 %v5661_v43, %v4889_v36  ;;  %v1996_v32 = vpop.f32.mrb[31].mxu1  ;;  %2018 = vmax.xlane.f32.xlu0 %v2017_v45 }
 0x627   : > { %v7233_v46 = vadd.f32 %v4888_v41, %v1996_v32 }
 0x628   : > { %v2026_v20 = vsel %vm1262_vm3, %v7231_v30, -inf }
 0x629   : > { %2027 = vmax.xlane.f32.xlu1 %v2026_v20  ;;  %v7237_v47 = vpop.f32.mrb[32].mxu1  ;;  %v2023_v40 = vsel %vm1262_vm3, %v7233_v46, -inf }
 0x62a   : > { %v7241_v51 = vpop.f32.mrb[33].mxu1  ;;  %2024 = vmax.xlane.f32.xlu0 %v2023_v40 }
 0x62d   : > { %v7243_v42 = vpop.f32.mrb[34].mxu1 }
 0x62e   : > { %v7245_v52 = vpop.f32.mrb[35].mxu1 }
 0x631   : > { %v5748_v62 = vpop.f32.mrb[36].mxu1 }
 0x632   : > { %v2693_v63 = vadd.f32 %v5748_v62, %v4950_v29  ;;  %v2687_v0 = vpop.f32.mrb[37].mxu1 }
 0x633   : > { %v2688_v1 = vadd.f32 %v4950_v29, %v2687_v0 }
 0x635   : > { %v6194_v48 = vpack.c.bf16 %v2693_v63, %v2688_v1  ;;  %v5751_v3 = vpop.f32.mrb[38].mxu1 }
 0x636   : > { %v2703_v49 = vadd.f32 %v5751_v3, %v4950_v29  ;;  %v2697_v7 = vpop.f32.mrb[39].mxu1 }
 0x637   : > { %v2698_v8 = vadd.f32 %v4950_v29, %v2697_v7  ;;  %6196 = vmatprep.subr.msk.bf16.mxu1 %vm6866_vm2, %v6194_v48 }
 0x638   : > { %6199 = vmatpush3.bf16.xpose.msk.msra.mxu1 %vm6866_vm2, %v6194_v48 }
 0x639   : > { %v6200_v9 = vpack.c.bf16 %v2703_v49, %v2698_v8  ;;  %v5754_v10 = vpop.f32.mrb[40].mxu1 }
 0x63a   : > { %v2713_v14 = vadd.f32 %v5754_v10, %v4950_v29  ;;  %v2707_v15 = vpop.f32.mrb[41].mxu1 }
 0x63b   : > { %v2708_v17 = vadd.f32 %v4950_v29, %v2707_v15  ;;  %6202 = vmatprep.subr.msk.bf16.mxu1 %vm6866_vm2, %v6200_v9 }
 0x63d   : > { %v6206_v18 = vpack.c.bf16 %v2713_v14, %v2708_v17  ;;  %v5757_v19 = vpop.f32.mrb[42].mxu1 }
 0x63e   : > { %v2723_v22 = vadd.f32 %v5757_v19, %v4950_v29  ;;  %v2717_v23 = vpop.f32.mrb[43].mxu1 }
 0x63f   : > { %v2718_v26 = vadd.f32 %v4950_v29, %v2717_v23 }
 0x640   : > { %6205 = vmatpush3.bf16.xpose.msk.msra.mxu1 %vm6866_vm2, %v6200_v9 }
 0x641   : > { %v6212_v5 = vpack.c.bf16 %v2723_v22, %v2718_v26  ;;  %6208 = vmatprep.subr.msk.bf16.mxu1 %vm6866_vm2, %v6206_v18 }
 0x648   : > { %6211 = vmatpush3.bf16.xpose.msk.msra.mxu1 %vm6866_vm2, %v6206_v18 }
 0x649   : > { %6214 = vmatprep.subr.msk.bf16.mxu1 %vm6866_vm2, %v6212_v5 }
 0x650   : > { %6217 = vmatpush3.bf16.xpose.msk.msra.mxu1 %vm6866_vm2, %v6212_v5  ;;  %v4914_v5 = vld [vmem:[%s7892_s10 + $0x8] sm:$0xff] }
 0x651   : > { %5690 = vmatprep.subr.mxu0 %v4914_v5 }
 0x6aa   : > { %v2010_v25 = vpop.xlane.xlu1 %2009 }
 0x6ab   : > { %v2030_v27 = vsub.f32 %v7189_v12, %v2010_v25  ;;  %v2007_v31 = vpop.xlane.xlu0 %2006 }
 0x6ac   : > { %v2029_v34 = vsub.f32 %v7191_v6, %v2007_v31 }
 0x6ad   : > { %v2039_v36 = vmul.f32 1.442695, %v2030_v27 }
 0x6ae   : > { %v2037_v37 = vmul.f32 1.442695, %v2029_v34  ;;  %v2016_v41 = vpop.xlane.xlu1 %2015 }
 0x6af   : > { %6422 = vpow2.f32 %v2039_v36  ;;  %v2032_v43 = vsub.f32 %v7203_v16, %v2016_v41  ;;  %v2013_v45 = vpop.xlane.xlu0 %2012 }
 0x6b0   : > { %6424 = vpow2.f32 %v2037_v37  ;;  %v2031_v32 = vsub.f32 %v7205_v24, %v2013_v45 }
 0x6b1   : > { %v2043_v20 = vmul.f32 1.442695, %v2032_v43 }
 0x6b2   : > { %v2041_v40 = vmul.f32 1.442695, %v2031_v32  ;;  %v2022_v29 = vpop.xlane.xlu1 %2021 }
 0x6b3   : > { %6426 = vpow2.f32 %v2043_v20  ;;  %v2034_v62 = vsub.f32 %v7217_v33, %v2022_v29  ;;  %v2019_v12 = vpop.xlane.xlu0 %2018 }
 0x6b4   : > { %6428 = vpow2.f32 %v2041_v40  ;;  %v2033_v6 = vsub.f32 %v7219_v35, %v2019_v12 }
 0x6b5   : > { %v2047_v63 = vmul.f32 1.442695, %v2034_v62 }
 0x6b6   : > { %v2045_v0 = vmul.f32 1.442695, %v2033_v6  ;;  %v2028_v1 = vpop.xlane.xlu1 %2027 }
 0x6b7   : > { %6430 = vpow2.f32 %v2047_v63  ;;  %v2036_v16 = vsub.f32 %v7231_v30, %v2028_v1  ;;  %v2025_v48 = vpop.xlane.xlu0 %2024 }
 0x6b8   : > { %6432 = vpow2.f32 %v2045_v0  ;;  %v2035_v24 = vsub.f32 %v7233_v46, %v2025_v48 }
 0x6b9   : > { %v6423_v3 = vpop.eup %6422  ;;  %v2051_v49 = vmul.f32 1.442695, %v2036_v16 }
 0x6ba   : > { %v6425_v7 = vpop.eup %6424  ;;  %v2049_v8 = vmul.f32 1.442695, %v2035_v24  ;;  %v2056_v33 = vsel %vm1262_vm3, %v6423_v3, 0.0 }
 0x6bb   : > { %6434 = vpow2.f32 %v2051_v49  ;;  %2057 = vadd.xlane.f32.xlu1 %v2056_v33  ;;  %v2053_v35 = vsel %vm1262_vm3, %v6425_v7, 0.0 }
 0x6bc   : > { %6436 = vpow2.f32 %v2049_v8  ;;  %2054 = vadd.xlane.f32.xlu0 %v2053_v35 }
 0x6bd   : > { %v6427_v9 = vpop.eup %6426 }
 0x6be   : > { %v6429_v10 = vpop.eup %6428  ;;  %v2062_v30 = vsel %vm1262_vm3, %v6427_v9, 0.0 }
 0x6bf   : > { %2063 = vadd.xlane.f32.xlu1 %v2062_v30  ;;  %v2059_v14 = vsel %vm1262_vm3, %v6429_v10, 0.0 }
 0x6c0   : > { %2060 = vadd.xlane.f32.xlu0 %v2059_v14 }
 0x6c1   : > { %v6431_v46 = vpop.eup %6430 }
 0x6c2   : > { %v6433_v15 = vpop.eup %6432  ;;  %v2068_v17 = vsel %vm1262_vm3, %v6431_v46, 0.0 }
 0x6c3   : > { %2069 = vadd.xlane.f32.xlu1 %v2068_v17  ;;  %v2065_v18 = vsel %vm1262_vm3, %v6433_v15, 0.0  ;;  %v4960_v17 = vld [vmem:[%s7888_s6 + $0x48] sm:$0xff] }
 0x6c4   : > { %2066 = vadd.xlane.f32.xlu0 %v2065_v18 }
 0x6c5   : > { %v6435_v19 = vpop.eup %6434 }
 0x6c6   : > { %v6437_v22 = vpop.eup %6436  ;;  %v2074_v23 = vsel %vm1262_vm3, %v6435_v19, 0.0 }
 0x6c7   : > { %2075 = vadd.xlane.f32.xlu1 %v2074_v23  ;;  %v2071_v26 = vsel %vm1262_vm3, %v6437_v22, 0.0  ;;  %v5017_v23 = vld [vmem:[%s7886_s4 + $0x78] sm:$0xff] }
 0x6c8   : > { %2072 = vadd.xlane.f32.xlu0 %v2071_v26 }
 0x748   : > { %v2058_v25 = vpop.xlane.xlu1 %2057 }
 0x749   : > { %6438 = vrcp.f32 %v2058_v25  ;;  %v2055_v27 = vpop.xlane.xlu0 %2054 }
 0x74a   : > { %6440 = vrcp.f32 %v2055_v27 }
 0x74c   : > { %v2064_v31 = vpop.xlane.xlu1 %2063 }
 0x74d   : > { %6442 = vrcp.f32 %v2064_v31  ;;  %v2061_v34 = vpop.xlane.xlu0 %2060 }
 0x74e   : > { %6444 = vrcp.f32 %v2061_v34 }
 0x750   : > { %v2070_v36 = vpop.xlane.xlu1 %2069 }
 0x751   : > { %6446 = vrcp.f32 %v2070_v36  ;;  %v2067_v37 = vpop.xlane.xlu0 %2066 }
 0x752   : > { %6448 = vrcp.f32 %v2067_v37 }
 0x753   : > { %v6439_v41 = vpop.eup %6438 }
 0x754   : > { %v6441_v43 = vpop.eup %6440  ;;  %v2076_v45 = vpop.xlane.xlu1 %2075  ;;  %v2086_v40 = vmul.f32 %v6439_v41, %v6423_v3  ;;  %v4964_v41 = vld [vmem:[%s7891_s9 + $0x2] ss:$0 sm:$0xff] }
 0x755   : > { %6450 = vrcp.f32 %v2076_v45  ;;  %v2073_v32 = vpop.xlane.xlu0 %2072  ;;  %v2085_v20 = vmul.f32 %v6441_v43, %v6425_v7  ;;  %v1480_v7 = vld [vmem:[%s7892_s10] sm:$0xff]  ;;  %v5043_v45 = vld [vmem:[%s7888_s6 + $0x68] sm:$0xff] }
 0x756   : > { %6452 = vrcp.f32 %v2073_v32  ;;  %v5042_v43 = vld [vmem:[%s7888_s6 + $0x60] sm:$0xff] }
 0x757   : > { %v6443_v29 = vpop.eup %6442  ;;  %5678 = vmatprep.mubr.msk.f32.mxu0 %vm1262_vm3, %v2085_v20 }
 0x758   : > { %v6445_v62 = vpop.eup %6444  ;;  %5679 = vmatmul.mubr.msk.f32.vlgmr.msra.gmra.mrb[40].mxu0 %vm1262_vm3, %v2086_v40  ;;  %v2088_v6 = vmul.f32 %v6443_v29, %v6427_v9 }
 0x759   : > { %v2087_v12 = vmul.f32 %v6445_v62, %v6429_v10  ;;  %5691 = vmatpush3.msra.mxu0 %v4914_v5 }
 0x75a   : > { %5704 = vmatprep.subr.mxu0 %v1480_v7 }
 0x75b   : > { %v6447_v63 = vpop.eup %6446  ;;  %5681 = vmatprep.mubr.msk.f32.mxu0 %vm1262_vm3, %v2087_v12  ;;  %v6250_v12 = vpack.c.bf16 %v5043_v45, %v5042_v43 }
 0x75c   : > { %v6449_v0 = vpop.eup %6448  ;;  %5682 = vmatmul.mubr.msk.f32.gmra.mrb[42].mxu0 %vm1262_vm3, %v2088_v6  ;;  %v2090_v16 = vmul.f32 %v6447_v63, %v6431_v46 }
 0x75d   : > { %v2089_v1 = vmul.f32 %v6449_v0, %v6433_v15  ;;  %v4959_v15 = vld [vmem:[%s7888_s6 + $0x40] sm:$0xff] }
 0x75e   : > { %v6186_v18 = vpack.c.bf16 %v4960_v17, %v4959_v15 }
 0x75f   : > { %v6451_v48 = vpop.eup %6450  ;;  %5684 = vmatprep.mubr.msk.f32.mxu0 %vm1262_vm3, %v2089_v1 }
 0x760   : > { %v6453_v24 = vpop.eup %6452  ;;  %5685 = vmatmul.mubr.msk.f32.gmra.mrb[44].mxu0 %vm1262_vm3, %v2090_v16  ;;  %v2092_v49 = vmul.f32 %v6451_v48, %v6435_v19 }
 0x761   : > { %v2091_v3 = vmul.f32 %v6453_v24, %v6437_v22  ;;  %v5016_v22 = vld [vmem:[%s7886_s4 + $0x70] sm:$0xff] }
 0x762   : > { %v6238_v34 = vpack.c.bf16 %v5017_v23, %v5016_v22 }
 0x763   : > { %5687 = vmatprep.mubr.msk.f32.mxu0 %vm1262_vm3, %v2091_v3 }
 0x764   : > { %5688 = vmatmul.mubr.msk.f32.gmra.mrb[46].mxu0 %vm1262_vm3, %v2092_v49 }
 0x82b   : > { %v5680_v8 = vpop.f32.mrb[40].mxu0 }
 0x82c   : > { %v2183_v33 = vpop.f32.mrb[41].mxu0 }
 0x82d   : > { %5692 = vmatprep.mubr.msk.f32.mxu0 %vm1108_vm1, %v2183_v33 }
 0x82e   : > { %5693 = vmatmul.mubr.msk.f32.vlgmr.msra.gmra.mrb[48].mxu0 %vm1108_vm1, %v5680_v8 }
 0x82f   : > { %5705 = vmatpush3.msra.mxu0 %v1480_v7  ;;  %v5683_v35 = vpop.f32.mrb[42].mxu0 }
 0x830   : > { %v2193_v9 = vpop.f32.mrb[43].mxu0  ;;  %6171 = vmatprep.subr.bf16.mxu0 %v7103_v53 }
 0x831   : > { %5695 = vmatprep.mubr.msk.f32.mxu0 %vm1108_vm1, %v2193_v9 }
 0x832   : > { %5696 = vmatmul.mubr.msk.f32.gmra.mrb[50].mxu0 %vm1108_vm1, %v5683_v35 }
 0x833   : > { %v5686_v10 = vpop.f32.mrb[44].mxu0 }
 0x834   : > { %v2203_v30 = vpop.f32.mrb[45].mxu0 }
 0x835   : > { %5698 = vmatprep.mubr.msk.f32.mxu0 %vm1108_vm1, %v2203_v30  ;;  %v5045_v30 = vld [vmem:[%s7888_s6 + $0x78] sm:$0xff] }
 0x836   : > { %5699 = vmatmul.mubr.msk.f32.gmra.mrb[52].mxu0 %vm1108_vm1, %v5686_v10 }
 0x837   : > { %v5689_v14 = vpop.f32.mrb[46].mxu0 }
 0x838   : > { %v2213_v46 = vpop.f32.mrb[47].mxu0 }
 0x839   : > { %5701 = vmatprep.mubr.msk.f32.mxu0 %vm1108_vm1, %v2213_v46 }
 0x83a   : > { %5702 = vmatmul.mubr.msk.f32.gmra.mrb[54].mxu0 %vm1108_vm1, %v5689_v14 }
 0x83b   : > { %5706 = vmatprep.mubr.msk.f32.mxu0 %vm1108_vm1, %v7108_v56 }
 0x83e   : > { %5707 = vmatmul.mubr.msk.f32.vlgmr.msra.gmra.mrb[48].mxu0 %vm1108_vm1, %v7106_v55  ;;  %v4962_v55 = vld [vmem:[%s7888_s6 + $0x58] sm:$0xff] }
 0x83f   : > { %6173 = vmatpush3.bf16.msra.mxu0 %v7103_v53  ;;  %5709 = vmatprep.mubr.msk.f32.mxu0 %vm1108_vm1, %v7112_v28  ;;  %v4961_v53 = vld [vmem:[%s7888_s6 + $0x50] sm:$0xff]  ;;  %v5015_v28 = vld [vmem:[%s7886_s4 + $0x68] sm:$0xff] }
 0x840   : > { %6175 = vmatprep.subr.bf16.mxu0 %v7131_v11  ;;  %v6190_v56 = vpack.c.bf16 %v4962_v55, %v4961_v53 }
 0x842   : > { %5710 = vmatmul.mubr.msk.f32.gmra.mrb[50].mxu0 %vm1108_vm1, %v7110_v50  ;;  %v5014_v50 = vld [vmem:[%s7886_s4 + $0x60] sm:$0xff] }
 0x843   : > { %5712 = vmatprep.mubr.msk.f32.mxu0 %vm1108_vm1, %v7116_v59  ;;  %6177 = vmatpush3.bf16.msra.mxu0 %v7131_v11  ;;  %v4936_v59 = vld [vmem:[%s7889_s7 + $0x2] ss:$0 sm:$0xff] }
 0x844   : > { %6187 = vmatprep.subr.bf16.mxu0 %v6186_v18  ;;  %v2582_v36 = vadd.f32 %v4936_v59, %v7241_v51  ;;  %v2587_v51 = vadd.f32 %v7237_v47, %v4936_v59  ;;  %v2592_v63 = vadd.f32 %v4936_v59, %v7245_v52  ;;  %v2597_v47 = vadd.f32 %v7243_v42, %v4936_v59  ;;  %v5044_v42 = vld [vmem:[%s7888_s6 + $0x70] sm:$0xff] }
 0x846   : > { %5713 = vmatmul.mubr.msk.f32.gmra.mrb[52].mxu0 %vm1108_vm1, %v7114_v57  ;;  %v6234_v57 = vpack.c.bf16 %v5015_v28, %v5014_v50  ;;  %v2604_v6 = vmul.f32 0.35355338, %v2582_v36  ;;  %v2605_v48 = vmul.f32 0.35355338, %v2587_v51  ;;  %v2606_v49 = vmul.f32 0.35355338, %v2592_v63 }
 0x847   : > { %5715 = vmatprep.mubr.msk.f32.mxu0 %vm1108_vm1, %v7120_v38  ;;  %v2607_v33 = vmul.f32 0.35355338, %v2597_v47  ;;  %v4973_v50 = vld [vmem:[%s7909_s21 + $0x80] sm:$0xff]  ;;  %v4979_v51 = vld [vmem:[%s7909_s21 + $0xb0] sm:$0xff] }
 0x848   : > { %6235 = vmatprep.subr.bf16.mxu1 %v6234_v57  ;;  %v7489_v63 = vld [vmem:[%s7889_s7 + $0x3] ss:$0 sm:$0xff] }
 0x84a   : > { %5716 = vmatmul.mubr.msk.f32.gmra.mrb[54].mxu0 %vm1108_vm1, %v7118_v58 }
 0x84b   : > { %5726 = vmatprep.mubr.msk.f32.mxu0 %vm584_vm0, %v6775_v44 }
 0x84e   : > { %5727 = vmatmul.mubr.msk.f32.vlgmr.msra.gmra.mrb[56].mxu0 %vm584_vm0, %v6789_v21 }
 0x84f   : > { %5729 = vmatprep.mubr.msk.f32.mxu0 %vm584_vm0, %v6792_v54  ;;  %6189 = vmatpush3.bf16.msra.mxu0 %v6186_v18  ;;  %v6254_v18 = vpack.c.bf16 %v5045_v30, %v5044_v42 }
 0x850   : > { %6191 = vmatprep.subr.bf16.mxu0 %v6190_v56 }
 0x852   : > { %5730 = vmatmul.mubr.msk.f32.gmra.mrb[58].mxu0 %vm584_vm0, %v6803_v60 }
 0x853   : > { %6193 = vmatpush3.bf16.msra.mxu0 %v6190_v56  ;;  %5766 = vmatprep.mubr.msk.f32.mxu0 %vm584_vm0, %v6775_v44  ;;  %v4974_v56 = vld [vmem:[%s7909_s21 + $0x88] sm:$0xff] }
 0x856   : > { %5767 = vmatmul.mubr.msk.f32.vlgmr.msra.gmra.mrb[60].mxu0 %vm584_vm0, %v6789_v21 }
 0x857   : > { %5769 = vmatprep.mubr.msk.f32.mxu0 %vm584_vm0, %v6792_v54 }
 0x85a   : > { %5770 = vmatmul.mubr.msk.f32.gmra.mrb[62].mxu0 %vm584_vm0, %v6803_v60 }
 0x85b   : > { %5772 = vmatprep.mubr.msk.f32.mxu0 %vm584_vm0, %v6807_v61 }
 0x85e   : > { %5773 = vmatmul.mubr.msk.f32.gmra.mrb[64].mxu0 %vm584_vm0, %v6818_v39 }
 0x85f   : > { %5775 = vmatprep.mubr.msk.f32.mxu0 %vm584_vm0, %v6821_v2 }
 0x862   : > { %5776 = vmatmul.mubr.msk.f32.gmra.mrb[66].mxu0 %vm584_vm0, %v6831_v4 }
 0x921   : > { %v5728_v58 = vpop.f32.mrb[56].mxu0 }
 0x922   : > { %v2567_v38 = vadd.f32 %v5728_v58, %v4936_v59  ;;  %v2561_v11 = vpop.f32.mrb[57].mxu0 }
 0x923   : > { %v2562_v19 = vadd.f32 %v4936_v59, %v2561_v11 }
 0x924   : > { %v2601_v25 = vmul.f32 0.35355338, %v2567_v38  ;;  %v4976_v38 = vld [vmem:[%s7909_s21 + $0x98] sm:$0xff] }
 0x925   : > { %v2600_v26 = vmul.f32 0.35355338, %v2562_v19  ;;  %v5731_v5 = vpop.f32.mrb[58].mxu0  ;;  %v4975_v19 = vld [vmem:[%s7909_s21 + $0x90] sm:$0xff] }
 0x926   : > { %v2577_v27 = vadd.f32 %v5731_v5, %v4936_v59  ;;  %v2571_v31 = vpop.f32.mrb[59].mxu0 }
 0x927   : > { %v2572_v37 = vadd.f32 %v4936_v59, %v2571_v31  ;;  %5794 = vmatprep.mubr.msk.f32.mxu1 %vm1108_vm1, %v2600_v26 }
 0x928   : > { %5795 = vmatmul.mubr.msk.f32.vlgmr.msra.gmra.mrb[44].mxu1 %vm1108_vm1, %v2601_v25  ;;  %v2603_v40 = vmul.f32 0.35355338, %v2577_v27  ;;  %v4978_v27 = vld [vmem:[%s7909_s21 + $0xa8] sm:$0xff] }
 0x929   : > { %v2602_v32 = vmul.f32 0.35355338, %v2572_v37  ;;  %v5768_v20 = vpop.f32.mrb[60].mxu0  ;;  %6237 = vmatpush3.bf16.msra.mxu1 %v6234_v57 }
 0x92a   : > { %v2811_v29 = vadd.f32 %v5768_v20, %v4964_v41  ;;  %v2805_v62 = vpop.f32.mrb[61].mxu0  ;;  %6239 = vmatprep.subr.bf16.mxu1 %v6238_v34 }
 0x92b   : > { %v2806_v0 = vadd.f32 %v4964_v41, %v2805_v62  ;;  %5797 = vmatprep.mubr.msk.f32.mxu1 %vm1108_vm1, %v2602_v32  ;;  %v4980_v32 = vld [vmem:[%s7909_s21 + $0xb8] sm:$0xff] }
 0x92c   : > { %5798 = vmatmul.mubr.msk.f32.gmra.mrb[46].mxu1 %vm1108_vm1, %v2603_v40 }
 0x92d   : > { %v6218_v1 = vpack.c.bf16 %v2811_v29, %v2806_v0  ;;  %v5771_v16 = vpop.f32.mrb[62].mxu0  ;;  %5800 = vmatprep.mubr.msk.f32.mxu1 %vm1108_vm1, %v2604_v6  ;;  %6241 = vmatpush3.bf16.msra.mxu1 %v6238_v34  ;;  %v4977_v34 = vld [vmem:[%s7909_s21 + $0xa0] sm:$0xff] }
 0x92e   : > { %v2821_v24 = vadd.f32 %v5771_v16, %v4964_v41  ;;  %v2815_v3 = vpop.f32.mrb[63].mxu0  ;;  %6251 = vmatprep.subr.bf16.mxu1 %v6250_v12 }
 0x92f   : > { %v2816_v7 = vadd.f32 %v4964_v41, %v2815_v3  ;;  %6219 = vmatprep.subr.bf16.mxu0 %v6218_v1 }
 0x930   : > { %5801 = vmatmul.mubr.msk.f32.gmra.mrb[48].mxu1 %vm1108_vm1, %v2605_v48  ;;  %6221 = vmatpush3.bf16.msra.mxu0 %v6218_v1 }
 0x931   : > { %v6222_v52 = vpack.c.bf16 %v2821_v24, %v2816_v7  ;;  %v5774_v8 = vpop.f32.mrb[64].mxu0  ;;  %5803 = vmatprep.mubr.msk.f32.mxu1 %vm1108_vm1, %v2606_v49 }
 0x932   : > { %v2831_v35 = vadd.f32 %v5774_v8, %v4964_v41  ;;  %v2825_v9 = vpop.f32.mrb[65].mxu0 }
 0x933   : > { %v2826_v10 = vadd.f32 %v4964_v41, %v2825_v9  ;;  %6223 = vmatprep.subr.bf16.mxu0 %v6222_v52 }
 0x934   : > { %5804 = vmatmul.mubr.msk.f32.gmra.mrb[50].mxu1 %vm1108_vm1, %v2607_v33  ;;  %6225 = vmatpush3.bf16.msra.mxu0 %v6222_v52 }
 0x935   : > { %v6226_v14 = vpack.c.bf16 %v2831_v35, %v2826_v10  ;;  %v5777_v46 = vpop.f32.mrb[66].mxu0  ;;  %5856 = vmatprep.mubr.msk.f32.mxu1 %vm584_vm0, %v6775_v44 }
 0x936   : > { %v2841_v15 = vadd.f32 %v5777_v46, %v4964_v41  ;;  %v2835_v17 = vpop.f32.mrb[67].mxu0 }
 0x937   : > { %v2836_v53 = vadd.f32 %v4964_v41, %v2835_v17  ;;  %6227 = vmatprep.subr.bf16.mxu0 %v6226_v14 }
 0x938   : > { %6229 = vmatpush3.bf16.msra.mxu0 %v6226_v14  ;;  %5857 = vmatmul.mubr.msk.f32.vlgmr.msra.gmra.mrb[52].mxu1 %vm584_vm0, %v6789_v21  ;;  %v5047_v14 = vld [vmem:[%s7891_s9 + $0x3] ss:$0 sm:$0xff] }
 0x939   : > { %v6230_v55 = vpack.c.bf16 %v2841_v15, %v2836_v53  ;;  %5859 = vmatprep.mubr.msk.f32.mxu1 %vm584_vm0, %v6792_v54  ;;  %6253 = vmatpush3.bf16.msra.mxu1 %v6250_v12 }
 0x93a   : > { %6255 = vmatprep.subr.bf16.mxu1 %v6254_v18 }
 0x93b   : > { %6231 = vmatprep.subr.bf16.mxu0 %v6230_v55 }
 0x93c   : > { %6233 = vmatpush3.bf16.msra.mxu0 %v6230_v55  ;;  %5860 = vmatmul.mubr.msk.f32.gmra.mrb[54].mxu1 %vm584_vm0, %v6803_v60 }
 0x93d   : > { %5862 = vmatprep.mubr.msk.f32.mxu1 %vm584_vm0, %v6807_v61  ;;  %6257 = vmatpush3.bf16.msra.mxu1 %v6254_v18 }
 0x940   : > { %5863 = vmatmul.mubr.msk.f32.gmra.mrb[56].mxu1 %vm584_vm0, %v6818_v39 }
 0x941   : > { %5865 = vmatprep.mubr.msk.f32.mxu1 %vm584_vm0, %v6821_v2 }
 0x944   : > { %5866 = vmatmul.mubr.msk.f32.gmra.mrb[58].mxu1 %vm584_vm0, %v6831_v4 }
 0x945   : > { %5896 = vmatprep.mubr.msk.f32.mxu1 %vm584_vm0, %v6775_v44 }
 0x948   : > { %5897 = vmatmul.mubr.msk.f32.vlgmr.msra.gmra.mrb[60].mxu1 %vm584_vm0, %v6789_v21 }
 0x949   : > { %5899 = vmatprep.mubr.msk.f32.mxu1 %vm584_vm0, %v6792_v54 }
 0x94c   : > { %5900 = vmatmul.mubr.msk.f32.gmra.mrb[62].mxu1 %vm584_vm0, %v6803_v60 }
 0x94d   : > { %5902 = vmatprep.mubr.msk.f32.mxu1 %vm584_vm0, %v6807_v61 }
 0x950   : > { %5903 = vmatmul.mubr.msk.f32.gmra.mrb[64].mxu1 %vm584_vm0, %v6818_v39 }
 0x951   : > { %5905 = vmatprep.mubr.msk.f32.mxu1 %vm584_vm0, %v6821_v2 }
 0x954   : > { %5906 = vmatmul.mubr.msk.f32.gmra.mrb[66].mxu1 %vm584_vm0, %v6831_v4 }
 0x9fb   : > { %v5796_v28 = vpop.f32.mrb[44].mxu1 }
 0x9fc   : > { %v7440_v57 = vadd.f32 %v5796_v28, %v4974_v56  ;;  %v2967_v59 = vpop.f32.mrb[45].mxu1 }
 0x9fd   : > { %v7442_v58 = vadd.f32 %v4973_v50, %v2967_v59 }
 0x9fe   : > { %v3009_v11 = vsel %vm1262_vm3, %v7440_v57, -inf }
 0x9ff   : > { %3010 = vmax.xlane.f32.xlu1 %v3009_v11  ;;  %v5799_v22 = vpop.f32.mrb[46].mxu1  ;;  %v3006_v23 = vsel %vm1262_vm3, %v7442_v58, -inf }
 0xa00   : > { %v7454_v26 = vadd.f32 %v5799_v22, %v4976_v38  ;;  %v2977_v5 = vpop.f32.mrb[47].mxu1  ;;  %3007 = vmax.xlane.f32.xlu0 %v3006_v23 }
 0xa01   : > { %v7456_v25 = vadd.f32 %v4975_v19, %v2977_v5 }
 0xa02   : > { %v3015_v31 = vsel %vm1262_vm3, %v7454_v26, -inf }
 0xa03   : > { %3016 = vmax.xlane.f32.xlu1 %v3015_v31  ;;  %v5802_v36 = vpop.f32.mrb[48].mxu1  ;;  %v3012_v37 = vsel %vm1262_vm3, %v7456_v25, -inf }
 0xa04   : > { %v7468_v41 = vadd.f32 %v5802_v36, %v4978_v27  ;;  %v2987_v43 = vpop.f32.mrb[49].mxu1  ;;  %3013 = vmax.xlane.f32.xlu0 %v3012_v37 }
 0xa05   : > { %v7470_v45 = vadd.f32 %v4977_v34, %v2987_v43 }
 0xa06   : > { %v3021_v20 = vsel %vm1262_vm3, %v7468_v41, -inf }
 0xa07   : > { %3022 = vmax.xlane.f32.xlu1 %v3021_v20  ;;  %v5805_v40 = vpop.f32.mrb[50].mxu1  ;;  %v3018_v29 = vsel %vm1262_vm3, %v7470_v45, -inf }
 0xa08   : > { %v7482_v62 = vadd.f32 %v5805_v40, %v4980_v32  ;;  %v2997_v12 = vpop.f32.mrb[51].mxu1  ;;  %3019 = vmax.xlane.f32.xlu0 %v3018_v29 }
 0xa09   : > { %v7484_v6 = vadd.f32 %v4979_v51, %v2997_v12 }
 0xa0a   : > { %v3027_v0 = vsel %vm1262_vm3, %v7482_v62, -inf }
 0xa0b   : > { %3028 = vmax.xlane.f32.xlu1 %v3027_v0  ;;  %v5858_v1 = vpop.f32.mrb[52].mxu1  ;;  %v3024_v16 = vsel %vm1262_vm3, %v7484_v6, -inf }
 0xa0c   : > { %v7496_v48 = vadd.f32 %v5858_v1, %v7489_v63  ;;  %v7498_v47 = vpop.f32.mrb[53].mxu1  ;;  %3025 = vmax.xlane.f32.xlu0 %v3024_v16 }
 0xa0f   : > { %v5861_v24 = vpop.f32.mrb[54].mxu1 }
 0xa10   : > { %v7501_v3 = vadd.f32 %v5861_v24, %v7489_v63  ;;  %v3451_v49 = vpop.f32.mrb[55].mxu1 }
 0xa11   : > { %v7504_v7 = vadd.f32 %v7489_v63, %v3451_v49 }
 0xa13   : > { %v5864_v52 = vpop.f32.mrb[56].mxu1 }
 0xa14   : > { %v7507_v8 = vadd.f32 %v5864_v52, %v7489_v63  ;;  %v3461_v33 = vpop.f32.mrb[57].mxu1 }
 0xa15   : > { %v7510_v35 = vadd.f32 %v7489_v63, %v3461_v33 }
 0xa17   : > { %v5867_v9 = vpop.f32.mrb[58].mxu1 }
 0xa18   : > { %v7513_v10 = vadd.f32 %v5867_v9, %v7489_v63  ;;  %v3471_v42 = vpop.f32.mrb[59].mxu1 }
 0xa19   : > { %v7516_v30 = vadd.f32 %v7489_v63, %v3471_v42 }
 0xa1b   : > { %v5898_v46 = vpop.f32.mrb[60].mxu1  ;;  %v3486_v13 = vmul.f32 0.35355338, %v7516_v30 }
 0xa1c   : > { %v3691_v15 = vadd.f32 %v5898_v46, %v5047_v14  ;;  %v3685_v17 = vpop.f32.mrb[61].mxu1 }
 0xa1d   : > { %v3686_v18 = vadd.f32 %v5047_v14, %v3685_v17 }
 0xa1f   : > { %v6282_v53 = vpack.c.bf16 %v3691_v15, %v3686_v18  ;;  %v5901_v55 = vpop.f32.mrb[62].mxu1 }
 0xa20   : > { %v3701_v56 = vadd.f32 %v5901_v55, %v5047_v14  ;;  %v3695_v50 = vpop.f32.mrb[63].mxu1 }
 0xa21   : > { %v3696_v28 = vadd.f32 %v5047_v14, %v3695_v50  ;;  %6283 = vmatprep.subr.bf16.mxu1 %v6282_v53 }
 0xa22   : > { %6285 = vmatpush3.bf16.msra.mxu1 %v6282_v53 }
 0xa23   : > { %v6286_v59 = vpack.c.bf16 %v3701_v56, %v3696_v28  ;;  %v5904_v38 = vpop.f32.mrb[64].mxu1 }
 0xa24   : > { %v3711_v11 = vadd.f32 %v5904_v38, %v5047_v14  ;;  %v3705_v19 = vpop.f32.mrb[65].mxu1 }
 0xa25   : > { %v3706_v22 = vadd.f32 %v5047_v14, %v3705_v19  ;;  %6287 = vmatprep.subr.bf16.mxu1 %v6286_v59 }
 0xa26   : > { %6289 = vmatpush3.bf16.msra.mxu1 %v6286_v59 }
 0xa27   : > { %v6290_v23 = vpack.c.bf16 %v3711_v11, %v3706_v22  ;;  %v5907_v5 = vpop.f32.mrb[66].mxu1 }
 0xa28   : > { %v3721_v27 = vadd.f32 %v5907_v5, %v5047_v14  ;;  %v3715_v31 = vpop.f32.mrb[67].mxu1 }
 0xa29   : > { %v3716_v34 = vadd.f32 %v5047_v14, %v3715_v31  ;;  %6291 = vmatprep.subr.bf16.mxu1 %v6290_v23 }
 0xa2a   : > { %6293 = vmatpush3.bf16.msra.mxu1 %v6290_v23  ;;  %v5005_v23 = vld [vmem:[%s7892_s10 + $0x10] sm:$0xff] }
 0xa2b   : > { %v6294_v36 = vpack.c.bf16 %v3721_v27, %v3716_v34  ;;  %5834 = vmatprep.subr.mxu0 %v5005_v23 }
 0xa2d   : > { %6295 = vmatprep.subr.bf16.mxu1 %v6294_v36 }
 0xa2e   : > { %6297 = vmatpush3.bf16.msra.mxu1 %v6294_v36 }
 0xa8c   : > { %v3011_v37 = vpop.xlane.xlu1 %3010 }
 0xa8d   : > { %v3031_v43 = vsub.f32 %v7440_v57, %v3011_v37  ;;  %v3008_v32 = vpop.xlane.xlu0 %3007 }
 0xa8e   : > { %v3030_v20 = vsub.f32 %v7442_v58, %v3008_v32 }
 0xa8f   : > { %v3040_v51 = vmul.f32 1.442695, %v3031_v43 }
 0xa90   : > { %v3038_v40 = vmul.f32 1.442695, %v3030_v20  ;;  %v3017_v29 = vpop.xlane.xlu1 %3016 }
 0xa91   : > { %6454 = vpow2.f32 %v3040_v51  ;;  %v3033_v12 = vsub.f32 %v7454_v26, %v3017_v29  ;;  %v3014_v0 = vpop.xlane.xlu0 %3013 }
 0xa92   : > { %6456 = vpow2.f32 %v3038_v40  ;;  %v3032_v1 = vsub.f32 %v7456_v25, %v3014_v0 }
 0xa93   : > { %v3044_v16 = vmul.f32 1.442695, %v3033_v12 }
 0xa94   : > { %v3042_v24 = vmul.f32 1.442695, %v3032_v1  ;;  %v3023_v49 = vpop.xlane.xlu1 %3022 }
 0xa95   : > { %6458 = vpow2.f32 %v3044_v16  ;;  %v3035_v52 = vsub.f32 %v7468_v41, %v3023_v49  ;;  %v3020_v57 = vpop.xlane.xlu0 %3019 }
 0xa96   : > { %6460 = vpow2.f32 %v3042_v24  ;;  %v3034_v58 = vsub.f32 %v7470_v45, %v3020_v57 }
 0xa97   : > { %v3048_v33 = vmul.f32 1.442695, %v3035_v52 }
 0xa98   : > { %v3046_v9 = vmul.f32 1.442695, %v3034_v58  ;;  %v3029_v42 = vpop.xlane.xlu1 %3028 }
 0xa99   : > { %6462 = vpow2.f32 %v3048_v33  ;;  %v3037_v26 = vsub.f32 %v7482_v62, %v3029_v42  ;;  %v3026_v14 = vpop.xlane.xlu0 %3025 }
 0xa9a   : > { %6464 = vpow2.f32 %v3046_v9  ;;  %v3036_v25 = vsub.f32 %v7484_v6, %v3026_v14  ;;  %v5029_v14 = vld [vmem:[%s7887_s5 + $0x68] sm:$0xff] }
 0xa9b   : > { %v6455_v46 = vpop.eup %6454  ;;  %v3052_v15 = vmul.f32 1.442695, %v3037_v26  ;;  %v5028_v26 = vld [vmem:[%s7887_s5 + $0x60] sm:$0xff] }
 0xa9c   : > { %v6457_v17 = vpop.eup %6456  ;;  %v3050_v18 = vmul.f32 1.442695, %v3036_v25  ;;  %v3057_v41 = vsel %vm1262_vm3, %v6455_v46, 0.0  ;;  %v6242_v25 = vpack.c.bf16 %v5029_v14, %v5028_v26 }
 0xa9d   : > { %6466 = vpow2.f32 %v3052_v15  ;;  %3058 = vadd.xlane.f32.xlu1 %v3057_v41  ;;  %v3054_v45 = vsel %vm1262_vm3, %v6457_v17, 0.0  ;;  %v5031_v15 = vld [vmem:[%s7887_s5 + $0x78] sm:$0xff] }
 0xa9e   : > { %6468 = vpow2.f32 %v3050_v18  ;;  %3055 = vadd.xlane.f32.xlu0 %v3054_v45 }
 0xa9f   : > { %v6459_v53 = vpop.eup %6458 }
 0xaa0   : > { %v6461_v55 = vpop.eup %6460  ;;  %v3063_v62 = vsel %vm1262_vm3, %v6459_v53, 0.0 }
 0xaa1   : > { %3064 = vadd.xlane.f32.xlu1 %v3063_v62  ;;  %v3060_v56 = vsel %vm1262_vm3, %v6461_v55, 0.0 }
 0xaa2   : > { %3061 = vadd.xlane.f32.xlu0 %v3060_v56 }
 0xaa3   : > { %v6463_v6 = vpop.eup %6462 }
 0xaa4   : > { %v6465_v50 = vpop.eup %6464  ;;  %v3069_v28 = vsel %vm1262_vm3, %v6463_v6, 0.0 }
 0xaa5   : > { %3070 = vadd.xlane.f32.xlu1 %v3069_v28  ;;  %v3066_v59 = vsel %vm1262_vm3, %v6465_v50, 0.0 }
 0xaa6   : > { %3067 = vadd.xlane.f32.xlu0 %v3066_v59 }
 0xaa7   : > { %v6467_v38 = vpop.eup %6466 }
 0xaa8   : > { %v6469_v11 = vpop.eup %6468  ;;  %v3075_v19 = vsel %vm1262_vm3, %v6467_v38, 0.0 }
 0xaa9   : > { %3076 = vadd.xlane.f32.xlu1 %v3075_v19  ;;  %v3072_v22 = vsel %vm1262_vm3, %v6469_v11, 0.0 }
 0xaaa   : > { %3073 = vadd.xlane.f32.xlu0 %v3072_v22 }
 0xb2a   : > { %v3059_v5 = vpop.xlane.xlu1 %3058 }
 0xb2b   : > { %6470 = vrcp.f32 %v3059_v5  ;;  %v3056_v27 = vpop.xlane.xlu0 %3055 }
 0xb2c   : > { %6472 = vrcp.f32 %v3056_v27 }
 0xb2e   : > { %v3065_v31 = vpop.xlane.xlu1 %3064 }
 0xb2f   : > { %6474 = vrcp.f32 %v3065_v31  ;;  %v3062_v34 = vpop.xlane.xlu0 %3061 }
 0xb30   : > { %6476 = vrcp.f32 %v3062_v34 }
 0xb32   : > { %v3071_v36 = vpop.xlane.xlu1 %3070 }
 0xb33   : > { %6478 = vrcp.f32 %v3071_v36  ;;  %v3068_v37 = vpop.xlane.xlu0 %3067 }
 0xb34   : > { %6480 = vrcp.f32 %v3068_v37  ;;  %v3481_v37 = vmul.f32 0.35355338, %v7496_v48  ;;  %v3487_v48 = vmul.f32 0.35355338, %v7513_v10 }
 0xb35   : > { %v6471_v43 = vpop.eup %6470 }
 0xb36   : > { %v6473_v32 = vpop.eup %6472  ;;  %v3077_v20 = vpop.xlane.xlu1 %3076  ;;  %v3087_v29 = vmul.f32 %v6471_v43, %v6455_v46  ;;  %v5030_v46 = vld [vmem:[%s7887_s5 + $0x70] sm:$0xff]  ;;  %v3482_v43 = vmul.f32 0.35355338, %v7504_v7  ;;  %v5056_v7 = vld [vmem:[%s7909_s21 + $0xc0] sm:$0xff] }
 0xb37   : > { %6482 = vrcp.f32 %v3077_v20  ;;  %v3074_v51 = vpop.xlane.xlu0 %3073  ;;  %v3086_v40 = vmul.f32 %v6473_v32, %v6457_v17  ;;  %v6246_v41 = vpack.c.bf16 %v5031_v15, %v5030_v46  ;;  %v3483_v32 = vmul.f32 0.35355338, %v7501_v3  ;;  %v5057_v3 = vld [vmem:[%s7909_s21 + $0xc8] sm:$0xff]  ;;  %v5062_v15 = vld [vmem:[%s7909_s21 + $0xf0] sm:$0xff] }
 0xb38   : > { %6484 = vrcp.f32 %v3074_v51  ;;  %v3484_v20 = vmul.f32 0.35355338, %v7510_v35  ;;  %v3485_v51 = vmul.f32 0.35355338, %v7507_v8 }
 0xb39   : > { %v6475_v12 = vpop.eup %6474  ;;  %5822 = vmatprep.mubr.msk.f32.mxu0 %vm1262_vm3, %v3086_v40 }
 0xb3a   : > { %v6477_v0 = vpop.eup %6476  ;;  %5823 = vmatmul.mubr.msk.f32.vlgmr.msra.gmra.mrb[68].mxu0 %vm1262_vm3, %v3087_v29  ;;  %v3089_v16 = vmul.f32 %v6475_v12, %v6459_v53  ;;  %v5059_v29 = vld [vmem:[%s7909_s21 + $0xd8] sm:$0xff]  ;;  %v5058_v12 = vld [vmem:[%s7909_s21 + $0xd0] sm:$0xff] }
 0xb3b   : > { %v3088_v1 = vmul.f32 %v6477_v0, %v6461_v55  ;;  %5835 = vmatpush3.msra.mxu0 %v5005_v23 }
 0xb3c   : > { %6243 = vmatprep.subr.bf16.mxu0 %v6242_v25 }
 0xb3d   : > { %v6479_v24 = vpop.eup %6478  ;;  %5825 = vmatprep.mubr.msk.f32.mxu0 %vm1262_vm3, %v3088_v1 }
 0xb3e   : > { %v6481_v49 = vpop.eup %6480  ;;  %5826 = vmatmul.mubr.msk.f32.gmra.mrb[70].mxu0 %vm1262_vm3, %v3089_v16  ;;  %v3091_v57 = vmul.f32 %v6479_v24, %v6463_v6 }
 0xb3f   : > { %v3090_v52 = vmul.f32 %v6481_v49, %v6465_v50  ;;  %v3442_v50 = vadd.f32 %v7489_v63, %v7498_v47 }
 0xb41   : > { %v6483_v58 = vpop.eup %6482  ;;  %5828 = vmatprep.mubr.msk.f32.mxu0 %vm1262_vm3, %v3090_v52  ;;  %v5061_v52 = vld [vmem:[%s7909_s21 + $0xe8] sm:$0xff] }
 0xb42   : > { %v6485_v33 = vpop.eup %6484  ;;  %5829 = vmatmul.mubr.msk.f32.gmra.mrb[72].mxu0 %vm1262_vm3, %v3091_v57  ;;  %v3093_v42 = vmul.f32 %v6483_v58, %v6467_v38  ;;  %v5060_v58 = vld [vmem:[%s7909_s21 + $0xe0] sm:$0xff] }
 0xb43   : > { %v3092_v9 = vmul.f32 %v6485_v33, %v6469_v11 }
 0xb45   : > { %5831 = vmatprep.mubr.msk.f32.mxu0 %vm1262_vm3, %v3092_v9 }
 0xb46   : > { %5832 = vmatmul.mubr.msk.f32.gmra.mrb[74].mxu0 %vm1262_vm3, %v3093_v42 }
 0xc0d   : > { %v5824_v17 = vpop.f32.mrb[68].mxu0 }
 0xc0e   : > { %v3184_v18 = vpop.f32.mrb[69].mxu0 }
 0xc0f   : > { %5836 = vmatprep.mubr.msk.f32.mxu0 %vm1108_vm1, %v3184_v18 }
 0xc10   : > { %5837 = vmatmul.mubr.msk.f32.vlgmr.msra.gmra.mrb[48].mxu0 %vm1108_vm1, %v5824_v17 }
 0xc11   : > { %6245 = vmatpush3.bf16.msra.mxu0 %v6242_v25  ;;  %v5827_v45 = vpop.f32.mrb[70].mxu0  ;;  %v5063_v25 = vld [vmem:[%s7909_s21 + $0xf8] sm:$0xff] }
 0xc12   : > { %v3194_v53 = vpop.f32.mrb[71].mxu0  ;;  %6247 = vmatprep.subr.bf16.mxu0 %v6246_v41 }
 0xc13   : > { %5839 = vmatprep.mubr.msk.f32.mxu0 %vm1108_vm1, %v3194_v53 }
 0xc14   : > { %5840 = vmatmul.mubr.msk.f32.gmra.mrb[50].mxu0 %vm1108_vm1, %v5827_v45 }
 0xc15   : > { %v5830_v55 = vpop.f32.mrb[72].mxu0  ;;  %6249 = vmatpush3.bf16.msra.mxu0 %v6246_v41 }
 0xc16   : > { %v3204_v62 = vpop.f32.mrb[73].mxu0 }
 0xc17   : > { %5842 = vmatprep.mubr.msk.f32.mxu0 %vm1108_vm1, %v3204_v62 }
 0xc18   : > { %5843 = vmatmul.mubr.msk.f32.gmra.mrb[52].mxu0 %vm1108_vm1, %v5830_v55 }
 0xc19   : > { %v5833_v56 = vpop.f32.mrb[74].mxu0 }
 0xc1a   : > { %v3214_v6 = vpop.f32.mrb[75].mxu0 }
 0xc1b   : > { %5845 = vmatprep.mubr.msk.f32.mxu0 %vm1108_vm1, %v3214_v6 }
 0xc1c   : > { %5846 = vmatmul.mubr.msk.f32.gmra.mrb[54].mxu0 %vm1108_vm1, %v5833_v56 }
 0xc1d   : > { %5876 = vmatprep.mubr.msk.f32.mxu0 %vm584_vm0, %v6775_v44  ;;  %v3480_v44 = vmul.f32 0.35355338, %v3442_v50 }
 0xc20   : > { %5877 = vmatmul.mubr.msk.f32.vlgmr.msra.gmra.mrb[76].mxu0 %vm584_vm0, %v6789_v21  ;;  %v5033_v21 = vld [vmem:[%s7890_s8 + $0x3] ss:$0 sm:$0xff] }
 0xc21   : > { %5879 = vmatprep.mubr.msk.f32.mxu0 %vm584_vm0, %v6792_v54 }
 0xc24   : > { %5880 = vmatmul.mubr.msk.f32.gmra.mrb[78].mxu0 %vm584_vm0, %v6803_v60 }
 0xc25   : > { %5882 = vmatprep.mubr.msk.f32.mxu0 %vm584_vm0, %v6807_v61 }
 0xc28   : > { %5883 = vmatmul.mubr.msk.f32.gmra.mrb[80].mxu0 %vm584_vm0, %v6818_v39 }
 0xc29   : > { %5885 = vmatprep.mubr.msk.f32.mxu0 %vm584_vm0, %v6821_v2 }
 0xc2c   : > { %5886 = vmatmul.mubr.msk.f32.gmra.mrb[82].mxu0 %vm584_vm0, %v6831_v4 }
 0xc2d   : > { %5924 = vmatprep.mubr.msk.f32.mxu0 %vm1108_vm1, %v3480_v44 }
 0xcf3   : > { %v5878_v54 = vpop.f32.mrb[76].mxu0 }
 0xcf4   : > { %v3573_v60 = vadd.f32 %v5878_v54, %v5033_v21  ;;  %v3567_v61 = vpop.f32.mrb[77].mxu0 }
 0xcf5   : > { %v3568_v63 = vadd.f32 %v5033_v21, %v3567_v61 }
 0xcf7   : > { %v6258_v47 = vpack.c.bf16 %v3573_v60, %v3568_v63  ;;  %v5881_v28 = vpop.f32.mrb[78].mxu0 }
 0xcf8   : > { %v3583_v39 = vadd.f32 %v5881_v28, %v5033_v21  ;;  %v3577_v59 = vpop.f32.mrb[79].mxu0 }
 0xcf9   : > { %v3578_v38 = vadd.f32 %v5033_v21, %v3577_v59  ;;  %6260 = vmatprep.subr.msk.bf16.mxu0 %vm6866_vm2, %v6258_v47 }
 0xcfa   : > { %6263 = vmatpush3.bf16.xpose.msk.msra.mxu0 %vm6866_vm2, %v6258_v47 }
 0xcfb   : > { %v6264_v2 = vpack.c.bf16 %v3583_v39, %v3578_v38  ;;  %v5884_v4 = vpop.f32.mrb[80].mxu0 }
 0xcfc   : > { %v3593_v11 = vadd.f32 %v5884_v4, %v5033_v21  ;;  %v3587_v19 = vpop.f32.mrb[81].mxu0 }
 0xcfd   : > { %v3588_v22 = vadd.f32 %v5033_v21, %v3587_v19  ;;  %6266 = vmatprep.subr.msk.bf16.mxu0 %vm6866_vm2, %v6264_v2 }
 0xcff   : > { %v6270_v23 = vpack.c.bf16 %v3593_v11, %v3588_v22  ;;  %v5887_v5 = vpop.f32.mrb[82].mxu0 }
 0xd00   : > { %v3603_v27 = vadd.f32 %v5887_v5, %v5033_v21  ;;  %v3597_v31 = vpop.f32.mrb[83].mxu0 }
 0xd01   : > { %v3598_v34 = vadd.f32 %v5033_v21, %v3597_v31 }
 0xd02   : > { %6269 = vmatpush3.bf16.xpose.msk.msra.mxu0 %vm6866_vm2, %v6264_v2 }
 0xd03   : > { %v6276_v36 = vpack.c.bf16 %v3603_v27, %v3598_v34  ;;  %6272 = vmatprep.subr.msk.bf16.mxu0 %vm6866_vm2, %v6270_v23 }
 0xd0a   : > { %6275 = vmatpush3.bf16.xpose.msk.msra.mxu0 %vm6866_vm2, %v6270_v23 }
 0xd0b   : > { %6278 = vmatprep.subr.msk.bf16.mxu0 %vm6866_vm2, %v6276_v36 }
 0xd12   : > { %6281 = vmatpush3.bf16.xpose.msk.msra.mxu0 %vm6866_vm2, %v6276_v36 }
 0xd19   : > { %5925 = vmatmul.mubr.msk.f32.vlgmr.msra.gmra.mrb[84].mxu0 %vm1108_vm1, %v3481_v37 }
 0xd1a   : > { %5927 = vmatprep.mubr.msk.f32.mxu0 %vm1108_vm1, %v3482_v43 }
 0xd1d   : > { %5928 = vmatmul.mubr.msk.f32.gmra.mrb[86].mxu0 %vm1108_vm1, %v3483_v32 }
 0xd1e   : > { %5930 = vmatprep.mubr.msk.f32.mxu0 %vm1108_vm1, %v3484_v20 }
 0xd21   : > { %5931 = vmatmul.mubr.msk.f32.gmra.mrb[88].mxu0 %vm1108_vm1, %v3485_v51 }
 0xd22   : > { %5933 = vmatprep.mubr.msk.f32.mxu0 %vm1108_vm1, %v3486_v13 }
 0xd25   : > { %5934 = vmatmul.mubr.msk.f32.gmra.mrb[90].mxu0 %vm1108_vm1, %v3487_v48 }
 0xdec   : > { %v5926_v35 = vpop.f32.mrb[84].mxu0 }
 0xded   : > { %v3853_v8 = vadd.f32 %v5926_v35, %v5057_v3  ;;  %v3847_v40 = vpop.f32.mrb[85].mxu0 }
 0xdee   : > { %v3848_v30 = vadd.f32 %v5056_v7, %v3847_v40 }
 0xdef   : > { %v3889_v10 = vsel %vm1262_vm3, %v3853_v8, -inf }
 0xdf0   : > { %3890 = vmax.xlane.f32.xlu1 %v3889_v10  ;;  %v5929_v0 = vpop.f32.mrb[86].mxu0  ;;  %v3886_v1 = vsel %vm1262_vm3, %v3848_v30, -inf }
 0xdf1   : > { %v3863_v16 = vadd.f32 %v5929_v0, %v5059_v29  ;;  %v3857_v24 = vpop.f32.mrb[87].mxu0  ;;  %3887 = vmax.xlane.f32.xlu0 %v3886_v1 }
 0xdf2   : > { %v3858_v49 = vadd.f32 %v5058_v12, %v3857_v24  ;;  %v5088_v12 = vld [vmem:[%s7892_s10 + $0x18] sm:$0xff] }
 0xdf3   : > { %v3895_v57 = vsel %vm1262_vm3, %v3863_v16, -inf  ;;  %5964 = vmatprep.subr.mxu0 %v5088_v12 }
 0xdf4   : > { %3896 = vmax.xlane.f32.xlu1 %v3895_v57  ;;  %v5932_v33 = vpop.f32.mrb[88].mxu0  ;;  %v3892_v9 = vsel %vm1262_vm3, %v3858_v49, -inf  ;;  %5965 = vmatpush3.msra.mxu0 %v5088_v12 }
 0xdf5   : > { %v3873_v42 = vadd.f32 %v5932_v33, %v5061_v52  ;;  %v3867_v26 = vpop.f32.mrb[89].mxu0  ;;  %3893 = vmax.xlane.f32.xlu0 %v3892_v9 }
 0xdf6   : > { %v3868_v14 = vadd.f32 %v5060_v58, %v3867_v26 }
 0xdf7   : > { %v3901_v46 = vsel %vm1262_vm3, %v3873_v42, -inf }
 0xdf8   : > { %3902 = vmax.xlane.f32.xlu1 %v3901_v46  ;;  %v5935_v17 = vpop.f32.mrb[90].mxu0  ;;  %v3898_v18 = vsel %vm1262_vm3, %v3868_v14, -inf }
 0xdf9   : > { %v3883_v41 = vadd.f32 %v5935_v17, %v5063_v25  ;;  %v3877_v45 = vpop.f32.mrb[91].mxu0  ;;  %3899 = vmax.xlane.f32.xlu0 %v3898_v18 }
 0xdfa   : > { %v3878_v53 = vadd.f32 %v5062_v15, %v3877_v45 }
 0xdfb   : > { %v3907_v55 = vsel %vm1262_vm3, %v3883_v41, -inf }
 0xdfc   : > { %3908 = vmax.xlane.f32.xlu1 %v3907_v55  ;;  %v3904_v62 = vsel %vm1262_vm3, %v3878_v53, -inf }
 0xdfd   : > { %3905 = vmax.xlane.f32.xlu0 %v3904_v62 }
 0xe7d   : > { %v3891_v56 = vpop.xlane.xlu1 %3890 }
 0xe7e   : > { %v3911_v6 = vsub.f32 %v3853_v8, %v3891_v56  ;;  %v3888_v50 = vpop.xlane.xlu0 %3887 }
 0xe7f   : > { %v3910_v44 = vsub.f32 %v3848_v30, %v3888_v50 }
 0xe80   : > { %v3920_v21 = vmul.f32 1.442695, %v3911_v6 }
 0xe81   : > { %v3918_v54 = vmul.f32 1.442695, %v3910_v44  ;;  %v3897_v60 = vpop.xlane.xlu1 %3896 }
 0xe82   : > { %6486 = vpow2.f32 %v3920_v21  ;;  %v3913_v61 = vsub.f32 %v3863_v16, %v3897_v60  ;;  %v3894_v63 = vpop.xlane.xlu0 %3893 }
 0xe83   : > { %6488 = vpow2.f32 %v3918_v54  ;;  %v3912_v47 = vsub.f32 %v3858_v49, %v3894_v63 }
 0xe84   : > { %v3924_v28 = vmul.f32 1.442695, %v3913_v61 }
 0xe85   : > { %v3922_v39 = vmul.f32 1.442695, %v3912_v47  ;;  %v3903_v59 = vpop.xlane.xlu1 %3902 }
 0xe86   : > { %6490 = vpow2.f32 %v3924_v28  ;;  %v3915_v38 = vsub.f32 %v3873_v42, %v3903_v59  ;;  %v3900_v2 = vpop.xlane.xlu0 %3899  ;;  %v5097_v28 = vld [vmem:[%s7893_s11] ss:$0 sm:$0xff] }
 0xe87   : > { %6492 = vpow2.f32 %v3922_v39  ;;  %v3914_v4 = vsub.f32 %v3868_v14, %v3900_v2  ;;  %v6550_v39 = vld [vmem:[%s6677_s1 + $0x8] sm:$0xff]  ;;  %v6551_v2 = vld [vmem:[%s6677_s1] sm:$0xff] }
 0xe88   : > { %v3928_v11 = vmul.f32 1.442695, %v3915_v38 }
 0xe89   : > { %v3926_v19 = vmul.f32 1.442695, %v3914_v4  ;;  %v3909_v22 = vpop.xlane.xlu1 %3908 }
 0xe8a   : > { %6494 = vpow2.f32 %v3928_v11  ;;  %v3917_v23 = vsub.f32 %v3883_v41, %v3909_v22  ;;  %v3906_v5 = vpop.xlane.xlu0 %3905 }
 0xe8b   : > { %6496 = vpow2.f32 %v3926_v19  ;;  %v3916_v27 = vsub.f32 %v3878_v53, %v3906_v5 }
 0xe8c   : > { %v6487_v31 = vpop.eup %6486  ;;  %v3932_v34 = vmul.f32 1.442695, %v3917_v23  ;;  %v6552_v23 = vld [vmem:[%s6677_s1 + $0x18] sm:$0xff] }
 0xe8d   : > { %v6489_v36 = vpop.eup %6488  ;;  %v3930_v37 = vmul.f32 1.442695, %v3916_v27  ;;  %v3937_v43 = vsel %vm1262_vm3, %v6487_v31, 0.0 }
 0xe8e   : > { %6498 = vpow2.f32 %v3932_v34  ;;  %3938 = vadd.xlane.f32.xlu1 %v3937_v43  ;;  %v3934_v32 = vsel %vm1262_vm3, %v6489_v36, 0.0  ;;  %v6553_v34 = vld [vmem:[%s6677_s1 + $0x10] sm:$0xff] }
 0xe8f   : > { %6500 = vpow2.f32 %v3930_v37  ;;  %3935 = vadd.xlane.f32.xlu0 %v3934_v32 }
 0xe90   : > { %v6491_v20 = vpop.eup %6490 }
 0xe91   : > { %v6493_v51 = vpop.eup %6492  ;;  %v3943_v13 = vsel %vm1262_vm3, %v6491_v20, 0.0 }
 0xe92   : > { %3944 = vadd.xlane.f32.xlu1 %v3943_v13  ;;  %v3940_v48 = vsel %vm1262_vm3, %v6493_v51, 0.0 }
 0xe93   : > { %3941 = vadd.xlane.f32.xlu0 %v3940_v48 }
 0xe94   : > { %v6495_v3 = vpop.eup %6494 }
 0xe95   : > { %v6497_v7 = vpop.eup %6496  ;;  %v3949_v35 = vsel %vm1262_vm3, %v6495_v3, 0.0 }
 0xe96   : > { %3950 = vadd.xlane.f32.xlu1 %v3949_v35  ;;  %v3946_v8 = vsel %vm1262_vm3, %v6497_v7, 0.0 }
 0xe97   : > { %3947 = vadd.xlane.f32.xlu0 %v3946_v8 }
 0xe98   : > { %v6499_v40 = vpop.eup %6498 }
 0xe99   : > { %v6501_v30 = vpop.eup %6500  ;;  %v3955_v29 = vsel %vm1262_vm3, %v6499_v40, 0.0 }
 0xe9a   : > { %3956 = vadd.xlane.f32.xlu1 %v3955_v29  ;;  %v3952_v10 = vsel %vm1262_vm3, %v6501_v30, 0.0 }
 0xe9b   : > { %3953 = vadd.xlane.f32.xlu0 %v3952_v10  ;;  %v6556_v10 = vld [vmem:[%s6677_s1 + $0x38] sm:$0xff] }
 0xf1b   : > { %v3939_v0 = vpop.xlane.xlu1 %3938 }
 0xf1c   : > { %6502 = vrcp.f32 %v3939_v0  ;;  %v3936_v1 = vpop.xlane.xlu0 %3935 }
 0xf1d   : > { %6504 = vrcp.f32 %v3936_v1 }
 0xf1f   : > { %v3945_v16 = vpop.xlane.xlu1 %3944 }
 0xf20   : > { %6506 = vrcp.f32 %v3945_v16  ;;  %v3942_v24 = vpop.xlane.xlu0 %3941  ;;  %v6557_v16 = vld [vmem:[%s6677_s1 + $0x30] sm:$0xff] }
 0xf21   : > { %6508 = vrcp.f32 %v3942_v24 }
 0xf23   : > { %v3951_v49 = vpop.xlane.xlu1 %3950 }
 0xf24   : > { %6510 = vrcp.f32 %v3951_v49  ;;  %v3948_v52 = vpop.xlane.xlu0 %3947 }
 0xf25   : > { %6512 = vrcp.f32 %v3948_v52 }
 0xf26   : > { %v6503_v57 = vpop.eup %6502 }
 0xf27   : > { %v6505_v58 = vpop.eup %6504  ;;  %v3957_v33 = vpop.xlane.xlu1 %3956  ;;  %v3967_v26 = vmul.f32 %v6503_v57, %v6487_v31 }
 0xf28   : > { %6514 = vrcp.f32 %v3957_v33  ;;  %v3954_v9 = vpop.xlane.xlu0 %3953  ;;  %v3966_v42 = vmul.f32 %v6505_v58, %v6489_v36 }
 0xf29   : > { %6516 = vrcp.f32 %v3954_v9 }
 0xf2a   : > { %v6507_v14 = vpop.eup %6506  ;;  %5952 = vmatprep.mubr.msk.f32.mxu1 %vm1262_vm3, %v3966_v42 }
 0xf2b   : > { %v6509_v25 = vpop.eup %6508  ;;  %5953 = vmatmul.mubr.msk.f32.vlgmr.msra.gmra.mrb[68].mxu1 %vm1262_vm3, %v3967_v26  ;;  %v3969_v15 = vmul.f32 %v6507_v14, %v6491_v20 }
 0xf2c   : > { %v3968_v46 = vmul.f32 %v6509_v25, %v6493_v51  ;;  %v6554_v51 = vld [vmem:[%s6677_s1 + $0x28] sm:$0xff] }
 0xf2e   : > { %v6511_v17 = vpop.eup %6510  ;;  %5955 = vmatprep.mubr.msk.f32.mxu1 %vm1262_vm3, %v3968_v46 }
 0xf2f   : > { %v6513_v18 = vpop.eup %6512  ;;  %5956 = vmatmul.mubr.msk.f32.gmra.mrb[70].mxu1 %vm1262_vm3, %v3969_v15  ;;  %v3971_v45 = vmul.f32 %v6511_v17, %v6495_v3 }
 0xf30   : > { %v3970_v41 = vmul.f32 %v6513_v18, %v6497_v7  ;;  %v6555_v7 = vld [vmem:[%s6677_s1 + $0x20] sm:$0xff] }
 0xf32   : > { %v6515_v53 = vpop.eup %6514  ;;  %5958 = vmatprep.mubr.msk.f32.mxu1 %vm1262_vm3, %v3970_v41 }
 0xf33   : > { %v6517_v55 = vpop.eup %6516  ;;  %5959 = vmatmul.mubr.msk.f32.gmra.mrb[72].mxu1 %vm1262_vm3, %v3971_v45  ;;  %v3973_v56 = vmul.f32 %v6515_v53, %v6499_v40 }
 0xf34   : > { %v3972_v62 = vmul.f32 %v6517_v55, %v6501_v30 }
 0xf36   : > { %5961 = vmatprep.mubr.msk.f32.mxu1 %vm1262_vm3, %v3972_v62 }
 0xf37   : > { %5962 = vmatmul.mubr.msk.f32.gmra.mrb[74].mxu1 %vm1262_vm3, %v3973_v56 }
 0xffe   : > { %v5954_v6 = vpop.f32.mrb[68].mxu1 }
 0xfff   : > { %v4064_v50 = vpop.f32.mrb[69].mxu1 }
0x1000   : > { %5966 = vmatprep.mubr.msk.f32.mxu0 %vm1108_vm1, %v4064_v50 }
0x1001   : > { %5967 = vmatmul.mubr.msk.f32.vlgmr.msra.gmra.mrb[48].mxu0 %vm1108_vm1, %v5954_v6 }
0x1002   : > { %v5957_v44 = vpop.f32.mrb[70].mxu1 }
0x1003   : > { %v4074_v21 = vpop.f32.mrb[71].mxu1 }
0x1004   : > { %5969 = vmatprep.mubr.msk.f32.mxu0 %vm1108_vm1, %v4074_v21 }
0x1005   : > { %5970 = vmatmul.mubr.msk.f32.gmra.mrb[50].mxu0 %vm1108_vm1, %v5957_v44 }
0x1006   : > { %v5960_v54 = vpop.f32.mrb[72].mxu1 }
0x1007   : > { %v4084_v60 = vpop.f32.mrb[73].mxu1 }
0x1008   : > { %5972 = vmatprep.mubr.msk.f32.mxu0 %vm1108_vm1, %v4084_v60 }
0x1009   : > { %5973 = vmatmul.mubr.msk.f32.gmra.mrb[52].mxu0 %vm1108_vm1, %v5960_v54 }
0x100a   : > { %v5963_v61 = vpop.f32.mrb[74].mxu1 }
0x100b   : > { %v4094_v63 = vpop.f32.mrb[75].mxu1 }
0x100c   : > { %5975 = vmatprep.mubr.msk.f32.mxu0 %vm1108_vm1, %v4094_v63 }
0x100d   : > { %5976 = vmatmul.mubr.msk.f32.gmra.mrb[54].mxu0 %vm1108_vm1, %v5963_v61 }
0x10d4   : > { %v5968_v47 = vpop.f32.mrb[48].mxu0 }
0x10d5   : > { %v4243_v59 = vadd.f32 %v6550_v39, %v5968_v47  ;;  %v4195_v38 = vpop.f32.mrb[49].mxu0 }
0x10d6   : > { %v4242_v4 = vadd.f32 %v6551_v2, %v4195_v38 }
0x10d7   : > { %v7684_v11 = vadd.f32 %v5097_v28, %v4243_v59 }
0x10d8   : > { %v7686_v19 = vadd.f32 %v5097_v28, %v4242_v4  ;;  %v5971_v22 = vpop.f32.mrb[50].mxu0 }
0x10d9   : > { %v4245_v5 = vadd.f32 %v6552_v23, %v5971_v22  ;;  %v4205_v27 = vpop.f32.mrb[51].mxu0  ;;  %v4268_v31 = vsel %vm584_vm0, %v7684_v11, 0.0 }
0x10da   : > { %v4244_v36 = vadd.f32 %v6553_v34, %v4205_v27  ;;  %4269 = vadd.xlane.f32.xlu1 %v4268_v31  ;;  %v4265_v37 = vsel %vm584_vm0, %v7686_v19, 0.0 }
0x10db   : > { %v7694_v43 = vadd.f32 %v5097_v28, %v4245_v5  ;;  %4266 = vadd.xlane.f32.xlu0 %v4265_v37 }
0x10dc   : > { %v7696_v32 = vadd.f32 %v5097_v28, %v4244_v36  ;;  %v5974_v20 = vpop.f32.mrb[52].mxu0 }
0x10dd   : > { %v4247_v13 = vadd.f32 %v6554_v51, %v5974_v20  ;;  %v4215_v48 = vpop.f32.mrb[53].mxu0  ;;  %v4274_v3 = vsel %vm584_vm0, %v7694_v43, 0.0 }
0x10de   : > { %v4246_v35 = vadd.f32 %v6555_v7, %v4215_v48  ;;  %4275 = vadd.xlane.f32.xlu1 %v4274_v3  ;;  %v4271_v8 = vsel %vm584_vm0, %v7696_v32, 0.0  ;;  %v4400_v48 = vld [vmem:[%s7896_s14 + $0x8] sm:$0xff]  ;;  %v4401_v7 = vld [vmem:[%s7896_s14 + $0x10] sm:$0xff] }
0x10df   : > { %v7704_v40 = vadd.f32 %v5097_v28, %v4247_v13  ;;  %4272 = vadd.xlane.f32.xlu0 %v4271_v8  ;;  %v4399_v13 = vld [vmem:[%s7896_s14] sm:$0xff] }
0x10e0   : > { %v7706_v30 = vadd.f32 %v5097_v28, %v4246_v35  ;;  %v5977_v29 = vpop.f32.mrb[54].mxu0  ;;  %v6298_v3 = vpack.c.bf16 %v4400_v48, %v4399_v13  ;;  %v4402_v35 = vld [vmem:[%s7896_s14 + $0x18] sm:$0xff] }
0x10e1   : > { %v4249_v12 = vadd.f32 %v6556_v10, %v5977_v29  ;;  %v4225_v0 = vpop.f32.mrb[55].mxu0  ;;  %v4280_v1 = vsel %vm584_vm0, %v7704_v40, 0.0  ;;  %v6302_v8 = vpack.c.bf16 %v4402_v35, %v4401_v7  ;;  %v4579_v29 = vld [vmem:[%s7898_s16] sm:$0xff]  ;;  %v4580_v10 = vld [vmem:[%s7898_s16 + $0x8] sm:$0xff] }
0x10e2   : > { %v4248_v24 = vadd.f32 %v6557_v16, %v4225_v0  ;;  %4281 = vadd.xlane.f32.xlu1 %v4280_v1  ;;  %v4277_v49 = vsel %vm584_vm0, %v7706_v30, 0.0  ;;  %6299 = vmatprep.subr.bf16.mxu1 %v6298_v3  ;;  %v4583_v7 = vld [vmem:[%s7898_s16 + $0x20] sm:$0xff]  ;;  %v4584_v35 = vld [vmem:[%s7898_s16 + $0x28] sm:$0xff] }
0x10e3   : > { %v7714_v52 = vadd.f32 %v5097_v28, %v4249_v12  ;;  %4278 = vadd.xlane.f32.xlu0 %v4277_v49  ;;  %6301 = vmatpush3.bf16.msra.mxu1 %v6298_v3  ;;  %v6306_v12 = vpack.c.bf16 %v4580_v10, %v4579_v29 }
0x10e4   : > { %v7716_v57 = vadd.f32 %v5097_v28, %v4248_v24  ;;  %6303 = vmatprep.subr.bf16.mxu1 %v6302_v8 }
0x10e5   : > { %v4286_v58 = vsel %vm584_vm0, %v7714_v52, 0.0 }
0x10e6   : > { %4287 = vadd.xlane.f32.xlu1 %v4286_v58  ;;  %v4283_v33 = vsel %vm584_vm0, %v7716_v57, 0.0 }
0x10e7   : > { %4284 = vadd.xlane.f32.xlu0 %v4283_v33  ;;  %6305 = vmatpush3.bf16.msra.mxu1 %v6302_v8 }
0x10e8   : > { %6307 = vmatprep.subr.bf16.mxu1 %v6306_v12 }
0x1167   : > { %v4270_v9 = vpop.xlane.xlu1 %4269 }
0x1168   : > { %v4290_v42 = vmul.f32 0.03125, %v4270_v9  ;;  %v4267_v26 = vpop.xlane.xlu0 %4266 }
0x1169   : > { %v4289_v14 = vmul.f32 0.03125, %v4267_v26 }
0x116a   : > { %v7723_v25 = vsub.f32 %v7684_v11, %v4290_v42 }
0x116b   : > { %v7726_v46 = vsub.f32 %v7686_v19, %v4289_v14  ;;  %v4276_v15 = vpop.xlane.xlu1 %4275 }
0x116c   : > { %v4292_v17 = vmul.f32 0.03125, %v4276_v15  ;;  %v4273_v18 = vpop.xlane.xlu0 %4272  ;;  %v4306_v41 = vmul.f32 %v7723_v25, %v7723_v25 }
0x116d   : > { %v4291_v45 = vmul.f32 0.03125, %v4273_v18  ;;  %v4305_v53 = vmul.f32 %v7726_v46, %v7726_v46 }
0x116e   : > { %v7733_v55 = vsub.f32 %v7694_v43, %v4292_v17  ;;  %v4316_v62 = vsel %vm584_vm0, %v4306_v41, 0.0 }
0x116f   : > { %v7737_v56 = vsub.f32 %v7696_v32, %v4291_v45  ;;  %v4282_v6 = vpop.xlane.xlu1 %4281  ;;  %4317 = vadd.xlane.f32.xlu1 %v4316_v62  ;;  %v4313_v50 = vsel %vm584_vm0, %v4305_v53, 0.0 }
0x1170   : > { %v4294_v44 = vmul.f32 0.03125, %v4282_v6  ;;  %4314 = vadd.xlane.f32.xlu0 %v4313_v50  ;;  %v4279_v21 = vpop.xlane.xlu0 %4278  ;;  %v4308_v54 = vmul.f32 %v7733_v55, %v7733_v55 }
0x1171   : > { %v4293_v60 = vmul.f32 0.03125, %v4279_v21  ;;  %v4307_v61 = vmul.f32 %v7737_v56, %v7737_v56 }
0x1172   : > { %v7745_v63 = vsub.f32 %v7704_v40, %v4294_v44  ;;  %v4322_v47 = vsel %vm584_vm0, %v4308_v54, 0.0 }
0x1173   : > { %v7749_v28 = vsub.f32 %v7706_v30, %v4293_v60  ;;  %4323 = vadd.xlane.f32.xlu1 %v4322_v47  ;;  %v4288_v39 = vpop.xlane.xlu1 %4287  ;;  %v4319_v59 = vsel %vm584_vm0, %v4307_v61, 0.0  ;;  %v5098_v60 = vld [vmem:[%s7894_s12] ss:$0 sm:$0xff] }
0x1174   : > { %v4296_v38 = vmul.f32 0.03125, %v4288_v39  ;;  %4320 = vadd.xlane.f32.xlu0 %v4319_v59  ;;  %v4285_v2 = vpop.xlane.xlu0 %4284  ;;  %v4310_v4 = vmul.f32 %v7745_v63, %v7745_v63 }
0x1175   : > { %v4295_v22 = vmul.f32 0.03125, %v4285_v2  ;;  %v4309_v23 = vmul.f32 %v7749_v28, %v7749_v28  ;;  %v5099_v2 = vld [vmem:[%s7895_s13] ss:$0 sm:$0xff] }
0x1176   : > { %v7757_v5 = vsub.f32 %v7714_v52, %v4296_v38  ;;  %v4328_v27 = vsel %vm584_vm0, %v4310_v4, 0.0 }
0x1177   : > { %v7761_v31 = vsub.f32 %v7716_v57, %v4295_v22  ;;  %4329 = vadd.xlane.f32.xlu1 %v4328_v27  ;;  %v4325_v34 = vsel %vm584_vm0, %v4309_v23, 0.0  ;;  %v4581_v27 = vld [vmem:[%s7898_s16 + $0x10] sm:$0xff] }
0x1178   : > { %4326 = vadd.xlane.f32.xlu0 %v4325_v34  ;;  %v4312_v36 = vmul.f32 %v7757_v5, %v7757_v5 }
0x1179   : > { %v4311_v37 = vmul.f32 %v7761_v31, %v7761_v31 }
0x117a   : > { %v4334_v20 = vsel %vm584_vm0, %v4312_v36, 0.0 }
0x117b   : > { %4335 = vadd.xlane.f32.xlu1 %v4334_v20  ;;  %v4331_v51 = vsel %vm584_vm0, %v4311_v37, 0.0 }
0x117c   : > { %4332 = vadd.xlane.f32.xlu0 %v4331_v51 }
0x11fc   : > { %v4318_v0 = vpop.xlane.xlu1 %4317 }
0x11fd   : > { %v4338_v1 = vmul.f32 0.03125, %v4318_v0  ;;  %v4315_v16 = vpop.xlane.xlu0 %4314 }
0x11fe   : > { %v4337_v24 = vmul.f32 0.03125, %v4315_v16 }
0x11ff   : > { %v4346_v49 = vadd.f32 1e-05, %v4338_v1  ;;  %v6314_v1 = vpack.c.bf16 %v4584_v35, %v4583_v7 }
0x1200   : > { %v4345_v58 = vadd.f32 1e-05, %v4337_v24  ;;  %v4324_v33 = vpop.xlane.xlu1 %4323 }
0x1201   : > { %6518 = vrsqrt.f32 %v4346_v49  ;;  %v4340_v9 = vmul.f32 0.03125, %v4324_v33  ;;  %v4321_v42 = vpop.xlane.xlu0 %4320 }
0x1202   : > { %6520 = vrsqrt.f32 %v4345_v58  ;;  %v4339_v26 = vmul.f32 0.03125, %v4321_v42 }
0x1203   : > { %v4348_v14 = vadd.f32 1e-05, %v4340_v9 }
0x1204   : > { %v4347_v15 = vadd.f32 1e-05, %v4339_v26  ;;  %v4330_v17 = vpop.xlane.xlu1 %4329 }
0x1205   : > { %6522 = vrsqrt.f32 %v4348_v14  ;;  %v4342_v18 = vmul.f32 0.03125, %v4330_v17  ;;  %v4327_v41 = vpop.xlane.xlu0 %4326  ;;  %v4588_v17 = vld [vmem:[%s7898_s16 + $0x48] sm:$0xff] }
0x1206   : > { %6524 = vrsqrt.f32 %v4347_v15  ;;  %v4341_v45 = vmul.f32 0.03125, %v4327_v41  ;;  %v4587_v15 = vld [vmem:[%s7898_s16 + $0x40] sm:$0xff]  ;;  %v4589_v41 = vld [vmem:[%s7898_s16 + $0x50] sm:$0xff] }
0x1207   : > { %v4350_v53 = vadd.f32 1e-05, %v4342_v18  ;;  %v6322_v18 = vpack.c.bf16 %v4588_v17, %v4587_v15 }
0x1208   : > { %v4349_v62 = vadd.f32 1e-05, %v4341_v45  ;;  %v4336_v6 = vpop.xlane.xlu1 %4335  ;;  %v4590_v45 = vld [vmem:[%s7898_s16 + $0x58] sm:$0xff] }
0x1209   : > { %6526 = vrsqrt.f32 %v4350_v53  ;;  %v4344_v50 = vmul.f32 0.03125, %v4336_v6  ;;  %v4333_v44 = vpop.xlane.xlu0 %4332  ;;  %v6326_v53 = vpack.c.bf16 %v4590_v45, %v4589_v41  ;;  %v4592_v6 = vld [vmem:[%s7898_s16 + $0x68] sm:$0xff] }
0x120a   : > { %6528 = vrsqrt.f32 %v4349_v62  ;;  %v4343_v21 = vmul.f32 0.03125, %v4333_v44  ;;  %v4591_v62 = vld [vmem:[%s7898_s16 + $0x60] sm:$0xff]  ;;  %v4593_v44 = vld [vmem:[%s7898_s16 + $0x70] sm:$0xff] }
0x120b   : > { %v6519_v54 = vpop.eup %6518  ;;  %v4352_v61 = vadd.f32 1e-05, %v4344_v50  ;;  %v6330_v50 = vpack.c.bf16 %v4592_v6, %v4591_v62 }
0x120c   : > { %v6521_v47 = vpop.eup %6520  ;;  %v4362_v39 = vmul.f32 %v6519_v54, %v7723_v25  ;;  %v4351_v59 = vadd.f32 1e-05, %v4343_v21  ;;  %v4582_v25 = vld [vmem:[%s7898_s16 + $0x18] sm:$0xff] }
0x120d   : > { %6530 = vrsqrt.f32 %v4352_v61  ;;  %v4361_v38 = vmul.f32 %v6521_v47, %v7726_v46  ;;  %v6310_v13 = vpack.c.bf16 %v4582_v25, %v4581_v27  ;;  %v4594_v21 = vld [vmem:[%s7898_s16 + $0x78] sm:$0xff] }
0x120e   : > { %v4377_v4 = vmul.f32 %v5098_v60, %v4362_v39  ;;  %6532 = vrsqrt.f32 %v4351_v59  ;;  %v6334_v54 = vpack.c.bf16 %v4594_v21, %v4593_v44 }
0x120f   : > { %v6523_v22 = vpop.eup %6522  ;;  %v4376_v23 = vmul.f32 %v5098_v60, %v4361_v38 }
0x1210   : > { %v6525_v34 = vpop.eup %6524  ;;  %v4364_v36 = vmul.f32 %v6523_v22, %v7733_v55  ;;  %v4392_v20 = vadd.f32 %v5099_v2, %v4377_v4 }
0x1211   : > { %v4391_v46 = vadd.f32 %v5099_v2, %v4376_v23  ;;  %v4363_v37 = vmul.f32 %v6525_v34, %v7737_v56 }
0x1212   : > { %v4379_v51 = vmul.f32 %v5098_v60, %v4364_v36 }
0x1213   : > { %v6527_v48 = vpop.eup %6526  ;;  %5986 = vmatprep.mubr.msk.f32.mxu1 %vm584_vm0, %v4391_v46  ;;  %v4378_v3 = vmul.f32 %v5098_v60, %v4363_v37 }
0x1214   : > { %v6529_v8 = vpop.eup %6528  ;;  %5987 = vmatmul.mubr.msk.f32.vlgmr.msra.gmra.mrb[76].mxu1 %vm584_vm0, %v4392_v20  ;;  %v4366_v55 = vmul.f32 %v6527_v48, %v7745_v63  ;;  %v4394_v10 = vadd.f32 %v5099_v2, %v4379_v51 }
0x1215   : > { %v4393_v56 = vadd.f32 %v5099_v2, %v4378_v3  ;;  %v4365_v29 = vmul.f32 %v6529_v8, %v7749_v28  ;;  %6309 = vmatpush3.bf16.msra.mxu1 %v6306_v12 }
0x1216   : > { %v4381_v0 = vmul.f32 %v5098_v60, %v4366_v55  ;;  %6311 = vmatprep.subr.bf16.mxu1 %v6310_v13 }
0x1217   : > { %v6531_v16 = vpop.eup %6530  ;;  %5989 = vmatprep.mubr.msk.f32.mxu1 %vm584_vm0, %v4393_v56  ;;  %v4380_v24 = vmul.f32 %v5098_v60, %v4365_v29 }
0x1218   : > { %v6533_v49 = vpop.eup %6532  ;;  %5990 = vmatmul.mubr.msk.f32.gmra.mrb[78].mxu1 %vm584_vm0, %v4394_v10  ;;  %v4368_v58 = vmul.f32 %v6531_v16, %v7757_v5  ;;  %v4396_v9 = vadd.f32 %v5099_v2, %v4381_v0  ;;  %v4585_v5 = vld [vmem:[%s7898_s16 + $0x30] sm:$0xff] }
0x1219   : > { %v4395_v33 = vadd.f32 %v5099_v2, %v4380_v24  ;;  %v4367_v63 = vmul.f32 %v6533_v49, %v7761_v31  ;;  %6313 = vmatpush3.bf16.msra.mxu1 %v6310_v13  ;;  %v4586_v31 = vld [vmem:[%s7898_s16 + $0x38] sm:$0xff] }
0x121a   : > { %v4383_v28 = vmul.f32 %v5098_v60, %v4368_v58  ;;  %6315 = vmatprep.subr.bf16.mxu1 %v6314_v1  ;;  %v6318_v14 = vpack.c.bf16 %v4586_v31, %v4585_v5 }
0x121b   : > { %5992 = vmatprep.mubr.msk.f32.mxu1 %vm584_vm0, %v4395_v33  ;;  %v4382_v12 = vmul.f32 %v5098_v60, %v4367_v63  ;;  %v5100_v60 = vld [vmem:[%s7897_s15] ss:$0 sm:$0xff] }
0x121c   : > { %5993 = vmatmul.mubr.msk.f32.gmra.mrb[80].mxu1 %vm584_vm0, %v4396_v9  ;;  %v4398_v26 = vadd.f32 %v5099_v2, %v4383_v28 }
0x121d   : > { %v4397_v42 = vadd.f32 %v5099_v2, %v4382_v12  ;;  %6317 = vmatpush3.bf16.msra.mxu1 %v6314_v1 }
0x121e   : > { %6319 = vmatprep.subr.bf16.mxu1 %v6318_v14 }
0x121f   : > { %5995 = vmatprep.mubr.msk.f32.mxu1 %vm584_vm0, %v4397_v42 }
0x1220   : > { %5996 = vmatmul.mubr.msk.f32.gmra.mrb[82].mxu1 %vm584_vm0, %v4398_v26 }
0x1221   : > { %6321 = vmatpush3.bf16.msra.mxu1 %v6318_v14 }
0x1222   : > { %6323 = vmatprep.subr.bf16.mxu1 %v6322_v18 }
0x1225   : > { %6325 = vmatpush3.bf16.msra.mxu1 %v6322_v18 }
0x1226   : > { %6327 = vmatprep.subr.bf16.mxu1 %v6326_v53 }
0x1229   : > { %6329 = vmatpush3.bf16.msra.mxu1 %v6326_v53 }
0x122a   : > { %6331 = vmatprep.subr.bf16.mxu1 %v6330_v50 }
0x122d   : > { %6333 = vmatpush3.bf16.msra.mxu1 %v6330_v50 }
0x122e   : > { %6335 = vmatprep.subr.bf16.mxu1 %v6334_v54 }
0x1231   : > { %6337 = vmatpush3.bf16.msra.mxu1 %v6334_v54 }
0x12e7   : > { %v5988_v61 = vpop.f32.mrb[76].mxu1 }
0x12e8   : > { %v4506_v47 = vadd.f32 %v5988_v61, %v5100_v60  ;;  %v4500_v39 = vpop.f32.mrb[77].mxu1  ;;  %v5109_v61 = vld [vmem:[%s7899_s17] ss:$0 sm:$0xff] }
0x12e9   : > { %v4501_v59 = vadd.f32 %v5100_v60, %v4500_v39 }
0x12ea   : > { %v4548_v38 = vmul.f32 0.70710677, %v4506_v47  ;;  %v4540_v16 = vmul.f32 0.5, %v4506_v47 }
0x12eb   : > { %v4547_v2 = vmul.f32 0.70710677, %v4501_v59  ;;  %v5991_v4 = vpop.f32.mrb[78].mxu1  ;;  %v4539_v0 = vmul.f32 0.5, %v4501_v59 }
0x12ec   : > { %6534 = verf.f32 %v4548_v38  ;;  %v4516_v22 = vadd.f32 %v5991_v4, %v5100_v60  ;;  %v4510_v23 = vpop.f32.mrb[79].mxu1 }
0x12ed   : > { %6536 = verf.f32 %v4547_v2  ;;  %v4511_v27 = vadd.f32 %v5100_v60, %v4510_v23 }
0x12ee   : > { %v4550_v25 = vmul.f32 0.70710677, %v4516_v22  ;;  %v4542_v12 = vmul.f32 0.5, %v4516_v22 }
0x12ef   : > { %v4549_v34 = vmul.f32 0.70710677, %v4511_v27  ;;  %v5994_v36 = vpop.f32.mrb[80].mxu1  ;;  %v4541_v9 = vmul.f32 0.5, %v4511_v27 }
0x12f0   : > { %6538 = verf.f32 %v4550_v25  ;;  %v4526_v46 = vadd.f32 %v5994_v36, %v5100_v60  ;;  %v4520_v37 = vpop.f32.mrb[81].mxu1 }
0x12f1   : > { %6540 = verf.f32 %v4549_v34  ;;  %v4521_v20 = vadd.f32 %v5100_v60, %v4520_v37 }
0x12f2   : > { %v4552_v51 = vmul.f32 0.70710677, %v4526_v46  ;;  %v4544_v18 = vmul.f32 0.5, %v4526_v46 }
0x12f3   : > { %v4551_v13 = vmul.f32 0.70710677, %v4521_v20  ;;  %v5997_v48 = vpop.f32.mrb[82].mxu1  ;;  %v4543_v15 = vmul.f32 0.5, %v4521_v20 }
0x12f4   : > { %6542 = verf.f32 %v4552_v51  ;;  %v4536_v3 = vadd.f32 %v5997_v48, %v5100_v60  ;;  %v4530_v7 = vpop.f32.mrb[83].mxu1 }
0x12f5   : > { %6544 = verf.f32 %v4551_v13  ;;  %v4531_v35 = vadd.f32 %v5100_v60, %v4530_v7 }
0x12f6   : > { %v6535_v8 = vpop.eup %6534  ;;  %v4554_v55 = vmul.f32 0.70710677, %v4536_v3  ;;  %v4546_v21 = vmul.f32 0.5, %v4536_v3 }
0x12f7   : > { %v6537_v56 = vpop.eup %6536  ;;  %v4564_v29 = vadd.f32 1.0, %v6535_v8  ;;  %v4553_v10 = vmul.f32 0.70710677, %v4531_v35  ;;  %v4545_v50 = vmul.f32 0.5, %v4531_v35 }
0x12f8   : > { %v4563_v1 = vadd.f32 1.0, %v6537_v56  ;;  %6546 = verf.f32 %v4554_v55 }
0x12f9   : > { %6548 = verf.f32 %v4553_v10  ;;  %v4572_v33 = vmul.f32 %v4564_v29, %v4540_v16 }
0x12fa   : > { %v6539_v24 = vpop.eup %6538  ;;  %v4571_v49 = vmul.f32 %v4563_v1, %v4539_v0 }
0x12fb   : > { %v6541_v58 = vpop.eup %6540  ;;  %v4566_v63 = vadd.f32 1.0, %v6539_v24 }
0x12fc   : > { %v4565_v28 = vadd.f32 1.0, %v6541_v58  ;;  %6030 = vmatprep.mubr.f32.mxu1 %v4571_v49 }
0x12fd   : > { %6031 = vmatmul.mubr.f32.vlgmr.msra.gmra.mrb[84].mxu1 %v4572_v33  ;;  %v4574_v14 = vmul.f32 %v4566_v63, %v4542_v12 }
0x12fe   : > { %v6543_v42 = vpop.eup %6542  ;;  %v4573_v26 = vmul.f32 %v4565_v28, %v4541_v9 }
0x12ff   : > { %v6545_v5 = vpop.eup %6544  ;;  %v4568_v31 = vadd.f32 1.0, %v6543_v42 }
0x1300   : > { %v4567_v17 = vadd.f32 1.0, %v6545_v5  ;;  %6033 = vmatprep.mubr.f32.mxu1 %v4573_v26 }
0x1301   : > { %6034 = vmatmul.mubr.f32.gmra.mrb[86].mxu1 %v4574_v14  ;;  %v4576_v6 = vmul.f32 %v4568_v31, %v4544_v18 }
0x1302   : > { %v6547_v41 = vpop.eup %6546  ;;  %v4575_v45 = vmul.f32 %v4567_v17, %v4543_v15 }
0x1303   : > { %v6549_v53 = vpop.eup %6548  ;;  %v4570_v62 = vadd.f32 1.0, %v6547_v41 }
0x1304   : > { %v4569_v44 = vadd.f32 1.0, %v6549_v53  ;;  %6036 = vmatprep.mubr.f32.mxu1 %v4575_v45 }
0x1305   : > { %6037 = vmatmul.mubr.f32.gmra.mrb[88].mxu1 %v4576_v6  ;;  %v4578_v60 = vmul.f32 %v4570_v62, %v4546_v21 }
0x1306   : > { %v4577_v54 = vmul.f32 %v4569_v44, %v4545_v50 }
0x1308   : > { %6039 = vmatprep.mubr.f32.mxu1 %v4577_v54 }
0x1309   : > { %6040 = vmatmul.mubr.f32.gmra.mrb[90].mxu1 %v4578_v60 }
0x13d0   : > { %v6032_v47 = vpop.f32.mrb[84].mxu1 }
0x13d1   : > { %v4674_v39 = vadd.f32 %v6032_v47, %v5109_v61  ;;  %v4668_v59 = vpop.f32.mrb[85].mxu1 }
0x13d2   : > { %v4669_v38 = vadd.f32 %v5109_v61, %v4668_v59 }
0x13d3   : > { %v4708_v2 = vadd.f32 %v4674_v39, %v7684_v11 }
0x13d4   : > { %v4707_v4 = vadd.f32 %v4669_v38, %v7686_v19  ;;  %v6035_v22 = vpop.f32.mrb[86].mxu1 }
0x13d5   : > { %4716 = vst.msk [vmem:[%s575_s20 + $0x8] sm:$0xff] %vm584_vm0, %v4708_v2  ;;  %v4684_v23 = vadd.f32 %v6035_v22, %v5109_v61  ;;  %v4678_v27 = vpop.f32.mrb[87].mxu1 }
0x13d6   : > { %4715 = vst.msk [vmem:[%s575_s20] sm:$0xff] %vm584_vm0, %v4707_v4  ;;  %v4679_v25 = vadd.f32 %v5109_v61, %v4678_v27 }
0x13d7   : > { %v4710_v34 = vadd.f32 %v4684_v23, %v7694_v43 }
0x13d8   : > { %v4709_v36 = vadd.f32 %v4679_v25, %v7696_v32  ;;  %v6038_v46 = vpop.f32.mrb[88].mxu1 }
0x13d9   : > { %4718 = vst.msk [vmem:[%s575_s20 + $0x18] sm:$0xff] %vm584_vm0, %v4710_v34  ;;  %v4694_v37 = vadd.f32 %v6038_v46, %v5109_v61  ;;  %v4688_v20 = vpop.f32.mrb[89].mxu1 }
0x13da   : > { %4717 = vst.msk [vmem:[%s575_s20 + $0x10] sm:$0xff] %vm584_vm0, %v4709_v36  ;;  %v4689_v11 = vadd.f32 %v5109_v61, %v4688_v20 }
0x13db   : > { %v4712_v19 = vadd.f32 %v4694_v37, %v7704_v40 }
0x13dc   : > { %v4711_v51 = vadd.f32 %v4689_v11, %v7706_v30  ;;  %v6041_v13 = vpop.f32.mrb[90].mxu1 }
0x13dd   : > { %4720 = vst.msk [vmem:[%s575_s20 + $0x28] sm:$0xff] %vm584_vm0, %v4712_v19  ;;  %v4704_v48 = vadd.f32 %v6041_v13, %v5109_v61  ;;  %v4698_v3 = vpop.f32.mrb[91].mxu1 }
0x13de   : > { %4719 = vst.msk [vmem:[%s575_s20 + $0x20] sm:$0xff] %vm584_vm0, %v4711_v51  ;;  %v4699_v43 = vadd.f32 %v5109_v61, %v4698_v3 }
0x13df   : > { %v4714_v32 = vadd.f32 %v4704_v48, %v7714_v52 }
0x13e0   : > { %v4713_v7 = vadd.f32 %v4699_v43, %v7716_v57 }
0x13e1   : > { %4722 = vst.msk [vmem:[%s575_s20 + $0x38] sm:$0xff] %vm584_vm0, %v4714_v32 }
0x13e2   : > { %4721 = vst.msk [vmem:[%s575_s20 + $0x30] sm:$0xff] %vm584_vm0, %v4713_v7 }
0x13e3 PF: > { %s28_s27 = sadd.s32 1, %s6564_s27  }
0x13e4   : > { %p25_p4 = scmp.ge.s32.totalorder %s28_s27, 4  }
0x13e6   :  { %27 = sbr.rel (!%p25_p4) target bundleno = 4 (0x4), region = 146 }

</bundles_post_ra>
